<compile_context>
chip_gen: v5e
topology: v5e:2x2
jax: 0.10.0
libtpu: 0.0.40
codegen_flags: <defaults>
</compile_context>

<pallas_src>
import math
import functools

import jax
import jax.numpy as jnp
from jax.experimental import pallas as pl
from jax.experimental.pallas import tpu as pltpu


NEG_INF = -1e30
_VMEM_LIMIT = 48 * 1024 * 1024


# ----------------------------- in-kernel helpers -----------------------------

def _layernorm(x, g, b):
    # x: (T, D) f32, g/b: (1, D) f32
    mean = jnp.mean(x, axis=-1, keepdims=True)
    var = jnp.mean(jnp.square(x - mean), axis=-1, keepdims=True)
    return (x - mean) * jax.lax.rsqrt(var + 1e-5) * g + b


def _matmul_bias(x, w, b):
    # bf16 MXU matmul, f32 accumulate, f32 bias add.
    return jnp.dot(x.astype(w.dtype), w, preferred_element_type=jnp.float32) + b


def _mha_into(attn_ref, q, k, v, bias, n_head):
    """Multi-head attention; writes the (Tq, D) bf16 result into attn_ref.

    q/k/v: (T*, D) f32 (q is already pre-scaled by 1/sqrt(Dh) because the
    scale was folded into the Q projection weights).  bias: additive mask
    broadcastable to (Tq, Tk) with 0 (attend) / -1e30 (masked).
    Heads write directly into lane slices of the VMEM scratch; q/k/v are cast
    to bf16 once; K is consumed in its native (Tk, Dh) form (no transpose).
    """
    Tq, D = q.shape
    Dh = D // n_head
    qb = q.astype(jnp.bfloat16)
    kb = k.astype(jnp.bfloat16)
    vb = v.astype(jnp.bfloat16)
    # TODO(synk): at realistic Tq/Tk/n_head use lax.fori_loop over heads (or a
    # flash-style Tk-blocked loop) to bound live ranges; a static unroll is
    # fine at this toy size.
    for h in range(n_head):
        lo = h * Dh
        qh = qb[:, lo:lo + Dh]                                     # (Tq, Dh)
        kh = kb[:, lo:lo + Dh]                                     # (Tk, Dh)
        vh = vb[:, lo:lo + Dh]                                     # (Tk, Dh)
        # contract Dh of q with Dh of k (transposed-RHS form, no kh.T).
        s = jax.lax.dot_general(qh, kh, (((1,), (1,)), ((), ())),
                                preferred_element_type=jnp.float32)  # (Tq, Tk)
        s = s + bias
        s = s - jnp.max(s, axis=-1, keepdims=True)
        p = jnp.exp(s)
        p = p * pl.reciprocal(jnp.sum(p, axis=-1, keepdims=True), approx=True)
        o = jax.lax.dot_general(p.astype(jnp.bfloat16), vh,
                                (((1,), (0,)), ((), ())),
                                preferred_element_type=jnp.float32)  # (Tq, Dh)
        attn_ref[:, lo:lo + Dh] = o.astype(jnp.bfloat16)
    return attn_ref[...]


# ----------------------------- fused layer kernels -----------------------------

def _encoder_layer_kernel(x_ref, kpad_ref,
                          ln1g_ref, ln1b_ref, wqkv_ref, bqkv_ref, wo_ref, bo_ref,
                          ln2g_ref, ln2b_ref, w1_ref, b1_ref, w2_ref, b2_ref,
                          o_ref, attn_ref, *, n_head):
    x = x_ref[0].astype(jnp.float32)                       # (T, D)
    D = x.shape[-1]
    bias = jnp.where(kpad_ref[0] > 0.0, 0.0, NEG_INF)      # (1, T) key padding

    # --- self-attention (pre-norm) ---
    h = _layernorm(x, ln1g_ref[...], ln1b_ref[...])
    qkv = _matmul_bias(h, wqkv_ref[...], bqkv_ref[...])    # (T, 3D)
    attn = _mha_into(attn_ref, qkv[:, :D], qkv[:, D:2 * D], qkv[:, 2 * D:],
                     bias, n_head)
    x = x + _matmul_bias(attn, wo_ref[...], bo_ref[...])

    # --- feed-forward (pre-norm) ---
    h = _layernorm(x, ln2g_ref[...], ln2b_ref[...])
    hh = jnp.maximum(_matmul_bias(h, w1_ref[...], b1_ref[...]), 0.0)
    x = x + _matmul_bias(hh, w2_ref[...], b2_ref[...])

    o_ref[0] = x.astype(o_ref.dtype)


def _decoder_layer_kernel(x_ref, enc_ref, tkpad_ref, skpad_ref, tqpad_ref,
                          ln1g_ref, ln1b_ref, sa_wqkv_ref, sa_bqkv_ref,
                          sa_wo_ref, sa_bo_ref,
                          ln2g_ref, ln2b_ref, ca_wq_ref, ca_bq_ref,
                          ca_wkv_ref, ca_bkv_ref, ca_wo_ref, ca_bo_ref,
                          ln3g_ref, ln3b_ref, w1_ref, b1_ref, w2_ref, b2_ref,
                          o_ref, attn_ref, *, n_head):
    x = x_ref[0].astype(jnp.float32)                       # (Tt, D)
    enc = enc_ref[0]                                       # (Ts, D) bf16
    Tt, D = x.shape

    t_key_ok = tkpad_ref[0] > 0.0                          # (1, Tt)
    s_key_ok = skpad_ref[0] > 0.0                          # (1, Ts)
    t_query_ok = tqpad_ref[0] > 0.0                        # (Tt, 1)

    # causal + padding masks built in-kernel (no (Tt,Tt)/(Tt,Ts) HBM reads).
    row = jax.lax.broadcasted_iota(jnp.int32, (Tt, Tt), 0)
    col = jax.lax.broadcasted_iota(jnp.int32, (Tt, Tt), 1)
    sa_bias = jnp.where((row >= col) & t_key_ok, 0.0, NEG_INF)   # (Tt, Tt)
    ca_bias = jnp.where(s_key_ok & t_query_ok, 0.0, NEG_INF)     # (Tt, Ts)

    # --- masked self-attention ---
    h = _layernorm(x, ln1g_ref[...], ln1b_ref[...])
    qkv = _matmul_bias(h, sa_wqkv_ref[...], sa_bqkv_ref[...])    # (Tt, 3D)
    attn = _mha_into(attn_ref, qkv[:, :D], qkv[:, D:2 * D], qkv[:, 2 * D:],
                     sa_bias, n_head)
    x = x + _matmul_bias(attn, sa_wo_ref[...], sa_bo_ref[...])

    # --- cross-attention (keys/values from encoder output) ---
    h = _layernorm(x, ln2g_ref[...], ln2b_ref[...])
    q = _matmul_bias(h, ca_wq_ref[...], ca_bq_ref[...])          # (Tt, D)
    kv = _matmul_bias(enc, ca_wkv_ref[...], ca_bkv_ref[...])     # (Ts, 2D)
    attn = _mha_into(attn_ref, q, kv[:, :D], kv[:, D:], ca_bias, n_head)
    x = x + _matmul_bias(attn, ca_wo_ref[...], ca_bo_ref[...])

    # --- feed-forward ---
    h = _layernorm(x, ln3g_ref[...], ln3b_ref[...])
    hh = jnp.maximum(_matmul_bias(h, w1_ref[...], b1_ref[...]), 0.0)
    x = x + _matmul_bias(hh, w2_ref[...], b2_ref[...])

    o_ref[0] = x.astype(o_ref.dtype)


def _head_logsoftmax_kernel(x_ref, w_ref, b_ref, o_ref):
    # Padded-vocab lm_head + log-softmax. Pad weight cols are 0, pad bias is
    # -1e30, so padded lanes contribute ~0 probability mass.
    logits = jnp.dot(x_ref[...].astype(w_ref.dtype), w_ref[...],
                     preferred_element_type=jnp.float32) + b_ref[...]
    m = jnp.max(logits, axis=-1, keepdims=True)
    z = logits - m
    lse = jnp.log(jnp.sum(jnp.exp(z), axis=-1, keepdims=True))
    o_ref[...] = z - lse


# ----------------------------- pallas_call wrappers -----------------------------

def _rep(shape):
    # whole-array block with a constant index map (stays VMEM-resident).
    # TODO(synk): at production D add pipeline_mode=pl.Buffered(1) so weight
    # blocks are not double-buffered (v7x 64 MiB VMEM budget).
    nd = len(shape)
    return pl.BlockSpec(shape, lambda b: (0,) * nd)


def pallas_encoder_layer(x, src_kpad, p, n_head):
    B, T, D = x.shape
    H4 = p["ff_w1"].shape[1]
    kernel = functools.partial(_encoder_layer_kernel, n_head=n_head)
    in_specs = [
        pl.BlockSpec((1, T, D), lambda b: (b, 0, 0)),     # x (bf16 residual)
        pl.BlockSpec((1, 1, T), lambda b: (b, 0, 0)),     # src key padding
        _rep((1, D)), _rep((1, D)),                       # ln1 g/b
        _rep((D, 3 * D)), _rep((1, 3 * D)),               # wqkv / bqkv
        _rep((D, D)), _rep((1, D)),                       # wo / bo
        _rep((1, D)), _rep((1, D)),                       # ln2 g/b
        _rep((D, H4)), _rep((1, H4)),                     # ff w1 / b1
        _rep((H4, D)), _rep((1, D)),                      # ff w2 / b2
    ]
    return pl.pallas_call(
        kernel,
        grid=(B,),
        out_shape=jax.ShapeDtypeStruct((B, T, D), jnp.bfloat16),
        in_specs=in_specs,
        out_specs=pl.BlockSpec((1, T, D), lambda b: (b, 0, 0)),
        scratch_shapes=[pltpu.VMEM((T, D), jnp.bfloat16)],
        compiler_params=pltpu.CompilerParams(
            dimension_semantics=("parallel",),
            vmem_limit_bytes=_VMEM_LIMIT),
    )(x, src_kpad,
      p["ln1_g"], p["ln1_b"], p["sa"]["wqkv"], p["sa"]["bqkv"],
      p["sa"]["wo"], p["sa"]["bo"],
      p["ln2_g"], p["ln2_b"], p["ff_w1"], p["ff_b1"], p["ff_w2"], p["ff_b2"])


def pallas_decoder_layer(x, enc, tgt_kpad, src_kpad, tgt_qpad, p, n_head):
    B, Tt, D = x.shape
    Ts = enc.shape[1]
    H4 = p["ff_w1"].shape[1]
    kernel = functools.partial(_decoder_layer_kernel, n_head=n_head)
    in_specs = [
        pl.BlockSpec((1, Tt, D), lambda b: (b, 0, 0)),    # x (bf16 residual)
        pl.BlockSpec((1, Ts, D), lambda b: (b, 0, 0)),    # enc (bf16)
        pl.BlockSpec((1, 1, Tt), lambda b: (b, 0, 0)),    # tgt key padding
        pl.BlockSpec((1, 1, Ts), lambda b: (b, 0, 0)),    # src key padding
        pl.BlockSpec((1, Tt, 1), lambda b: (b, 0, 0)),    # tgt query padding
        _rep((1, D)), _rep((1, D)),                       # ln1
        _rep((D, 3 * D)), _rep((1, 3 * D)),               # sa wqkv / bqkv
        _rep((D, D)), _rep((1, D)),                       # sa wo / bo
        _rep((1, D)), _rep((1, D)),                       # ln2
        _rep((D, D)), _rep((1, D)),                       # ca wq / bq
        _rep((D, 2 * D)), _rep((1, 2 * D)),               # ca wkv / bkv
        _rep((D, D)), _rep((1, D)),                       # ca wo / bo
        _rep((1, D)), _rep((1, D)),                       # ln3
        _rep((D, H4)), _rep((1, H4)),                     # ff w1 / b1
        _rep((H4, D)), _rep((1, D)),                      # ff w2 / b2
    ]
    return pl.pallas_call(
        kernel,
        grid=(B,),
        out_shape=jax.ShapeDtypeStruct((B, Tt, D), jnp.bfloat16),
        in_specs=in_specs,
        out_specs=pl.BlockSpec((1, Tt, D), lambda b: (b, 0, 0)),
        scratch_shapes=[pltpu.VMEM((Tt, D), jnp.bfloat16)],
        compiler_params=pltpu.CompilerParams(
            dimension_semantics=("parallel",),
            vmem_limit_bytes=_VMEM_LIMIT),
    )(x, enc, tgt_kpad, src_kpad, tgt_qpad,
      p["ln1_g"], p["ln1_b"],
      p["sa"]["wqkv"], p["sa"]["bqkv"], p["sa"]["wo"], p["sa"]["bo"],
      p["ln2_g"], p["ln2_b"],
      p["ca"]["wq"], p["ca"]["bq"], p["ca"]["wkv"], p["ca"]["bkv"],
      p["ca"]["wo"], p["ca"]["bo"],
      p["ln3_g"], p["ln3_b"],
      p["ff_w1"], p["ff_b1"], p["ff_w2"], p["ff_b2"])


def pallas_lm_head_logsoftmax(x2d, w_pad, b_pad):
    M, D = x2d.shape
    Vp = w_pad.shape[1]
    tm = M
    for cand in (512, 256, 128, 64, 32, 16, 8):   # biggest row tile that divides M
        if M % cand == 0:
            tm = cand
            break
    # TODO(synk): at production vocab (V ~ 32k, D >= 1024) tile the vocab axis
    # on a second grid dimension with an online logsumexp; the (D, Vp) weight
    # block here is tiny.
    return pl.pallas_call(
        _head_logsoftmax_kernel,
        grid=(M // tm,),
        out_shape=jax.ShapeDtypeStruct((M, Vp), jnp.float32),
        in_specs=[pl.BlockSpec((tm, D), lambda i: (i, 0)),
                  pl.BlockSpec((D, Vp), lambda i: (0, 0)),
                  pl.BlockSpec((1, Vp), lambda i: (0, 0))],
        out_specs=pl.BlockSpec((tm, Vp), lambda i: (i, 0)),
        compiler_params=pltpu.CompilerParams(
            dimension_semantics=("parallel",),
            vmem_limit_bytes=_VMEM_LIMIT),
    )(x2d, w_pad, b_pad)


# ------------------------------ model glue ------------------------------

def positional_encoding(T, D):
    pos = jnp.arange(T, dtype=jnp.float32)[:, None]
    i = jnp.arange(0, D, 2, dtype=jnp.float32)
    div = jnp.exp(-math.log(10000.0) * i / D)
    pe = jnp.zeros((T, D), jnp.float32)
    pe = pe.at[:, 0::2].set(jnp.sin(pos * div))
    pe = pe.at[:, 1::2].set(jnp.cos(pos * div))
    return pe


def transformer_forward(params, src, targets, *, n_head, n_layer, vocab_y):
    """Forward pass.  Masks follow the reference construction exactly
    (src != 0 key padding, targets != 0 key/query padding, lower-triangular
    no-peek), but only compact per-axis padding masks cross the HBM boundary;
    the combined (Tt,Tt)/(Tt,Ts) masks are formed inside the kernels."""
    B, Ts = src.shape
    _, Tt = targets.shape
    D = params["tok_x"].shape[1]

    # token embedding (gather) + sinusoidal positional encoding (XLA glue).
    # TODO(synk): embedding gather kept in XLA; a Pallas DMA-gather is overkill here.
    x = jnp.take(params["tok_x"], src, axis=0) + positional_encoding(Ts, D)[None]
    y = jnp.take(params["tok_y"], targets, axis=0) + positional_encoding(Tt, D)[None]

    # bf16 residual stream between layers (halves layer-boundary HBM traffic).
    x = x.astype(jnp.bfloat16)
    y = y.astype(jnp.bfloat16)

    src_kpad = (src != 0).astype(jnp.float32)[:, None, :]       # (B, 1, Ts)
    tgt_kpad = (targets != 0).astype(jnp.float32)[:, None, :]   # (B, 1, Tt)
    tgt_qpad = (targets != 0).astype(jnp.float32)[:, :, None]   # (B, Tt, 1)

    enc = x
    for l in range(n_layer):
        enc = pallas_encoder_layer(enc, src_kpad, params["enc"][l], n_head)

    dec = y
    for l in range(n_layer):
        dec = pallas_decoder_layer(dec, enc, tgt_kpad, src_kpad, tgt_qpad,
                                   params["dec"][l], n_head)

    logp = pallas_lm_head_logsoftmax(dec.reshape(B * Tt, D),
                                     params["lm_w"], params["lm_b"])
    return logp[:, :vocab_y].reshape(B, Tt, vocab_y)


# ------------------------- deterministic parameters -------------------------

def init_params(key, n_embed, n_head, vocab_x, vocab_y, n_layer):
    keys = iter(jax.random.split(key, 512))
    D = n_embed
    H4 = 4 * D
    q_scale = 1.0 / math.sqrt(D // n_head)   # folded into the Q projection

    def norm_f32(shape, scale=0.02):
        return scale * jax.random.normal(next(keys), shape, dtype=jnp.float32)

    def sa_p():
        # fold 1/sqrt(Dh) into the Q columns (weights AND bias) so the kernel
        # never multiplies q by the scale.
        wqkv = norm_f32((D, 3 * D)).at[:, :D].multiply(q_scale)
        bqkv = jnp.zeros((1, 3 * D), jnp.float32).at[:, :D].multiply(q_scale)
        return {"wqkv": wqkv.astype(jnp.bfloat16), "bqkv": bqkv,
                "wo": norm_f32((D, D)).astype(jnp.bfloat16),
                "bo": jnp.zeros((1, D), jnp.float32)}

    def ca_p():
        return {"wq": (norm_f32((D, D)) * q_scale).astype(jnp.bfloat16),
                "bq": jnp.zeros((1, D), jnp.float32) * q_scale,
                "wkv": norm_f32((D, 2 * D)).astype(jnp.bfloat16),
                "bkv": jnp.zeros((1, 2 * D), jnp.float32),
                "wo": norm_f32((D, D)).astype(jnp.bfloat16),
                "bo": jnp.zeros((1, D), jnp.float32)}

    def ln_p():
        return jnp.ones((1, D), jnp.float32), jnp.zeros((1, D), jnp.float32)

    def ff_p():
        return {"ff_w1": norm_f32((D, H4)).astype(jnp.bfloat16),
                "ff_b1": jnp.zeros((1, H4), jnp.float32),
                "ff_w2": norm_f32((H4, D)).astype(jnp.bfloat16),
                "ff_b2": jnp.zeros((1, D), jnp.float32)}

    enc_layers, dec_layers = [], []
    for _ in range(n_layer):
        g1, b1 = ln_p(); g2, b2 = ln_p()
        enc_layers.append({"sa": sa_p(), "ln1_g": g1, "ln1_b": b1,
                           "ln2_g": g2, "ln2_b": b2, **ff_p()})
    for _ in range(n_layer):
        g1, b1 = ln_p(); g2, b2 = ln_p(); g3, b3 = ln_p()
        dec_layers.append({"sa": sa_p(), "ca": ca_p(),
                           "ln1_g": g1, "ln1_b": b1, "ln2_g": g2, "ln2_b": b2,
                           "ln3_g": g3, "ln3_b": b3, **ff_p()})

    # lm_head: pad vocab up to a multiple of 128 lanes (zero weight cols,
    # -1e30 pad bias so padded lanes vanish from the log-softmax).
    Vp = ((vocab_y + 127) // 128) * 128
    lm_w = norm_f32((D, vocab_y))
    lm_w_pad = jnp.zeros((D, Vp), jnp.float32).at[:, :vocab_y].set(lm_w)
    lm_b_pad = jnp.full((1, Vp), NEG_INF, jnp.float32).at[:, :vocab_y].set(0.0)

    return {"tok_x": norm_f32((vocab_x, D)),
            "tok_y": norm_f32((vocab_y, D)),
            "enc": enc_layers, "dec": dec_layers,
            "lm_w": lm_w_pad.astype(jnp.bfloat16),
            "lm_b": lm_b_pad}


# --------------------------------- main ---------------------------------

if __name__ == "__main__":
    N_EMBED, N_HEAD, BLOCK_SIZE, N_LAYER = 32, 4, 8, 2
    VOCAB_X, VOCAB_Y = 11, 13
    B, Ts, Tt = 2, BLOCK_SIZE, BLOCK_SIZE

    key = jax.random.PRNGKey(0)
    kp, ks, kt = jax.random.split(key, 3)
    params = init_params(kp, N_EMBED, N_HEAD, VOCAB_X, VOCAB_Y, N_LAYER)

    src = jax.random.randint(ks, (B, Ts), 1, VOCAB_X, dtype=jnp.int32)
    targets = jax.random.randint(kt, (B, Tt), 1, VOCAB_Y, dtype=jnp.int32)

    fwd = jax.jit(functools.partial(transformer_forward,
                                    n_head=N_HEAD, n_layer=N_LAYER,
                                    vocab_y=VOCAB_Y))
    logits = fwd(params, src, targets)
    logits = jax.block_until_ready(logits)

    assert logits.shape == (B, Tt, VOCAB_Y)
    assert bool(jnp.all(jnp.isfinite(logits)))
    # log-softmax rows must sum (in prob space) to 1
    assert bool(jnp.allclose(jnp.sum(jnp.exp(logits), axis=-1), 1.0, atol=1e-4))
    print("KERNEL_OK")
</pallas_src>

<mosaic_0001>
module attributes {stable_mosaic.version = 11 : i64} {
  func.func @_head_logsoftmax_kernel(%arg0: i32, %arg1: memref<16x32xbf16, #tpu.memory_space<vmem>>, %arg2: memref<32x128xbf16, #tpu.memory_space<vmem>>, %arg3: memref<1x128xf32, #tpu.memory_space<vmem>>, %arg4: memref<16x128xf32, #tpu.memory_space<vmem>>) attributes {dimension_semantics = [#tpu.dimension_semantics<parallel>], iteration_bounds = array<i64: 1>, scalar_prefetch = 0 : i64, scratch_operands = 0 : i64, tpu.core_type = #tpu.core_type<tc>, window_params = [{transform_indices = @transform_0, window_bounds = array<i64: 16, 32>}, {pipeline_mode = #tpu.pipeline_mode<synchronous>, transform_indices = @transform_1, window_bounds = array<i64: 32, 128>}, {pipeline_mode = #tpu.pipeline_mode<synchronous>, transform_indices = @transform_2, window_bounds = array<i64: 1, 128>}, {transform_indices = @transform_3, window_bounds = array<i64: 16, 128>}]} {
    %c0 = arith.constant 0 : index
    %c0_0 = arith.constant 0 : index
    %0 = vector.load %arg1[%c0, %c0_0] : memref<16x32xbf16, #tpu.memory_space<vmem>>, vector<16x32xbf16>
    %c0_1 = arith.constant 0 : index
    %c0_2 = arith.constant 0 : index
    %1 = vector.load %arg2[%c0_1, %c0_2] : memref<32x128xbf16, #tpu.memory_space<vmem>>, vector<32x128xbf16>
    %cst = arith.constant dense<0.000000e+00> : vector<16x128xf32>
    %2 = tpu.matmul %0, %1, %cst {dimension_numbers = #tpu.dot_dimension_numbers<[1], [0], [0], [1], [0, 0, 1, 1], [], []>} : vector<16x32xbf16>, vector<32x128xbf16>, vector<16x128xf32> -> vector<16x128xf32>
    %c0_3 = arith.constant 0 : index
    %c0_4 = arith.constant 0 : index
    %3 = vector.load %arg3[%c0_3, %c0_4] : memref<1x128xf32, #tpu.memory_space<vmem>>, vector<1x128xf32>
    %4 = vector.broadcast %3 : vector<1x128xf32> to vector<16x128xf32>
    %5 = arith.addf %2, %4 : vector<16x128xf32>
    %cst_5 = arith.constant dense<0xFF800000> : vector<16xf32>
    %6 = vector.multi_reduction <maximumf>, %5, %cst_5 [1] : vector<16x128xf32> to vector<16xf32>
    %7 = vector.shape_cast %6 : vector<16xf32> to vector<16x1xf32>
    %8 = vector.broadcast %7 : vector<16x1xf32> to vector<16x128xf32>
    %9 = arith.subf %5, %8 : vector<16x128xf32>
    %10 = math.exp %9 : vector<16x128xf32>
    %cst_6 = arith.constant dense<0.000000e+00> : vector<16xf32>
    %11 = vector.multi_reduction <add>, %10, %cst_6 [1] : vector<16x128xf32> to vector<16xf32>
    %12 = vector.shape_cast %11 : vector<16xf32> to vector<16x1xf32>
    %13 = math.log %12 : vector<16x1xf32>
    %14 = vector.broadcast %13 : vector<16x1xf32> to vector<16x128xf32>
    %15 = arith.subf %9, %14 : vector<16x128xf32>
    %c0_7 = arith.constant 0 : index
    %c0_8 = arith.constant 0 : index
    %16 = vector.load %arg4[%c0_7, %c0_8] : memref<16x128xf32, #tpu.memory_space<vmem>>, vector<16x128xf32>
    tpu.vector_store %arg4[%c0_7, %c0_8], %15 {strides = array<i32>} : memref<16x128xf32, #tpu.memory_space<vmem>>, vector<16x128xf32>,
    return
  }
  func.func @transform_0(%arg0: i32) -> (i32, i32) {
    %c0_i32 = arith.constant 0 : i32
    %c0_i32_0 = arith.constant 0 : i32
    return %arg0, %c0_i32 : i32, i32
  }
  func.func @transform_1(%arg0: i32) -> (i32, i32) {
    %c0_i32 = arith.constant 0 : i32
    %c0_i32_0 = arith.constant 0 : i32
    %c0_i32_1 = arith.constant 0 : i32
    return %c0_i32, %c0_i32_0 : i32, i32
  }
  func.func @transform_2(%arg0: i32) -> (i32, i32) {
    %c0_i32 = arith.constant 0 : i32
    %c0_i32_0 = arith.constant 0 : i32
    %c0_i32_1 = arith.constant 0 : i32
    return %c0_i32, %c0_i32_0 : i32, i32
  }
  func.func @transform_3(%arg0: i32) -> (i32, i32) {
    %c0_i32 = arith.constant 0 : i32
    %c0_i32_0 = arith.constant 0 : i32
    return %arg0, %c0_i32 : i32, i32
  }
}

module attributes {stable_mosaic.version = 11 : i64} {
  func.func @_encoder_layer_kernel(%arg0: i32, %arg1: memref<1x8x32xbf16, #tpu.memory_space<vmem>>, %arg2: memref<1x1x8xf32, #tpu.memory_space<vmem>>, %arg3: memref<1x32xf32, #tpu.memory_space<vmem>>, %arg4: memref<1x32xf32, #tpu.memory_space<vmem>>, %arg5: memref<32x96xbf16, #tpu.memory_space<vmem>>, %arg6: memref<1x96xf32, #tpu.memory_space<vmem>>, %arg7: memref<32x32xbf16, #tpu.memory_space<vmem>>, %arg8: memref<1x32xf32, #tpu.memory_space<vmem>>, %arg9: memref<1x32xf32, #tpu.memory_space<vmem>>, %arg10: memref<1x32xf32, #tpu.memory_space<vmem>>, %arg11: memref<32x128xbf16, #tpu.memory_space<vmem>>, %arg12: memref<1x128xf32, #tpu.memory_space<vmem>>, %arg13: memref<128x32xbf16, #tpu.memory_space<vmem>>, %arg14: memref<1x32xf32, #tpu.memory_space<vmem>>, %arg15: memref<1x8x32xbf16, #tpu.memory_space<vmem>>, %arg16: memref<8x32xbf16, #tpu.memory_space<vmem>>) attributes {dimension_semantics = [#tpu.dimension_semantics<parallel>], iteration_bounds = array<i64: 2>, scalar_prefetch = 0 : i64, scratch_operands = 1 : i64, tpu.core_type = #tpu.core_type<tc>, window_params = [{transform_indices = @transform_0, window_bounds = array<i64: 1, 8, 32>}, {transform_indices = @transform_1, window_bounds = array<i64: 1, 1, 8>}, {pipeline_mode = #tpu.pipeline_mode<synchronous>, transform_indices = @transform_2, window_bounds = array<i64: 1, 32>}, {pipeline_mode = #tpu.pipeline_mode<synchronous>, transform_indices = @transform_3, window_bounds = array<i64: 1, 32>}, {pipeline_mode = #tpu.pipeline_mode<synchronous>, transform_indices = @transform_4, window_bounds = array<i64: 32, 96>}, {pipeline_mode = #tpu.pipeline_mode<synchronous>, transform_indices = @transform_5, window_bounds = array<i64: 1, 96>}, {pipeline_mode = #tpu.pipeline_mode<synchronous>, transform_indices = @transform_6, window_bounds = array<i64: 32, 32>}, {pipeline_mode = #tpu.pipeline_mode<synchronous>, transform_indices = @transform_7, window_bounds = array<i64: 1, 32>}, {pipeline_mode = #tpu.pipeline_mode<synchronous>, transform_indices = @transform_8, window_bounds = array<i64: 1, 32>}, {pipeline_mode = #tpu.pipeline_mode<synchronous>, transform_indices = @transform_9, window_bounds = array<i64: 1, 32>}, {pipeline_mode = #tpu.pipeline_mode<synchronous>, transform_indices = @transform_10, window_bounds = array<i64: 32, 128>}, {pipeline_mode = #tpu.pipeline_mode<synchronous>, transform_indices = @transform_11, window_bounds = array<i64: 1, 128>}, {pipeline_mode = #tpu.pipeline_mode<synchronous>, transform_indices = @transform_12, window_bounds = array<i64: 128, 32>}, {pipeline_mode = #tpu.pipeline_mode<synchronous>, transform_indices = @transform_13, window_bounds = array<i64: 1, 32>}, {transform_indices = @transform_14, window_bounds = array<i64: 1, 8, 32>}]} {
    %c0 = arith.constant 0 : index
    %c0_0 = arith.constant 0 : index
    %c0_1 = arith.constant 0 : index
    %0 = vector.load %arg1[%c0, %c0_0, %c0_1] : memref<1x8x32xbf16, #tpu.memory_space<vmem>>, vector<1x8x32xbf16>
    %1 = vector.shape_cast %0 : vector<1x8x32xbf16> to vector<8x32xbf16>
    %2 = arith.extf %1 : vector<8x32xbf16> to vector<8x32xf32>
    %c0_2 = arith.constant 0 : index
    %c0_3 = arith.constant 0 : index
    %c0_4 = arith.constant 0 : index
    %3 = vector.load %arg2[%c0_2, %c0_3, %c0_4] : memref<1x1x8xf32, #tpu.memory_space<vmem>>, vector<1x1x8xf32>
    %4 = vector.shape_cast %3 : vector<1x1x8xf32> to vector<1x8xf32>
    %cst = arith.constant 0.000000e+00 : f32
    %5 = vector.broadcast %cst : f32 to vector<1x8xf32>
    %6 = arith.cmpf ogt, %4, %5 : vector<1x8xf32>
    %cst_5 = arith.constant 0.000000e+00 : f32
    %cst_6 = arith.constant -1.000000e+30 : f32
    %7 = vector.broadcast %cst_5 : f32 to vector<1x8xf32>
    %8 = vector.broadcast %cst_6 : f32 to vector<1x8xf32>
    %9 = arith.select %6, %7, %8 : vector<1x8xi1>, vector<1x8xf32>
    %c0_7 = arith.constant 0 : index
    %c0_8 = arith.constant 0 : index
    %10 = vector.load %arg3[%c0_7, %c0_8] : memref<1x32xf32, #tpu.memory_space<vmem>>, vector<1x32xf32>
    %c0_9 = arith.constant 0 : index
    %c0_10 = arith.constant 0 : index
    %11 = vector.load %arg4[%c0_9, %c0_10] : memref<1x32xf32, #tpu.memory_space<vmem>>, vector<1x32xf32>
    %cst_11 = arith.constant dense<0.000000e+00> : vector<8xf32>
    %12 = vector.multi_reduction <add>, %2, %cst_11 [1] : vector<8x32xf32> to vector<8xf32>
    %13 = vector.shape_cast %12 : vector<8xf32> to vector<8x1xf32>
    %cst_12 = arith.constant 3.200000e+01 : f32
    %14 = vector.broadcast %cst_12 : f32 to vector<8x1xf32>
    %15 = arith.divf %13, %14 : vector<8x1xf32>
    %16 = vector.broadcast %15 : vector<8x1xf32> to vector<8x32xf32>
    %17 = arith.subf %2, %16 : vector<8x32xf32>
    %18 = arith.mulf %17, %17 : vector<8x32xf32>
    %cst_13 = arith.constant dense<0.000000e+00> : vector<8xf32>
    %19 = vector.multi_reduction <add>, %18, %cst_13 [1] : vector<8x32xf32> to vector<8xf32>
    %20 = vector.shape_cast %19 : vector<8xf32> to vector<8x1xf32>
    %cst_14 = arith.constant 3.200000e+01 : f32
    %21 = vector.broadcast %cst_14 : f32 to vector<8x1xf32>
    %22 = arith.divf %20, %21 : vector<8x1xf32>
    %23 = vector.broadcast %15 : vector<8x1xf32> to vector<8x32xf32>
    %24 = arith.subf %2, %23 : vector<8x32xf32>
    %cst_15 = arith.constant 9.99999974E-6 : f32
    %25 = vector.broadcast %cst_15 : f32 to vector<8x1xf32>
    %26 = arith.addf %22, %25 : vector<8x1xf32>
    %27 = math.rsqrt %26 : vector<8x1xf32>
    %28 = vector.broadcast %27 : vector<8x1xf32> to vector<8x32xf32>
    %29 = arith.mulf %24, %28 : vector<8x32xf32>
    %30 = vector.broadcast %10 : vector<1x32xf32> to vector<8x32xf32>
    %31 = arith.mulf %29, %30 : vector<8x32xf32>
    %32 = vector.broadcast %11 : vector<1x32xf32> to vector<8x32xf32>
    %33 = arith.addf %31, %32 : vector<8x32xf32>
    %c0_16 = arith.constant 0 : index
    %c0_17 = arith.constant 0 : index
    %34 = vector.load %arg5[%c0_16, %c0_17] : memref<32x96xbf16, #tpu.memory_space<vmem>>, vector<32x96xbf16>
    %c0_18 = arith.constant 0 : index
    %c0_19 = arith.constant 0 : index
    %35 = vector.load %arg6[%c0_18, %c0_19] : memref<1x96xf32, #tpu.memory_space<vmem>>, vector<1x96xf32>
    %36 = arith.truncf %33 : vector<8x32xf32> to vector<8x32xbf16>
    %cst_20 = arith.constant dense<0.000000e+00> : vector<8x96xf32>
    %37 = tpu.matmul %36, %34, %cst_20 {dimension_numbers = #tpu.dot_dimension_numbers<[1], [0], [0], [1], [0, 0, 1, 1], [], []>} : vector<8x32xbf16>, vector<32x96xbf16>, vector<8x96xf32> -> vector<8x96xf32>
    %38 = vector.broadcast %35 : vector<1x96xf32> to vector<8x96xf32>
    %39 = arith.addf %37, %38 : vector<8x96xf32>
    %40 = vector.extract_strided_slice %39 {offsets = [0, 0], sizes = [8, 32], strides = [1, 1]} : vector<8x96xf32> to vector<8x32xf32>
    %41 = vector.extract_strided_slice %39 {offsets = [0, 32], sizes = [8, 32], strides = [1, 1]} : vector<8x96xf32> to vector<8x32xf32>
    %42 = vector.extract_strided_slice %39 {offsets = [0, 64], sizes = [8, 32], strides = [1, 1]} : vector<8x96xf32> to vector<8x32xf32>
    %43 = arith.truncf %40 : vector<8x32xf32> to vector<8x32xbf16>
    %44 = arith.truncf %41 : vector<8x32xf32> to vector<8x32xbf16>
    %45 = arith.truncf %42 : vector<8x32xf32> to vector<8x32xbf16>
    %46 = vector.extract_strided_slice %43 {offsets = [0, 0], sizes = [8, 8], strides = [1, 1]} : vector<8x32xbf16> to vector<8x8xbf16>
    %47 = vector.extract_strided_slice %44 {offsets = [0, 0], sizes = [8, 8], strides = [1, 1]} : vector<8x32xbf16> to vector<8x8xbf16>
    %48 = vector.extract_strided_slice %45 {offsets = [0, 0], sizes = [8, 8], strides = [1, 1]} : vector<8x32xbf16> to vector<8x8xbf16>
    %cst_21 = arith.constant dense<0.000000e+00> : vector<8x8xf32>
    %49 = tpu.matmul %46, %47, %cst_21 {dimension_numbers = #tpu.dot_dimension_numbers<[1], [1], [0], [0], [0, 0, 1, 0], [], []>} : vector<8x8xbf16>, vector<8x8xbf16>, vector<8x8xf32> -> vector<8x8xf32>
    %50 = vector.broadcast %9 : vector<1x8xf32> to vector<8x8xf32>
    %51 = arith.addf %49, %50 : vector<8x8xf32>
    %cst_22 = arith.constant dense<0xFF800000> : vector<8xf32>
    %52 = vector.multi_reduction <maximumf>, %51, %cst_22 [1] : vector<8x8xf32> to vector<8xf32>
    %53 = vector.shape_cast %52 : vector<8xf32> to vector<8x1xf32>
    %54 = vector.broadcast %53 : vector<8x1xf32> to vector<8x8xf32>
    %55 = arith.subf %51, %54 : vector<8x8xf32>
    %56 = math.exp %55 : vector<8x8xf32>
    %cst_23 = arith.constant dense<0.000000e+00> : vector<8xf32>
    %57 = vector.multi_reduction <add>, %56, %cst_23 [1] : vector<8x8xf32> to vector<8xf32>
    %58 = vector.shape_cast %57 : vector<8xf32> to vector<8x1xf32>
    %59 = tpu.reciprocal %58 {approx = true} : vector<8x1xf32> -> vector<8x1xf32>
    %60 = vector.broadcast %59 : vector<8x1xf32> to vector<8x8xf32>
    %61 = arith.mulf %56, %60 : vector<8x8xf32>
    %62 = arith.truncf %61 : vector<8x8xf32> to vector<8x8xbf16>
    %cst_24 = arith.constant dense<0.000000e+00> : vector<8x8xf32>
    %63 = tpu.matmul %62, %48, %cst_24 {dimension_numbers = #tpu.dot_dimension_numbers<[1], [0], [0], [1], [0, 0, 1, 1], [], []>} : vector<8x8xbf16>, vector<8x8xbf16>, vector<8x8xf32> -> vector<8x8xf32>
    %64 = arith.truncf %63 : vector<8x8xf32> to vector<8x8xbf16>
    %c0_25 = arith.constant 0 : index
    %c0_26 = arith.constant 0 : index
    %65 = vector.load %arg16[%c0_25, %c0_26] : memref<8x32xbf16, #tpu.memory_space<vmem>>, vector<8x8xbf16>
    tpu.vector_store %arg16[%c0_25, %c0_26], %64 {strides = array<i32>} : memref<8x32xbf16, #tpu.memory_space<vmem>>, vector<8x8xbf16>,
    %66 = vector.extract_strided_slice %43 {offsets = [0, 8], sizes = [8, 8], strides = [1, 1]} : vector<8x32xbf16> to vector<8x8xbf16>
    %67 = vector.extract_strided_slice %44 {offsets = [0, 8], sizes = [8, 8], strides = [1, 1]} : vector<8x32xbf16> to vector<8x8xbf16>
    %68 = vector.extract_strided_slice %45 {offsets = [0, 8], sizes = [8, 8], strides = [1, 1]} : vector<8x32xbf16> to vector<8x8xbf16>
    %cst_27 = arith.constant dense<0.000000e+00> : vector<8x8xf32>
    %69 = tpu.matmul %66, %67, %cst_27 {dimension_numbers = #tpu.dot_dimension_numbers<[1], [1], [0], [0], [0, 0, 1, 0], [], []>} : vector<8x8xbf16>, vector<8x8xbf16>, vector<8x8xf32> -> vector<8x8xf32>
    %70 = vector.broadcast %9 : vector<1x8xf32> to vector<8x8xf32>
    %71 = arith.addf %69, %70 : vector<8x8xf32>
    %cst_28 = arith.constant dense<0xFF800000> : vector<8xf32>
    %72 = vector.multi_reduction <maximumf>, %71, %cst_28 [1] : vector<8x8xf32> to vector<8xf32>
    %73 = vector.shape_cast %72 : vector<8xf32> to vector<8x1xf32>
    %74 = vector.broadcast %73 : vector<8x1xf32> to vector<8x8xf32>
    %75 = arith.subf %71, %74 : vector<8x8xf32>
    %76 = math.exp %75 : vector<8x8xf32>
    %cst_29 = arith.constant dense<0.000000e+00> : vector<8xf32>
    %77 = vector.multi_reduction <add>, %76, %cst_29 [1] : vector<8x8xf32> to vector<8xf32>
    %78 = vector.shape_cast %77 : vector<8xf32> to vector<8x1xf32>
    %79 = tpu.reciprocal %78 {approx = true} : vector<8x1xf32> -> vector<8x1xf32>
    %80 = vector.broadcast %79 : vector<8x1xf32> to vector<8x8xf32>
    %81 = arith.mulf %76, %80 : vector<8x8xf32>
    %82 = arith.truncf %81 : vector<8x8xf32> to vector<8x8xbf16>
    %cst_30 = arith.constant dense<0.000000e+00> : vector<8x8xf32>
    %83 = tpu.matmul %82, %68, %cst_30 {dimension_numbers = #tpu.dot_dimension_numbers<[1], [0], [0], [1], [0, 0, 1, 1], [], []>} : vector<8x8xbf16>, vector<8x8xbf16>, vector<8x8xf32> -> vector<8x8xf32>
    %84 = arith.truncf %83 : vector<8x8xf32> to vector<8x8xbf16>
    %c0_31 = arith.constant 0 : index
    %c8 = arith.constant 8 : index
    %85 = vector.load %arg16[%c0_31, %c8] : memref<8x32xbf16, #tpu.memory_space<vmem>>, vector<8x8xbf16>
    tpu.vector_store %arg16[%c0_31, %c8], %84 {strides = array<i32>} : memref<8x32xbf16, #tpu.memory_space<vmem>>, vector<8x8xbf16>,
    %86 = vector.extract_strided_slice %43 {offsets = [0, 16], sizes = [8, 8], strides = [1, 1]} : vector<8x32xbf16> to vector<8x8xbf16>
    %87 = vector.extract_strided_slice %44 {offsets = [0, 16], sizes = [8, 8], strides = [1, 1]} : vector<8x32xbf16> to vector<8x8xbf16>
    %88 = vector.extract_strided_slice %45 {offsets = [0, 16], sizes = [8, 8], strides = [1, 1]} : vector<8x32xbf16> to vector<8x8xbf16>
    %cst_32 = arith.constant dense<0.000000e+00> : vector<8x8xf32>
    %89 = tpu.matmul %86, %87, %cst_32 {dimension_numbers = #tpu.dot_dimension_numbers<[1], [1], [0], [0], [0, 0, 1, 0], [], []>} : vector<8x8xbf16>, vector<8x8xbf16>, vector<8x8xf32> -> vector<8x8xf32>
    %90 = vector.broadcast %9 : vector<1x8xf32> to vector<8x8xf32>
    %91 = arith.addf %89, %90 : vector<8x8xf32>
    %cst_33 = arith.constant dense<0xFF800000> : vector<8xf32>
    %92 = vector.multi_reduction <maximumf>, %91, %cst_33 [1] : vector<8x8xf32> to vector<8xf32>
    %93 = vector.shape_cast %92 : vector<8xf32> to vector<8x1xf32>
    %94 = vector.broadcast %93 : vector<8x1xf32> to vector<8x8xf32>
    %95 = arith.subf %91, %94 : vector<8x8xf32>
    %96 = math.exp %95 : vector<8x8xf32>
    %cst_34 = arith.constant dense<0.000000e+00> : vector<8xf32>
    %97 = vector.multi_reduction <add>, %96, %cst_34 [1] : vector<8x8xf32> to vector<8xf32>
    %98 = vector.shape_cast %97 : vector<8xf32> to vector<8x1xf32>
    %99 = tpu.reciprocal %98 {approx = true} : vector<8x1xf32> -> vector<8x1xf32>
    %100 = vector.broadcast %99 : vector<8x1xf32> to vector<8x8xf32>
    %101 = arith.mulf %96, %100 : vector<8x8xf32>
    %102 = arith.truncf %101 : vector<8x8xf32> to vector<8x8xbf16>
    %cst_35 = arith.constant dense<0.000000e+00> : vector<8x8xf32>
    %103 = tpu.matmul %102, %88, %cst_35 {dimension_numbers = #tpu.dot_dimension_numbers<[1], [0], [0], [1], [0, 0, 1, 1], [], []>} : vector<8x8xbf16>, vector<8x8xbf16>, vector<8x8xf32> -> vector<8x8xf32>
    %104 = arith.truncf %103 : vector<8x8xf32> to vector<8x8xbf16>
    %c0_36 = arith.constant 0 : index
    %c16 = arith.constant 16 : index
    %105 = vector.load %arg16[%c0_36, %c16] : memref<8x32xbf16, #tpu.memory_space<vmem>>, vector<8x8xbf16>
    tpu.vector_store %arg16[%c0_36, %c16], %104 {strides = array<i32>} : memref<8x32xbf16, #tpu.memory_space<vmem>>, vector<8x8xbf16>,
    %106 = vector.extract_strided_slice %43 {offsets = [0, 24], sizes = [8, 8], strides = [1, 1]} : vector<8x32xbf16> to vector<8x8xbf16>
    %107 = vector.extract_strided_slice %44 {offsets = [0, 24], sizes = [8, 8], strides = [1, 1]} : vector<8x32xbf16> to vector<8x8xbf16>
    %108 = vector.extract_strided_slice %45 {offsets = [0, 24], sizes = [8, 8], strides = [1, 1]} : vector<8x32xbf16> to vector<8x8xbf16>
    %cst_37 = arith.constant dense<0.000000e+00> : vector<8x8xf32>
    %109 = tpu.matmul %106, %107, %cst_37 {dimension_numbers = #tpu.dot_dimension_numbers<[1], [1], [0], [0], [0, 0, 1, 0], [], []>} : vector<8x8xbf16>, vector<8x8xbf16>, vector<8x8xf32> -> vector<8x8xf32>
    %110 = vector.broadcast %9 : vector<1x8xf32> to vector<8x8xf32>
    %111 = arith.addf %109, %110 : vector<8x8xf32>
    %cst_38 = arith.constant dense<0xFF800000> : vector<8xf32>
    %112 = vector.multi_reduction <maximumf>, %111, %cst_38 [1] : vector<8x8xf32> to vector<8xf32>
    %113 = vector.shape_cast %112 : vector<8xf32> to vector<8x1xf32>
    %114 = vector.broadcast %113 : vector<8x1xf32> to vector<8x8xf32>
    %115 = arith.subf %111, %114 : vector<8x8xf32>
    %116 = math.exp %115 : vector<8x8xf32>
    %cst_39 = arith.constant dense<0.000000e+00> : vector<8xf32>
    %117 = vector.multi_reduction <add>, %116, %cst_39 [1] : vector<8x8xf32> to vector<8xf32>
    %118 = vector.shape_cast %117 : vector<8xf32> to vector<8x1xf32>
    %119 = tpu.reciprocal %118 {approx = true} : vector<8x1xf32> -> vector<8x1xf32>
    %120 = vector.broadcast %119 : vector<8x1xf32> to vector<8x8xf32>
    %121 = arith.mulf %116, %120 : vector<8x8xf32>
    %122 = arith.truncf %121 : vector<8x8xf32> to vector<8x8xbf16>
    %cst_40 = arith.constant dense<0.000000e+00> : vector<8x8xf32>
    %123 = tpu.matmul %122, %108, %cst_40 {dimension_numbers = #tpu.dot_dimension_numbers<[1], [0], [0], [1], [0, 0, 1, 1], [], []>} : vector<8x8xbf16>, vector<8x8xbf16>, vector<8x8xf32> -> vector<8x8xf32>
    %124 = arith.truncf %123 : vector<8x8xf32> to vector<8x8xbf16>
    %c0_41 = arith.constant 0 : index
    %c24 = arith.constant 24 : index
    %125 = vector.load %arg16[%c0_41, %c24] : memref<8x32xbf16, #tpu.memory_space<vmem>>, vector<8x8xbf16>
    tpu.vector_store %arg16[%c0_41, %c24], %124 {strides = array<i32>} : memref<8x32xbf16, #tpu.memory_space<vmem>>, vector<8x8xbf16>,
    %c0_42 = arith.constant 0 : index
    %c0_43 = arith.constant 0 : index
    %126 = vector.load %arg16[%c0_42, %c0_43] : memref<8x32xbf16, #tpu.memory_space<vmem>>, vector<8x32xbf16>
    %c0_44 = arith.constant 0 : index
    %c0_45 = arith.constant 0 : index
    %127 = vector.load %arg7[%c0_44, %c0_45] : memref<32x32xbf16, #tpu.memory_space<vmem>>, vector<32x32xbf16>
    %c0_46 = arith.constant 0 : index
    %c0_47 = arith.constant 0 : index
    %128 = vector.load %arg8[%c0_46, %c0_47] : memref<1x32xf32, #tpu.memory_space<vmem>>, vector<1x32xf32>
    %cst_48 = arith.constant dense<0.000000e+00> : vector<8x32xf32>
    %129 = tpu.matmul %126, %127, %cst_48 {dimension_numbers = #tpu.dot_dimension_numbers<[1], [0], [0], [1], [0, 0, 1, 1], [], []>} : vector<8x32xbf16>, vector<32x32xbf16>, vector<8x32xf32> -> vector<8x32xf32>
    %130 = vector.broadcast %128 : vector<1x32xf32> to vector<8x32xf32>
    %131 = arith.addf %129, %130 : vector<8x32xf32>
    %132 = arith.addf %2, %131 : vector<8x32xf32>
    %c0_49 = arith.constant 0 : index
    %c0_50 = arith.constant 0 : index
    %133 = vector.load %arg9[%c0_49, %c0_50] : memref<1x32xf32, #tpu.memory_space<vmem>>, vector<1x32xf32>
    %c0_51 = arith.constant 0 : index
    %c0_52 = arith.constant 0 : index
    %134 = vector.load %arg10[%c0_51, %c0_52] : memref<1x32xf32, #tpu.memory_space<vmem>>, vector<1x32xf32>
    %cst_53 = arith.constant dense<0.000000e+00> : vector<8xf32>
    %135 = vector.multi_reduction <add>, %132, %cst_53 [1] : vector<8x32xf32> to vector<8xf32>
    %136 = vector.shape_cast %135 : vector<8xf32> to vector<8x1xf32>
    %cst_54 = arith.constant 3.200000e+01 : f32
    %137 = vector.broadcast %cst_54 : f32 to vector<8x1xf32>
    %138 = arith.divf %136, %137 : vector<8x1xf32>
    %139 = vector.broadcast %138 : vector<8x1xf32> to vector<8x32xf32>
    %140 = arith.subf %132, %139 : vector<8x32xf32>
    %141 = arith.mulf %140, %140 : vector<8x32xf32>
    %cst_55 = arith.constant dense<0.000000e+00> : vector<8xf32>
    %142 = vector.multi_reduction <add>, %141, %cst_55 [1] : vector<8x32xf32> to vector<8xf32>
    %143 = vector.shape_cast %142 : vector<8xf32> to vector<8x1xf32>
    %cst_56 = arith.constant 3.200000e+01 : f32
    %144 = vector.broadcast %cst_56 : f32 to vector<8x1xf32>
    %145 = arith.divf %143, %144 : vector<8x1xf32>
    %146 = vector.broadcast %138 : vector<8x1xf32> to vector<8x32xf32>
    %147 = arith.subf %132, %146 : vector<8x32xf32>
    %cst_57 = arith.constant 9.99999974E-6 : f32
    %148 = vector.broadcast %cst_57 : f32 to vector<8x1xf32>
    %149 = arith.addf %145, %148 : vector<8x1xf32>
    %150 = math.rsqrt %149 : vector<8x1xf32>
    %151 = vector.broadcast %150 : vector<8x1xf32> to vector<8x32xf32>
    %152 = arith.mulf %147, %151 : vector<8x32xf32>
    %153 = vector.broadcast %133 : vector<1x32xf32> to vector<8x32xf32>
    %154 = arith.mulf %152, %153 : vector<8x32xf32>
    %155 = vector.broadcast %134 : vector<1x32xf32> to vector<8x32xf32>
    %156 = arith.addf %154, %155 : vector<8x32xf32>
    %c0_58 = arith.constant 0 : index
    %c0_59 = arith.constant 0 : index
    %157 = vector.load %arg11[%c0_58, %c0_59] : memref<32x128xbf16, #tpu.memory_space<vmem>>, vector<32x128xbf16>
    %c0_60 = arith.constant 0 : index
    %c0_61 = arith.constant 0 : index
    %158 = vector.load %arg12[%c0_60, %c0_61] : memref<1x128xf32, #tpu.memory_space<vmem>>, vector<1x128xf32>
    %159 = arith.truncf %156 : vector<8x32xf32> to vector<8x32xbf16>
    %cst_62 = arith.constant dense<0.000000e+00> : vector<8x128xf32>
    %160 = tpu.matmul %159, %157, %cst_62 {dimension_numbers = #tpu.dot_dimension_numbers<[1], [0], [0], [1], [0, 0, 1, 1], [], []>} : vector<8x32xbf16>, vector<32x128xbf16>, vector<8x128xf32> -> vector<8x128xf32>
    %161 = vector.broadcast %158 : vector<1x128xf32> to vector<8x128xf32>
    %162 = arith.addf %160, %161 : vector<8x128xf32>
    %cst_63 = arith.constant 0.000000e+00 : f32
    %163 = vector.broadcast %cst_63 : f32 to vector<8x128xf32>
    %164 = arith.maximumf %162, %163 : vector<8x128xf32>
    %c0_64 = arith.constant 0 : index
    %c0_65 = arith.constant 0 : index
    %165 = vector.load %arg13[%c0_64, %c0_65] : memref<128x32xbf16, #tpu.memory_space<vmem>>, vector<128x32xbf16>
    %c0_66 = arith.constant 0 : index
    %c0_67 = arith.constant 0 : index
    %166 = vector.load %arg14[%c0_66, %c0_67] : memref<1x32xf32, #tpu.memory_space<vmem>>, vector<1x32xf32>
    %167 = arith.truncf %164 : vector<8x128xf32> to vector<8x128xbf16>
    %cst_68 = arith.constant dense<0.000000e+00> : vector<8x32xf32>
    %168 = tpu.matmul %167, %165, %cst_68 {dimension_numbers = #tpu.dot_dimension_numbers<[1], [0], [0], [1], [0, 0, 1, 1], [], []>} : vector<8x128xbf16>, vector<128x32xbf16>, vector<8x32xf32> -> vector<8x32xf32>
    %169 = vector.broadcast %166 : vector<1x32xf32> to vector<8x32xf32>
    %170 = arith.addf %168, %169 : vector<8x32xf32>
    %171 = arith.addf %132, %170 : vector<8x32xf32>
    %172 = arith.truncf %171 : vector<8x32xf32> to vector<8x32xbf16>
    %c0_69 = arith.constant 0 : index
    %c0_70 = arith.constant 0 : index
    %c0_71 = arith.constant 0 : index
    %173 = vector.load %arg15[%c0_69, %c0_70, %c0_71] : memref<1x8x32xbf16, #tpu.memory_space<vmem>>, vector<1x8x32xbf16>
    %174 = vector.shape_cast %173 : vector<1x8x32xbf16> to vector<8x32xbf16>
    %175 = vector.shape_cast %172 : vector<8x32xbf16> to vector<1x8x32xbf16>
    tpu.vector_store %arg15[%c0_69, %c0_70, %c0_71], %175 {strides = array<i32>} : memref<1x8x32xbf16, #tpu.memory_space<vmem>>, vector<1x8x32xbf16>,
    return
  }
  func.func @transform_0(%arg0: i32) -> (i32, i32, i32) {
    %c0_i32 = arith.constant 0 : i32
    %c0_i32_0 = arith.constant 0 : i32
    %c0_i32_1 = arith.constant 0 : i32
    return %arg0, %c0_i32, %c0_i32_0 : i32, i32, i32
  }
  func.func @transform_1(%arg0: i32) -> (i32, i32, i32) {
    %c0_i32 = arith.constant 0 : i32
    %c0_i32_0 = arith.constant 0 : i32
    %c0_i32_1 = arith.constant 0 : i32
    return %arg0, %c0_i32, %c0_i32_0 : i32, i32, i32
  }
  func.func @transform_2(%arg0: i32) -> (i32, i32) {
    %c0_i32 = arith.constant 0 : i32
    %c0_i32_0 = arith.constant 0 : i32
    %c0_i32_1 = arith.constant 0 : i32
    return %c0_i32, %c0_i32_0 : i32, i32
  }
  func.func @transform_3(%arg0: i32) -> (i32, i32) {
    %c0_i32 = arith.constant 0 : i32
    %c0_i32_0 = arith.constant 0 : i32
    %c0_i32_1 = arith.constant 0 : i32
    return %c0_i32, %c0_i32_0 : i32, i32
  }
  func.func @transform_4(%arg0: i32) -> (i32, i32) {
    %c0_i32 = arith.constant 0 : i32
    %c0_i32_0 = arith.constant 0 : i32
    %c0_i32_1 = arith.constant 0 : i32
    return %c0_i32, %c0_i32_0 : i32, i32
  }
  func.func @transform_5(%arg0: i32) -> (i32, i32) {
    %c0_i32 = arith.constant 0 : i32
    %c0_i32_0 = arith.constant 0 : i32
    %c0_i32_1 = arith.constant 0 : i32
    return %c0_i32, %c0_i32_0 : i32, i32
  }
  func.func @transform_6(%arg0: i32) -> (i32, i32) {
    %c0_i32 = arith.constant 0 : i32
    %c0_i32_0 = arith.constant 0 : i32
    %c0_i32_1 = arith.constant 0 : i32
    return %c0_i32, %c0_i32_0 : i32, i32
  }
  func.func @transform_7(%arg0: i32) -> (i32, i32) {
    %c0_i32 = arith.constant 0 : i32
    %c0_i32_0 = arith.constant 0 : i32
    %c0_i32_1 = arith.constant 0 : i32
    return %c0_i32, %c0_i32_0 : i32, i32
  }
  func.func @transform_8(%arg0: i32) -> (i32, i32) {
    %c0_i32 = arith.constant 0 : i32
    %c0_i32_0 = arith.constant 0 : i32
    %c0_i32_1 = arith.constant 0 : i32
    return %c0_i32, %c0_i32_0 : i32, i32
  }
  func.func @transform_9(%arg0: i32) -> (i32, i32) {
    %c0_i32 = arith.constant 0 : i32
    %c0_i32_0 = arith.constant 0 : i32
    %c0_i32_1 = arith.constant 0 : i32
    return %c0_i32, %c0_i32_0 : i32, i32
  }
  func.func @transform_10(%arg0: i32) -> (i32, i32) {
    %c0_i32 = arith.constant 0 : i32
    %c0_i32_0 = arith.constant 0 : i32
    %c0_i32_1 = arith.constant 0 : i32
    return %c0_i32, %c0_i32_0 : i32, i32
  }
  func.func @transform_11(%arg0: i32) -> (i32, i32) {
    %c0_i32 = arith.constant 0 : i32
    %c0_i32_0 = arith.constant 0 : i32
    %c0_i32_1 = arith.constant 0 : i32
    return %c0_i32, %c0_i32_0 : i32, i32
  }
  func.func @transform_12(%arg0: i32) -> (i32, i32) {
    %c0_i32 = arith.constant 0 : i32
    %c0_i32_0 = arith.constant 0 : i32
    %c0_i32_1 = arith.constant 0 : i32
    return %c0_i32, %c0_i32_0 : i32, i32
  }
  func.func @transform_13(%arg0: i32) -> (i32, i32) {
    %c0_i32 = arith.constant 0 : i32
    %c0_i32_0 = arith.constant 0 : i32
    %c0_i32_1 = arith.constant 0 : i32
    return %c0_i32, %c0_i32_0 : i32, i32
  }
  func.func @transform_14(%arg0: i32) -> (i32, i32, i32) {
    %c0_i32 = arith.constant 0 : i32
    %c0_i32_0 = arith.constant 0 : i32
    %c0_i32_1 = arith.constant 0 : i32
    return %arg0, %c0_i32, %c0_i32_0 : i32, i32, i32
  }
}

module attributes {stable_mosaic.version = 11 : i64} {
  func.func @_decoder_layer_kernel(%arg0: i32, %arg1: memref<1x8x32xbf16, #tpu.memory_space<vmem>>, %arg2: memref<1x8x32xbf16, #tpu.memory_space<vmem>>, %arg3: memref<1x1x8xf32, #tpu.memory_space<vmem>>, %arg4: memref<1x1x8xf32, #tpu.memory_space<vmem>>, %arg5: memref<1x8x1xf32, #tpu.memory_space<vmem>>, %arg6: memref<1x32xf32, #tpu.memory_space<vmem>>, %arg7: memref<1x32xf32, #tpu.memory_space<vmem>>, %arg8: memref<32x96xbf16, #tpu.memory_space<vmem>>, %arg9: memref<1x96xf32, #tpu.memory_space<vmem>>, %arg10: memref<32x32xbf16, #tpu.memory_space<vmem>>, %arg11: memref<1x32xf32, #tpu.memory_space<vmem>>, %arg12: memref<1x32xf32, #tpu.memory_space<vmem>>, %arg13: memref<1x32xf32, #tpu.memory_space<vmem>>, %arg14: memref<32x32xbf16, #tpu.memory_space<vmem>>, %arg15: memref<1x32xf32, #tpu.memory_space<vmem>>, %arg16: memref<32x64xbf16, #tpu.memory_space<vmem>>, %arg17: memref<1x64xf32, #tpu.memory_space<vmem>>, %arg18: memref<32x32xbf16, #tpu.memory_space<vmem>>, %arg19: memref<1x32xf32, #tpu.memory_space<vmem>>, %arg20: memref<1x32xf32, #tpu.memory_space<vmem>>, %arg21: memref<1x32xf32, #tpu.memory_space<vmem>>, %arg22: memref<32x128xbf16, #tpu.memory_space<vmem>>, %arg23: memref<1x128xf32, #tpu.memory_space<vmem>>, %arg24: memref<128x32xbf16, #tpu.memory_space<vmem>>, %arg25: memref<1x32xf32, #tpu.memory_space<vmem>>, %arg26: memref<1x8x32xbf16, #tpu.memory_space<vmem>>, %arg27: memref<8x32xbf16, #tpu.memory_space<vmem>>) attributes {dimension_semantics = [#tpu.dimension_semantics<parallel>], iteration_bounds = array<i64: 2>, scalar_prefetch = 0 : i64, scratch_operands = 1 : i64, tpu.core_type = #tpu.core_type<tc>, window_params = [{transform_indices = @transform_0, window_bounds = array<i64: 1, 8, 32>}, {transform_indices = @transform_1, window_bounds = array<i64: 1, 8, 32>}, {transform_indices = @transform_2, window_bounds = array<i64: 1, 1, 8>}, {transform_indices = @transform_3, window_bounds = array<i64: 1, 1, 8>}, {transform_indices = @transform_4, window_bounds = array<i64: 1, 8, 1>}, {pipeline_mode = #tpu.pipeline_mode<synchronous>, transform_indices = @transform_5, window_bounds = array<i64: 1, 32>}, {pipeline_mode = #tpu.pipeline_mode<synchronous>, transform_indices = @transform_6, window_bounds = array<i64: 1, 32>}, {pipeline_mode = #tpu.pipeline_mode<synchronous>, transform_indices = @transform_7, window_bounds = array<i64: 32, 96>}, {pipeline_mode = #tpu.pipeline_mode<synchronous>, transform_indices = @transform_8, window_bounds = array<i64: 1, 96>}, {pipeline_mode = #tpu.pipeline_mode<synchronous>, transform_indices = @transform_9, window_bounds = array<i64: 32, 32>}, {pipeline_mode = #tpu.pipeline_mode<synchronous>, transform_indices = @transform_10, window_bounds = array<i64: 1, 32>}, {pipeline_mode = #tpu.pipeline_mode<synchronous>, transform_indices = @transform_11, window_bounds = array<i64: 1, 32>}, {pipeline_mode = #tpu.pipeline_mode<synchronous>, transform_indices = @transform_12, window_bounds = array<i64: 1, 32>}, {pipeline_mode = #tpu.pipeline_mode<synchronous>, transform_indices = @transform_13, window_bounds = array<i64: 32, 32>}, {pipeline_mode = #tpu.pipeline_mode<synchronous>, transform_indices = @transform_14, window_bounds = array<i64: 1, 32>}, {pipeline_mode = #tpu.pipeline_mode<synchronous>, transform_indices = @transform_15, window_bounds = array<i64: 32, 64>}, {pipeline_mode = #tpu.pipeline_mode<synchronous>, transform_indices = @transform_16, window_bounds = array<i64: 1, 64>}, {pipeline_mode = #tpu.pipeline_mode<synchronous>, transform_indices = @transform_17, window_bounds = array<i64: 32, 32>}, {pipeline_mode = #tpu.pipeline_mode<synchronous>, transform_indices = @transform_18, window_bounds = array<i64: 1, 32>}, {pipeline_mode = #tpu.pipeline_mode<synchronous>, transform_indices = @transform_19, window_bounds = array<i64: 1, 32>}, {pipeline_mode = #tpu.pipeline_mode<synchronous>, transform_indices = @transform_20, window_bounds = array<i64: 1, 32>}, {pipeline_mode = #tpu.pipeline_mode<synchronous>, transform_indices = @transform_21, window_bounds = array<i64: 32, 128>}, {pipeline_mode = #tpu.pipeline_mode<synchronous>, transform_indices = @transform_22, window_bounds = array<i64: 1, 128>}, {pipeline_mode = #tpu.pipeline_mode<synchronous>, transform_indices = @transform_23, window_bounds = array<i64: 128, 32>}, {pipeline_mode = #tpu.pipeline_mode<synchronous>, transform_indices = @transform_24, window_bounds = array<i64: 1, 32>}, {transform_indices = @transform_25, window_bounds = array<i64: 1, 8, 32>}]} {
    %c0 = arith.constant 0 : index
    %c0_0 = arith.constant 0 : index
    %c0_1 = arith.constant 0 : index
    %0 = vector.load %arg1[%c0, %c0_0, %c0_1] : memref<1x8x32xbf16, #tpu.memory_space<vmem>>, vector<1x8x32xbf16>
    %1 = vector.shape_cast %0 : vector<1x8x32xbf16> to vector<8x32xbf16>
    %2 = arith.extf %1 : vector<8x32xbf16> to vector<8x32xf32>
    %c0_2 = arith.constant 0 : index
    %c0_3 = arith.constant 0 : index
    %c0_4 = arith.constant 0 : index
    %3 = vector.load %arg2[%c0_2, %c0_3, %c0_4] : memref<1x8x32xbf16, #tpu.memory_space<vmem>>, vector<1x8x32xbf16>
    %4 = vector.shape_cast %3 : vector<1x8x32xbf16> to vector<8x32xbf16>
    %c0_5 = arith.constant 0 : index
    %c0_6 = arith.constant 0 : index
    %c0_7 = arith.constant 0 : index
    %5 = vector.load %arg3[%c0_5, %c0_6, %c0_7] : memref<1x1x8xf32, #tpu.memory_space<vmem>>, vector<1x1x8xf32>
    %6 = vector.shape_cast %5 : vector<1x1x8xf32> to vector<1x8xf32>
    %cst = arith.constant 0.000000e+00 : f32
    %7 = vector.broadcast %cst : f32 to vector<1x8xf32>
    %8 = arith.cmpf ogt, %6, %7 : vector<1x8xf32>
    %c0_8 = arith.constant 0 : index
    %c0_9 = arith.constant 0 : index
    %c0_10 = arith.constant 0 : index
    %9 = vector.load %arg4[%c0_8, %c0_9, %c0_10] : memref<1x1x8xf32, #tpu.memory_space<vmem>>, vector<1x1x8xf32>
    %10 = vector.shape_cast %9 : vector<1x1x8xf32> to vector<1x8xf32>
    %cst_11 = arith.constant 0.000000e+00 : f32
    %11 = vector.broadcast %cst_11 : f32 to vector<1x8xf32>
    %12 = arith.cmpf ogt, %10, %11 : vector<1x8xf32>
    %c0_12 = arith.constant 0 : index
    %c0_13 = arith.constant 0 : index
    %c0_14 = arith.constant 0 : index
    %13 = vector.load %arg5[%c0_12, %c0_13, %c0_14] : memref<1x8x1xf32, #tpu.memory_space<vmem>>, vector<1x8x1xf32>
    %14 = vector.shape_cast %13 : vector<1x8x1xf32> to vector<8x1xf32>
    %cst_15 = arith.constant 0.000000e+00 : f32
    %15 = vector.broadcast %cst_15 : f32 to vector<8x1xf32>
    %16 = arith.cmpf ogt, %14, %15 : vector<8x1xf32>
    %17 = tpu.iota {dimensions = array<i32: 0>} : vector<8x8xi32>
    %18 = tpu.iota {dimensions = array<i32: 1>} : vector<8x8xi32>
    %19 = arith.cmpi sge, %17, %18 : vector<8x8xi32>
    %20 = vector.broadcast %8 : vector<1x8xi1> to vector<8x8xi1>
    %21 = arith.andi %19, %20 : vector<8x8xi1>
    %cst_16 = arith.constant 0.000000e+00 : f32
    %cst_17 = arith.constant -1.000000e+30 : f32
    %22 = vector.broadcast %cst_16 : f32 to vector<8x8xf32>
    %23 = vector.broadcast %cst_17 : f32 to vector<8x8xf32>
    %24 = arith.select %21, %22, %23 : vector<8x8xi1>, vector<8x8xf32>
    %25 = vector.broadcast %12 : vector<1x8xi1> to vector<8x8xi1>
    %26 = vector.broadcast %16 : vector<8x1xi1> to vector<8x8xi1>
    %27 = arith.andi %25, %26 : vector<8x8xi1>
    %cst_18 = arith.constant 0.000000e+00 : f32
    %cst_19 = arith.constant -1.000000e+30 : f32
    %28 = vector.broadcast %cst_18 : f32 to vector<8x8xf32>
    %29 = vector.broadcast %cst_19 : f32 to vector<8x8xf32>
    %30 = arith.select %27, %28, %29 : vector<8x8xi1>, vector<8x8xf32>
    %c0_20 = arith.constant 0 : index
    %c0_21 = arith.constant 0 : index
    %31 = vector.load %arg6[%c0_20, %c0_21] : memref<1x32xf32, #tpu.memory_space<vmem>>, vector<1x32xf32>
    %c0_22 = arith.constant 0 : index
    %c0_23 = arith.constant 0 : index
    %32 = vector.load %arg7[%c0_22, %c0_23] : memref<1x32xf32, #tpu.memory_space<vmem>>, vector<1x32xf32>
    %cst_24 = arith.constant dense<0.000000e+00> : vector<8xf32>
    %33 = vector.multi_reduction <add>, %2, %cst_24 [1] : vector<8x32xf32> to vector<8xf32>
    %34 = vector.shape_cast %33 : vector<8xf32> to vector<8x1xf32>
    %cst_25 = arith.constant 3.200000e+01 : f32
    %35 = vector.broadcast %cst_25 : f32 to vector<8x1xf32>
    %36 = arith.divf %34, %35 : vector<8x1xf32>
    %37 = vector.broadcast %36 : vector<8x1xf32> to vector<8x32xf32>
    %38 = arith.subf %2, %37 : vector<8x32xf32>
    %39 = arith.mulf %38, %38 : vector<8x32xf32>
    %cst_26 = arith.constant dense<0.000000e+00> : vector<8xf32>
    %40 = vector.multi_reduction <add>, %39, %cst_26 [1] : vector<8x32xf32> to vector<8xf32>
    %41 = vector.shape_cast %40 : vector<8xf32> to vector<8x1xf32>
    %cst_27 = arith.constant 3.200000e+01 : f32
    %42 = vector.broadcast %cst_27 : f32 to vector<8x1xf32>
    %43 = arith.divf %41, %42 : vector<8x1xf32>
    %44 = vector.broadcast %36 : vector<8x1xf32> to vector<8x32xf32>
    %45 = arith.subf %2, %44 : vector<8x32xf32>
    %cst_28 = arith.constant 9.99999974E-6 : f32
    %46 = vector.broadcast %cst_28 : f32 to vector<8x1xf32>
    %47 = arith.addf %43, %46 : vector<8x1xf32>
    %48 = math.rsqrt %47 : vector<8x1xf32>
    %49 = vector.broadcast %48 : vector<8x1xf32> to vector<8x32xf32>
    %50 = arith.mulf %45, %49 : vector<8x32xf32>
    %51 = vector.broadcast %31 : vector<1x32xf32> to vector<8x32xf32>
    %52 = arith.mulf %50, %51 : vector<8x32xf32>
    %53 = vector.broadcast %32 : vector<1x32xf32> to vector<8x32xf32>
    %54 = arith.addf %52, %53 : vector<8x32xf32>
    %c0_29 = arith.constant 0 : index
    %c0_30 = arith.constant 0 : index
    %55 = vector.load %arg8[%c0_29, %c0_30] : memref<32x96xbf16, #tpu.memory_space<vmem>>, vector<32x96xbf16>
    %c0_31 = arith.constant 0 : index
    %c0_32 = arith.constant 0 : index
    %56 = vector.load %arg9[%c0_31, %c0_32] : memref<1x96xf32, #tpu.memory_space<vmem>>, vector<1x96xf32>
    %57 = arith.truncf %54 : vector<8x32xf32> to vector<8x32xbf16>
    %cst_33 = arith.constant dense<0.000000e+00> : vector<8x96xf32>
    %58 = tpu.matmul %57, %55, %cst_33 {dimension_numbers = #tpu.dot_dimension_numbers<[1], [0], [0], [1], [0, 0, 1, 1], [], []>} : vector<8x32xbf16>, vector<32x96xbf16>, vector<8x96xf32> -> vector<8x96xf32>
    %59 = vector.broadcast %56 : vector<1x96xf32> to vector<8x96xf32>
    %60 = arith.addf %58, %59 : vector<8x96xf32>
    %61 = vector.extract_strided_slice %60 {offsets = [0, 0], sizes = [8, 32], strides = [1, 1]} : vector<8x96xf32> to vector<8x32xf32>
    %62 = vector.extract_strided_slice %60 {offsets = [0, 32], sizes = [8, 32], strides = [1, 1]} : vector<8x96xf32> to vector<8x32xf32>
    %63 = vector.extract_strided_slice %60 {offsets = [0, 64], sizes = [8, 32], strides = [1, 1]} : vector<8x96xf32> to vector<8x32xf32>
    %64 = arith.truncf %61 : vector<8x32xf32> to vector<8x32xbf16>
    %65 = arith.truncf %62 : vector<8x32xf32> to vector<8x32xbf16>
    %66 = arith.truncf %63 : vector<8x32xf32> to vector<8x32xbf16>
    %67 = vector.extract_strided_slice %64 {offsets = [0, 0], sizes = [8, 8], strides = [1, 1]} : vector<8x32xbf16> to vector<8x8xbf16>
    %68 = vector.extract_strided_slice %65 {offsets = [0, 0], sizes = [8, 8], strides = [1, 1]} : vector<8x32xbf16> to vector<8x8xbf16>
    %69 = vector.extract_strided_slice %66 {offsets = [0, 0], sizes = [8, 8], strides = [1, 1]} : vector<8x32xbf16> to vector<8x8xbf16>
    %cst_34 = arith.constant dense<0.000000e+00> : vector<8x8xf32>
    %70 = tpu.matmul %67, %68, %cst_34 {dimension_numbers = #tpu.dot_dimension_numbers<[1], [1], [0], [0], [0, 0, 1, 0], [], []>} : vector<8x8xbf16>, vector<8x8xbf16>, vector<8x8xf32> -> vector<8x8xf32>
    %71 = arith.addf %70, %24 : vector<8x8xf32>
    %cst_35 = arith.constant dense<0xFF800000> : vector<8xf32>
    %72 = vector.multi_reduction <maximumf>, %71, %cst_35 [1] : vector<8x8xf32> to vector<8xf32>
    %73 = vector.shape_cast %72 : vector<8xf32> to vector<8x1xf32>
    %74 = vector.broadcast %73 : vector<8x1xf32> to vector<8x8xf32>
    %75 = arith.subf %71, %74 : vector<8x8xf32>
    %76 = math.exp %75 : vector<8x8xf32>
    %cst_36 = arith.constant dense<0.000000e+00> : vector<8xf32>
    %77 = vector.multi_reduction <add>, %76, %cst_36 [1] : vector<8x8xf32> to vector<8xf32>
    %78 = vector.shape_cast %77 : vector<8xf32> to vector<8x1xf32>
    %79 = tpu.reciprocal %78 {approx = true} : vector<8x1xf32> -> vector<8x1xf32>
    %80 = vector.broadcast %79 : vector<8x1xf32> to vector<8x8xf32>
    %81 = arith.mulf %76, %80 : vector<8x8xf32>
    %82 = arith.truncf %81 : vector<8x8xf32> to vector<8x8xbf16>
    %cst_37 = arith.constant dense<0.000000e+00> : vector<8x8xf32>
    %83 = tpu.matmul %82, %69, %cst_37 {dimension_numbers = #tpu.dot_dimension_numbers<[1], [0], [0], [1], [0, 0, 1, 1], [], []>} : vector<8x8xbf16>, vector<8x8xbf16>, vector<8x8xf32> -> vector<8x8xf32>
    %84 = arith.truncf %83 : vector<8x8xf32> to vector<8x8xbf16>
    %c0_38 = arith.constant 0 : index
    %c0_39 = arith.constant 0 : index
    %85 = vector.load %arg27[%c0_38, %c0_39] : memref<8x32xbf16, #tpu.memory_space<vmem>>, vector<8x8xbf16>
    tpu.vector_store %arg27[%c0_38, %c0_39], %84 {strides = array<i32>} : memref<8x32xbf16, #tpu.memory_space<vmem>>, vector<8x8xbf16>,
    %86 = vector.extract_strided_slice %64 {offsets = [0, 8], sizes = [8, 8], strides = [1, 1]} : vector<8x32xbf16> to vector<8x8xbf16>
    %87 = vector.extract_strided_slice %65 {offsets = [0, 8], sizes = [8, 8], strides = [1, 1]} : vector<8x32xbf16> to vector<8x8xbf16>
    %88 = vector.extract_strided_slice %66 {offsets = [0, 8], sizes = [8, 8], strides = [1, 1]} : vector<8x32xbf16> to vector<8x8xbf16>
    %cst_40 = arith.constant dense<0.000000e+00> : vector<8x8xf32>
    %89 = tpu.matmul %86, %87, %cst_40 {dimension_numbers = #tpu.dot_dimension_numbers<[1], [1], [0], [0], [0, 0, 1, 0], [], []>} : vector<8x8xbf16>, vector<8x8xbf16>, vector<8x8xf32> -> vector<8x8xf32>
    %90 = arith.addf %89, %24 : vector<8x8xf32>
    %cst_41 = arith.constant dense<0xFF800000> : vector<8xf32>
    %91 = vector.multi_reduction <maximumf>, %90, %cst_41 [1] : vector<8x8xf32> to vector<8xf32>
    %92 = vector.shape_cast %91 : vector<8xf32> to vector<8x1xf32>
    %93 = vector.broadcast %92 : vector<8x1xf32> to vector<8x8xf32>
    %94 = arith.subf %90, %93 : vector<8x8xf32>
    %95 = math.exp %94 : vector<8x8xf32>
    %cst_42 = arith.constant dense<0.000000e+00> : vector<8xf32>
    %96 = vector.multi_reduction <add>, %95, %cst_42 [1] : vector<8x8xf32> to vector<8xf32>
    %97 = vector.shape_cast %96 : vector<8xf32> to vector<8x1xf32>
    %98 = tpu.reciprocal %97 {approx = true} : vector<8x1xf32> -> vector<8x1xf32>
    %99 = vector.broadcast %98 : vector<8x1xf32> to vector<8x8xf32>
    %100 = arith.mulf %95, %99 : vector<8x8xf32>
    %101 = arith.truncf %100 : vector<8x8xf32> to vector<8x8xbf16>
    %cst_43 = arith.constant dense<0.000000e+00> : vector<8x8xf32>
    %102 = tpu.matmul %101, %88, %cst_43 {dimension_numbers = #tpu.dot_dimension_numbers<[1], [0], [0], [1], [0, 0, 1, 1], [], []>} : vector<8x8xbf16>, vector<8x8xbf16>, vector<8x8xf32> -> vector<8x8xf32>
    %103 = arith.truncf %102 : vector<8x8xf32> to vector<8x8xbf16>
    %c0_44 = arith.constant 0 : index
    %c8 = arith.constant 8 : index
    %104 = vector.load %arg27[%c0_44, %c8] : memref<8x32xbf16, #tpu.memory_space<vmem>>, vector<8x8xbf16>
    tpu.vector_store %arg27[%c0_44, %c8], %103 {strides = array<i32>} : memref<8x32xbf16, #tpu.memory_space<vmem>>, vector<8x8xbf16>,
    %105 = vector.extract_strided_slice %64 {offsets = [0, 16], sizes = [8, 8], strides = [1, 1]} : vector<8x32xbf16> to vector<8x8xbf16>
    %106 = vector.extract_strided_slice %65 {offsets = [0, 16], sizes = [8, 8], strides = [1, 1]} : vector<8x32xbf16> to vector<8x8xbf16>
    %107 = vector.extract_strided_slice %66 {offsets = [0, 16], sizes = [8, 8], strides = [1, 1]} : vector<8x32xbf16> to vector<8x8xbf16>
    %cst_45 = arith.constant dense<0.000000e+00> : vector<8x8xf32>
    %108 = tpu.matmul %105, %106, %cst_45 {dimension_numbers = #tpu.dot_dimension_numbers<[1], [1], [0], [0], [0, 0, 1, 0], [], []>} : vector<8x8xbf16>, vector<8x8xbf16>, vector<8x8xf32> -> vector<8x8xf32>
    %109 = arith.addf %108, %24 : vector<8x8xf32>
    %cst_46 = arith.constant dense<0xFF800000> : vector<8xf32>
    %110 = vector.multi_reduction <maximumf>, %109, %cst_46 [1] : vector<8x8xf32> to vector<8xf32>
    %111 = vector.shape_cast %110 : vector<8xf32> to vector<8x1xf32>
    %112 = vector.broadcast %111 : vector<8x1xf32> to vector<8x8xf32>
    %113 = arith.subf %109, %112 : vector<8x8xf32>
    %114 = math.exp %113 : vector<8x8xf32>
    %cst_47 = arith.constant dense<0.000000e+00> : vector<8xf32>
    %115 = vector.multi_reduction <add>, %114, %cst_47 [1] : vector<8x8xf32> to vector<8xf32>
    %116 = vector.shape_cast %115 : vector<8xf32> to vector<8x1xf32>
    %117 = tpu.reciprocal %116 {approx = true} : vector<8x1xf32> -> vector<8x1xf32>
    %118 = vector.broadcast %117 : vector<8x1xf32> to vector<8x8xf32>
    %119 = arith.mulf %114, %118 : vector<8x8xf32>
    %120 = arith.truncf %119 : vector<8x8xf32> to vector<8x8xbf16>
    %cst_48 = arith.constant dense<0.000000e+00> : vector<8x8xf32>
    %121 = tpu.matmul %120, %107, %cst_48 {dimension_numbers = #tpu.dot_dimension_numbers<[1], [0], [0], [1], [0, 0, 1, 1], [], []>} : vector<8x8xbf16>, vector<8x8xbf16>, vector<8x8xf32> -> vector<8x8xf32>
    %122 = arith.truncf %121 : vector<8x8xf32> to vector<8x8xbf16>
    %c0_49 = arith.constant 0 : index
    %c16 = arith.constant 16 : index
    %123 = vector.load %arg27[%c0_49, %c16] : memref<8x32xbf16, #tpu.memory_space<vmem>>, vector<8x8xbf16>
    tpu.vector_store %arg27[%c0_49, %c16], %122 {strides = array<i32>} : memref<8x32xbf16, #tpu.memory_space<vmem>>, vector<8x8xbf16>,
    %124 = vector.extract_strided_slice %64 {offsets = [0, 24], sizes = [8, 8], strides = [1, 1]} : vector<8x32xbf16> to vector<8x8xbf16>
    %125 = vector.extract_strided_slice %65 {offsets = [0, 24], sizes = [8, 8], strides = [1, 1]} : vector<8x32xbf16> to vector<8x8xbf16>
    %126 = vector.extract_strided_slice %66 {offsets = [0, 24], sizes = [8, 8], strides = [1, 1]} : vector<8x32xbf16> to vector<8x8xbf16>
    %cst_50 = arith.constant dense<0.000000e+00> : vector<8x8xf32>
    %127 = tpu.matmul %124, %125, %cst_50 {dimension_numbers = #tpu.dot_dimension_numbers<[1], [1], [0], [0], [0, 0, 1, 0], [], []>} : vector<8x8xbf16>, vector<8x8xbf16>, vector<8x8xf32> -> vector<8x8xf32>
    %128 = arith.addf %127, %24 : vector<8x8xf32>
    %cst_51 = arith.constant dense<0xFF800000> : vector<8xf32>
    %129 = vector.multi_reduction <maximumf>, %128, %cst_51 [1] : vector<8x8xf32> to vector<8xf32>
    %130 = vector.shape_cast %129 : vector<8xf32> to vector<8x1xf32>
    %131 = vector.broadcast %130 : vector<8x1xf32> to vector<8x8xf32>
    %132 = arith.subf %128, %131 : vector<8x8xf32>
    %133 = math.exp %132 : vector<8x8xf32>
    %cst_52 = arith.constant dense<0.000000e+00> : vector<8xf32>
    %134 = vector.multi_reduction <add>, %133, %cst_52 [1] : vector<8x8xf32> to vector<8xf32>
    %135 = vector.shape_cast %134 : vector<8xf32> to vector<8x1xf32>
    %136 = tpu.reciprocal %135 {approx = true} : vector<8x1xf32> -> vector<8x1xf32>
    %137 = vector.broadcast %136 : vector<8x1xf32> to vector<8x8xf32>
    %138 = arith.mulf %133, %137 : vector<8x8xf32>
    %139 = arith.truncf %138 : vector<8x8xf32> to vector<8x8xbf16>
    %cst_53 = arith.constant dense<0.000000e+00> : vector<8x8xf32>
    %140 = tpu.matmul %139, %126, %cst_53 {dimension_numbers = #tpu.dot_dimension_numbers<[1], [0], [0], [1], [0, 0, 1, 1], [], []>} : vector<8x8xbf16>, vector<8x8xbf16>, vector<8x8xf32> -> vector<8x8xf32>
    %141 = arith.truncf %140 : vector<8x8xf32> to vector<8x8xbf16>
    %c0_54 = arith.constant 0 : index
    %c24 = arith.constant 24 : index
    %142 = vector.load %arg27[%c0_54, %c24] : memref<8x32xbf16, #tpu.memory_space<vmem>>, vector<8x8xbf16>
    tpu.vector_store %arg27[%c0_54, %c24], %141 {strides = array<i32>} : memref<8x32xbf16, #tpu.memory_space<vmem>>, vector<8x8xbf16>,
    %c0_55 = arith.constant 0 : index
    %c0_56 = arith.constant 0 : index
    %143 = vector.load %arg27[%c0_55, %c0_56] : memref<8x32xbf16, #tpu.memory_space<vmem>>, vector<8x32xbf16>
    %c0_57 = arith.constant 0 : index
    %c0_58 = arith.constant 0 : index
    %144 = vector.load %arg10[%c0_57, %c0_58] : memref<32x32xbf16, #tpu.memory_space<vmem>>, vector<32x32xbf16>
    %c0_59 = arith.constant 0 : index
    %c0_60 = arith.constant 0 : index
    %145 = vector.load %arg11[%c0_59, %c0_60] : memref<1x32xf32, #tpu.memory_space<vmem>>, vector<1x32xf32>
    %cst_61 = arith.constant dense<0.000000e+00> : vector<8x32xf32>
    %146 = tpu.matmul %143, %144, %cst_61 {dimension_numbers = #tpu.dot_dimension_numbers<[1], [0], [0], [1], [0, 0, 1, 1], [], []>} : vector<8x32xbf16>, vector<32x32xbf16>, vector<8x32xf32> -> vector<8x32xf32>
    %147 = vector.broadcast %145 : vector<1x32xf32> to vector<8x32xf32>
    %148 = arith.addf %146, %147 : vector<8x32xf32>
    %149 = arith.addf %2, %148 : vector<8x32xf32>
    %c0_62 = arith.constant 0 : index
    %c0_63 = arith.constant 0 : index
    %150 = vector.load %arg12[%c0_62, %c0_63] : memref<1x32xf32, #tpu.memory_space<vmem>>, vector<1x32xf32>
    %c0_64 = arith.constant 0 : index
    %c0_65 = arith.constant 0 : index
    %151 = vector.load %arg13[%c0_64, %c0_65] : memref<1x32xf32, #tpu.memory_space<vmem>>, vector<1x32xf32>
    %cst_66 = arith.constant dense<0.000000e+00> : vector<8xf32>
    %152 = vector.multi_reduction <add>, %149, %cst_66 [1] : vector<8x32xf32> to vector<8xf32>
    %153 = vector.shape_cast %152 : vector<8xf32> to vector<8x1xf32>
    %cst_67 = arith.constant 3.200000e+01 : f32
    %154 = vector.broadcast %cst_67 : f32 to vector<8x1xf32>
    %155 = arith.divf %153, %154 : vector<8x1xf32>
    %156 = vector.broadcast %155 : vector<8x1xf32> to vector<8x32xf32>
    %157 = arith.subf %149, %156 : vector<8x32xf32>
    %158 = arith.mulf %157, %157 : vector<8x32xf32>
    %cst_68 = arith.constant dense<0.000000e+00> : vector<8xf32>
    %159 = vector.multi_reduction <add>, %158, %cst_68 [1] : vector<8x32xf32> to vector<8xf32>
    %160 = vector.shape_cast %159 : vector<8xf32> to vector<8x1xf32>
    %cst_69 = arith.constant 3.200000e+01 : f32
    %161 = vector.broadcast %cst_69 : f32 to vector<8x1xf32>
    %162 = arith.divf %160, %161 : vector<8x1xf32>
    %163 = vector.broadcast %155 : vector<8x1xf32> to vector<8x32xf32>
    %164 = arith.subf %149, %163 : vector<8x32xf32>
    %cst_70 = arith.constant 9.99999974E-6 : f32
    %165 = vector.broadcast %cst_70 : f32 to vector<8x1xf32>
    %166 = arith.addf %162, %165 : vector<8x1xf32>
    %167 = math.rsqrt %166 : vector<8x1xf32>
    %168 = vector.broadcast %167 : vector<8x1xf32> to vector<8x32xf32>
    %169 = arith.mulf %164, %168 : vector<8x32xf32>
    %170 = vector.broadcast %150 : vector<1x32xf32> to vector<8x32xf32>
    %171 = arith.mulf %169, %170 : vector<8x32xf32>
    %172 = vector.broadcast %151 : vector<1x32xf32> to vector<8x32xf32>
    %173 = arith.addf %171, %172 : vector<8x32xf32>
    %c0_71 = arith.constant 0 : index
    %c0_72 = arith.constant 0 : index
    %174 = vector.load %arg14[%c0_71, %c0_72] : memref<32x32xbf16, #tpu.memory_space<vmem>>, vector<32x32xbf16>
    %c0_73 = arith.constant 0 : index
    %c0_74 = arith.constant 0 : index
    %175 = vector.load %arg15[%c0_73, %c0_74] : memref<1x32xf32, #tpu.memory_space<vmem>>, vector<1x32xf32>
    %176 = arith.truncf %173 : vector<8x32xf32> to vector<8x32xbf16>
    %cst_75 = arith.constant dense<0.000000e+00> : vector<8x32xf32>
    %177 = tpu.matmul %176, %174, %cst_75 {dimension_numbers = #tpu.dot_dimension_numbers<[1], [0], [0], [1], [0, 0, 1, 1], [], []>} : vector<8x32xbf16>, vector<32x32xbf16>, vector<8x32xf32> -> vector<8x32xf32>
    %178 = vector.broadcast %175 : vector<1x32xf32> to vector<8x32xf32>
    %179 = arith.addf %177, %178 : vector<8x32xf32>
    %c0_76 = arith.constant 0 : index
    %c0_77 = arith.constant 0 : index
    %180 = vector.load %arg16[%c0_76, %c0_77] : memref<32x64xbf16, #tpu.memory_space<vmem>>, vector<32x64xbf16>
    %c0_78 = arith.constant 0 : index
    %c0_79 = arith.constant 0 : index
    %181 = vector.load %arg17[%c0_78, %c0_79] : memref<1x64xf32, #tpu.memory_space<vmem>>, vector<1x64xf32>
    %cst_80 = arith.constant dense<0.000000e+00> : vector<8x64xf32>
    %182 = tpu.matmul %4, %180, %cst_80 {dimension_numbers = #tpu.dot_dimension_numbers<[1], [0], [0], [1], [0, 0, 1, 1], [], []>} : vector<8x32xbf16>, vector<32x64xbf16>, vector<8x64xf32> -> vector<8x64xf32>
    %183 = vector.broadcast %181 : vector<1x64xf32> to vector<8x64xf32>
    %184 = arith.addf %182, %183 : vector<8x64xf32>
    %185 = vector.extract_strided_slice %184 {offsets = [0, 0], sizes = [8, 32], strides = [1, 1]} : vector<8x64xf32> to vector<8x32xf32>
    %186 = vector.extract_strided_slice %184 {offsets = [0, 32], sizes = [8, 32], strides = [1, 1]} : vector<8x64xf32> to vector<8x32xf32>
    %187 = arith.truncf %179 : vector<8x32xf32> to vector<8x32xbf16>
    %188 = arith.truncf %185 : vector<8x32xf32> to vector<8x32xbf16>
    %189 = arith.truncf %186 : vector<8x32xf32> to vector<8x32xbf16>
    %190 = vector.extract_strided_slice %187 {offsets = [0, 0], sizes = [8, 8], strides = [1, 1]} : vector<8x32xbf16> to vector<8x8xbf16>
    %191 = vector.extract_strided_slice %188 {offsets = [0, 0], sizes = [8, 8], strides = [1, 1]} : vector<8x32xbf16> to vector<8x8xbf16>
    %192 = vector.extract_strided_slice %189 {offsets = [0, 0], sizes = [8, 8], strides = [1, 1]} : vector<8x32xbf16> to vector<8x8xbf16>
    %cst_81 = arith.constant dense<0.000000e+00> : vector<8x8xf32>
    %193 = tpu.matmul %190, %191, %cst_81 {dimension_numbers = #tpu.dot_dimension_numbers<[1], [1], [0], [0], [0, 0, 1, 0], [], []>} : vector<8x8xbf16>, vector<8x8xbf16>, vector<8x8xf32> -> vector<8x8xf32>
    %194 = arith.addf %193, %30 : vector<8x8xf32>
    %cst_82 = arith.constant dense<0xFF800000> : vector<8xf32>
    %195 = vector.multi_reduction <maximumf>, %194, %cst_82 [1] : vector<8x8xf32> to vector<8xf32>
    %196 = vector.shape_cast %195 : vector<8xf32> to vector<8x1xf32>
    %197 = vector.broadcast %196 : vector<8x1xf32> to vector<8x8xf32>
    %198 = arith.subf %194, %197 : vector<8x8xf32>
    %199 = math.exp %198 : vector<8x8xf32>
    %cst_83 = arith.constant dense<0.000000e+00> : vector<8xf32>
    %200 = vector.multi_reduction <add>, %199, %cst_83 [1] : vector<8x8xf32> to vector<8xf32>
    %201 = vector.shape_cast %200 : vector<8xf32> to vector<8x1xf32>
    %202 = tpu.reciprocal %201 {approx = true} : vector<8x1xf32> -> vector<8x1xf32>
    %203 = vector.broadcast %202 : vector<8x1xf32> to vector<8x8xf32>
    %204 = arith.mulf %199, %203 : vector<8x8xf32>
    %205 = arith.truncf %204 : vector<8x8xf32> to vector<8x8xbf16>
    %cst_84 = arith.constant dense<0.000000e+00> : vector<8x8xf32>
    %206 = tpu.matmul %205, %192, %cst_84 {dimension_numbers = #tpu.dot_dimension_numbers<[1], [0], [0], [1], [0, 0, 1, 1], [], []>} : vector<8x8xbf16>, vector<8x8xbf16>, vector<8x8xf32> -> vector<8x8xf32>
    %207 = arith.truncf %206 : vector<8x8xf32> to vector<8x8xbf16>
    %c0_85 = arith.constant 0 : index
    %c0_86 = arith.constant 0 : index
    %208 = vector.load %arg27[%c0_85, %c0_86] : memref<8x32xbf16, #tpu.memory_space<vmem>>, vector<8x8xbf16>
    tpu.vector_store %arg27[%c0_85, %c0_86], %207 {strides = array<i32>} : memref<8x32xbf16, #tpu.memory_space<vmem>>, vector<8x8xbf16>,
    %209 = vector.extract_strided_slice %187 {offsets = [0, 8], sizes = [8, 8], strides = [1, 1]} : vector<8x32xbf16> to vector<8x8xbf16>
    %210 = vector.extract_strided_slice %188 {offsets = [0, 8], sizes = [8, 8], strides = [1, 1]} : vector<8x32xbf16> to vector<8x8xbf16>
    %211 = vector.extract_strided_slice %189 {offsets = [0, 8], sizes = [8, 8], strides = [1, 1]} : vector<8x32xbf16> to vector<8x8xbf16>
    %cst_87 = arith.constant dense<0.000000e+00> : vector<8x8xf32>
    %212 = tpu.matmul %209, %210, %cst_87 {dimension_numbers = #tpu.dot_dimension_numbers<[1], [1], [0], [0], [0, 0, 1, 0], [], []>} : vector<8x8xbf16>, vector<8x8xbf16>, vector<8x8xf32> -> vector<8x8xf32>
    %213 = arith.addf %212, %30 : vector<8x8xf32>
    %cst_88 = arith.constant dense<0xFF800000> : vector<8xf32>
    %214 = vector.multi_reduction <maximumf>, %213, %cst_88 [1] : vector<8x8xf32> to vector<8xf32>
    %215 = vector.shape_cast %214 : vector<8xf32> to vector<8x1xf32>
    %216 = vector.broadcast %215 : vector<8x1xf32> to vector<8x8xf32>
    %217 = arith.subf %213, %216 : vector<8x8xf32>
    %218 = math.exp %217 : vector<8x8xf32>
    %cst_89 = arith.constant dense<0.000000e+00> : vector<8xf32>
    %219 = vector.multi_reduction <add>, %218, %cst_89 [1] : vector<8x8xf32> to vector<8xf32>
    %220 = vector.shape_cast %219 : vector<8xf32> to vector<8x1xf32>
    %221 = tpu.reciprocal %220 {approx = true} : vector<8x1xf32> -> vector<8x1xf32>
    %222 = vector.broadcast %221 : vector<8x1xf32> to vector<8x8xf32>
    %223 = arith.mulf %218, %222 : vector<8x8xf32>
    %224 = arith.truncf %223 : vector<8x8xf32> to vector<8x8xbf16>
    %cst_90 = arith.constant dense<0.000000e+00> : vector<8x8xf32>
    %225 = tpu.matmul %224, %211, %cst_90 {dimension_numbers = #tpu.dot_dimension_numbers<[1], [0], [0], [1], [0, 0, 1, 1], [], []>} : vector<8x8xbf16>, vector<8x8xbf16>, vector<8x8xf32> -> vector<8x8xf32>
    %226 = arith.truncf %225 : vector<8x8xf32> to vector<8x8xbf16>
    %c0_91 = arith.constant 0 : index
    %c8_92 = arith.constant 8 : index
    %227 = vector.load %arg27[%c0_91, %c8_92] : memref<8x32xbf16, #tpu.memory_space<vmem>>, vector<8x8xbf16>
    tpu.vector_store %arg27[%c0_91, %c8_92], %226 {strides = array<i32>} : memref<8x32xbf16, #tpu.memory_space<vmem>>, vector<8x8xbf16>,
    %228 = vector.extract_strided_slice %187 {offsets = [0, 16], sizes = [8, 8], strides = [1, 1]} : vector<8x32xbf16> to vector<8x8xbf16>
    %229 = vector.extract_strided_slice %188 {offsets = [0, 16], sizes = [8, 8], strides = [1, 1]} : vector<8x32xbf16> to vector<8x8xbf16>
    %230 = vector.extract_strided_slice %189 {offsets = [0, 16], sizes = [8, 8], strides = [1, 1]} : vector<8x32xbf16> to vector<8x8xbf16>
    %cst_93 = arith.constant dense<0.000000e+00> : vector<8x8xf32>
    %231 = tpu.matmul %228, %229, %cst_93 {dimension_numbers = #tpu.dot_dimension_numbers<[1], [1], [0], [0], [0, 0, 1, 0], [], []>} : vector<8x8xbf16>, vector<8x8xbf16>, vector<8x8xf32> -> vector<8x8xf32>
    %232 = arith.addf %231, %30 : vector<8x8xf32>
    %cst_94 = arith.constant dense<0xFF800000> : vector<8xf32>
    %233 = vector.multi_reduction <maximumf>, %232, %cst_94 [1] : vector<8x8xf32> to vector<8xf32>
    %234 = vector.shape_cast %233 : vector<8xf32> to vector<8x1xf32>
    %235 = vector.broadcast %234 : vector<8x1xf32> to vector<8x8xf32>
    %236 = arith.subf %232, %235 : vector<8x8xf32>
    %237 = math.exp %236 : vector<8x8xf32>
    %cst_95 = arith.constant dense<0.000000e+00> : vector<8xf32>
    %238 = vector.multi_reduction <add>, %237, %cst_95 [1] : vector<8x8xf32> to vector<8xf32>
    %239 = vector.shape_cast %238 : vector<8xf32> to vector<8x1xf32>
    %240 = tpu.reciprocal %239 {approx = true} : vector<8x1xf32> -> vector<8x1xf32>
    %241 = vector.broadcast %240 : vector<8x1xf32> to vector<8x8xf32>
    %242 = arith.mulf %237, %241 : vector<8x8xf32>
    %243 = arith.truncf %242 : vector<8x8xf32> to vector<8x8xbf16>
    %cst_96 = arith.constant dense<0.000000e+00> : vector<8x8xf32>
    %244 = tpu.matmul %243, %230, %cst_96 {dimension_numbers = #tpu.dot_dimension_numbers<[1], [0], [0], [1], [0, 0, 1, 1], [], []>} : vector<8x8xbf16>, vector<8x8xbf16>, vector<8x8xf32> -> vector<8x8xf32>
    %245 = arith.truncf %244 : vector<8x8xf32> to vector<8x8xbf16>
    %c0_97 = arith.constant 0 : index
    %c16_98 = arith.constant 16 : index
    %246 = vector.load %arg27[%c0_97, %c16_98] : memref<8x32xbf16, #tpu.memory_space<vmem>>, vector<8x8xbf16>
    tpu.vector_store %arg27[%c0_97, %c16_98], %245 {strides = array<i32>} : memref<8x32xbf16, #tpu.memory_space<vmem>>, vector<8x8xbf16>,
    %247 = vector.extract_strided_slice %187 {offsets = [0, 24], sizes = [8, 8], strides = [1, 1]} : vector<8x32xbf16> to vector<8x8xbf16>
    %248 = vector.extract_strided_slice %188 {offsets = [0, 24], sizes = [8, 8], strides = [1, 1]} : vector<8x32xbf16> to vector<8x8xbf16>
    %249 = vector.extract_strided_slice %189 {offsets = [0, 24], sizes = [8, 8], strides = [1, 1]} : vector<8x32xbf16> to vector<8x8xbf16>
    %cst_99 = arith.constant dense<0.000000e+00> : vector<8x8xf32>
    %250 = tpu.matmul %247, %248, %cst_99 {dimension_numbers = #tpu.dot_dimension_numbers<[1], [1], [0], [0], [0, 0, 1, 0], [], []>} : vector<8x8xbf16>, vector<8x8xbf16>, vector<8x8xf32> -> vector<8x8xf32>
    %251 = arith.addf %250, %30 : vector<8x8xf32>
    %cst_100 = arith.constant dense<0xFF800000> : vector<8xf32>
    %252 = vector.multi_reduction <maximumf>, %251, %cst_100 [1] : vector<8x8xf32> to vector<8xf32>
    %253 = vector.shape_cast %252 : vector<8xf32> to vector<8x1xf32>
    %254 = vector.broadcast %253 : vector<8x1xf32> to vector<8x8xf32>
    %255 = arith.subf %251, %254 : vector<8x8xf32>
    %256 = math.exp %255 : vector<8x8xf32>
    %cst_101 = arith.constant dense<0.000000e+00> : vector<8xf32>
    %257 = vector.multi_reduction <add>, %256, %cst_101 [1] : vector<8x8xf32> to vector<8xf32>
    %258 = vector.shape_cast %257 : vector<8xf32> to vector<8x1xf32>
    %259 = tpu.reciprocal %258 {approx = true} : vector<8x1xf32> -> vector<8x1xf32>
    %260 = vector.broadcast %259 : vector<8x1xf32> to vector<8x8xf32>
    %261 = arith.mulf %256, %260 : vector<8x8xf32>
    %262 = arith.truncf %261 : vector<8x8xf32> to vector<8x8xbf16>
    %cst_102 = arith.constant dense<0.000000e+00> : vector<8x8xf32>
    %263 = tpu.matmul %262, %249, %cst_102 {dimension_numbers = #tpu.dot_dimension_numbers<[1], [0], [0], [1], [0, 0, 1, 1], [], []>} : vector<8x8xbf16>, vector<8x8xbf16>, vector<8x8xf32> -> vector<8x8xf32>
    %264 = arith.truncf %263 : vector<8x8xf32> to vector<8x8xbf16>
    %c0_103 = arith.constant 0 : index
    %c24_104 = arith.constant 24 : index
    %265 = vector.load %arg27[%c0_103, %c24_104] : memref<8x32xbf16, #tpu.memory_space<vmem>>, vector<8x8xbf16>
    tpu.vector_store %arg27[%c0_103, %c24_104], %264 {strides = array<i32>} : memref<8x32xbf16, #tpu.memory_space<vmem>>, vector<8x8xbf16>,
    %c0_105 = arith.constant 0 : index
    %c0_106 = arith.constant 0 : index
    %266 = vector.load %arg27[%c0_105, %c0_106] : memref<8x32xbf16, #tpu.memory_space<vmem>>, vector<8x32xbf16>
    %c0_107 = arith.constant 0 : index
    %c0_108 = arith.constant 0 : index
    %267 = vector.load %arg18[%c0_107, %c0_108] : memref<32x32xbf16, #tpu.memory_space<vmem>>, vector<32x32xbf16>
    %c0_109 = arith.constant 0 : index
    %c0_110 = arith.constant 0 : index
    %268 = vector.load %arg19[%c0_109, %c0_110] : memref<1x32xf32, #tpu.memory_space<vmem>>, vector<1x32xf32>
    %cst_111 = arith.constant dense<0.000000e+00> : vector<8x32xf32>
    %269 = tpu.matmul %266, %267, %cst_111 {dimension_numbers = #tpu.dot_dimension_numbers<[1], [0], [0], [1], [0, 0, 1, 1], [], []>} : vector<8x32xbf16>, vector<32x32xbf16>, vector<8x32xf32> -> vector<8x32xf32>
    %270 = vector.broadcast %268 : vector<1x32xf32> to vector<8x32xf32>
    %271 = arith.addf %269, %270 : vector<8x32xf32>
    %272 = arith.addf %149, %271 : vector<8x32xf32>
    %c0_112 = arith.constant 0 : index
    %c0_113 = arith.constant 0 : index
    %273 = vector.load %arg20[%c0_112, %c0_113] : memref<1x32xf32, #tpu.memory_space<vmem>>, vector<1x32xf32>
    %c0_114 = arith.constant 0 : index
    %c0_115 = arith.constant 0 : index
    %274 = vector.load %arg21[%c0_114, %c0_115] : memref<1x32xf32, #tpu.memory_space<vmem>>, vector<1x32xf32>
    %cst_116 = arith.constant dense<0.000000e+00> : vector<8xf32>
    %275 = vector.multi_reduction <add>, %272, %cst_116 [1] : vector<8x32xf32> to vector<8xf32>
    %276 = vector.shape_cast %275 : vector<8xf32> to vector<8x1xf32>
    %cst_117 = arith.constant 3.200000e+01 : f32
    %277 = vector.broadcast %cst_117 : f32 to vector<8x1xf32>
    %278 = arith.divf %276, %277 : vector<8x1xf32>
    %279 = vector.broadcast %278 : vector<8x1xf32> to vector<8x32xf32>
    %280 = arith.subf %272, %279 : vector<8x32xf32>
    %281 = arith.mulf %280, %280 : vector<8x32xf32>
    %cst_118 = arith.constant dense<0.000000e+00> : vector<8xf32>
    %282 = vector.multi_reduction <add>, %281, %cst_118 [1] : vector<8x32xf32> to vector<8xf32>
    %283 = vector.shape_cast %282 : vector<8xf32> to vector<8x1xf32>
    %cst_119 = arith.constant 3.200000e+01 : f32
    %284 = vector.broadcast %cst_119 : f32 to vector<8x1xf32>
    %285 = arith.divf %283, %284 : vector<8x1xf32>
    %286 = vector.broadcast %278 : vector<8x1xf32> to vector<8x32xf32>
    %287 = arith.subf %272, %286 : vector<8x32xf32>
    %cst_120 = arith.constant 9.99999974E-6 : f32
    %288 = vector.broadcast %cst_120 : f32 to vector<8x1xf32>
    %289 = arith.addf %285, %288 : vector<8x1xf32>
    %290 = math.rsqrt %289 : vector<8x1xf32>
    %291 = vector.broadcast %290 : vector<8x1xf32> to vector<8x32xf32>
    %292 = arith.mulf %287, %291 : vector<8x32xf32>
    %293 = vector.broadcast %273 : vector<1x32xf32> to vector<8x32xf32>
    %294 = arith.mulf %292, %293 : vector<8x32xf32>
    %295 = vector.broadcast %274 : vector<1x32xf32> to vector<8x32xf32>
    %296 = arith.addf %294, %295 : vector<8x32xf32>
    %c0_121 = arith.constant 0 : index
    %c0_122 = arith.constant 0 : index
    %297 = vector.load %arg22[%c0_121, %c0_122] : memref<32x128xbf16, #tpu.memory_space<vmem>>, vector<32x128xbf16>
    %c0_123 = arith.constant 0 : index
    %c0_124 = arith.constant 0 : index
    %298 = vector.load %arg23[%c0_123, %c0_124] : memref<1x128xf32, #tpu.memory_space<vmem>>, vector<1x128xf32>
    %299 = arith.truncf %296 : vector<8x32xf32> to vector<8x32xbf16>
    %cst_125 = arith.constant dense<0.000000e+00> : vector<8x128xf32>
    %300 = tpu.matmul %299, %297, %cst_125 {dimension_numbers = #tpu.dot_dimension_numbers<[1], [0], [0], [1], [0, 0, 1, 1], [], []>} : vector<8x32xbf16>, vector<32x128xbf16>, vector<8x128xf32> -> vector<8x128xf32>
    %301 = vector.broadcast %298 : vector<1x128xf32> to vector<8x128xf32>
    %302 = arith.addf %300, %301 : vector<8x128xf32>
    %cst_126 = arith.constant 0.000000e+00 : f32
    %303 = vector.broadcast %cst_126 : f32 to vector<8x128xf32>
    %304 = arith.maximumf %302, %303 : vector<8x128xf32>
    %c0_127 = arith.constant 0 : index
    %c0_128 = arith.constant 0 : index
    %305 = vector.load %arg24[%c0_127, %c0_128] : memref<128x32xbf16, #tpu.memory_space<vmem>>, vector<128x32xbf16>
    %c0_129 = arith.constant 0 : index
    %c0_130 = arith.constant 0 : index
    %306 = vector.load %arg25[%c0_129, %c0_130] : memref<1x32xf32, #tpu.memory_space<vmem>>, vector<1x32xf32>
    %307 = arith.truncf %304 : vector<8x128xf32> to vector<8x128xbf16>
    %cst_131 = arith.constant dense<0.000000e+00> : vector<8x32xf32>
    %308 = tpu.matmul %307, %305, %cst_131 {dimension_numbers = #tpu.dot_dimension_numbers<[1], [0], [0], [1], [0, 0, 1, 1], [], []>} : vector<8x128xbf16>, vector<128x32xbf16>, vector<8x32xf32> -> vector<8x32xf32>
    %309 = vector.broadcast %306 : vector<1x32xf32> to vector<8x32xf32>
    %310 = arith.addf %308, %309 : vector<8x32xf32>
    %311 = arith.addf %272, %310 : vector<8x32xf32>
    %312 = arith.truncf %311 : vector<8x32xf32> to vector<8x32xbf16>
    %c0_132 = arith.constant 0 : index
    %c0_133 = arith.constant 0 : index
    %c0_134 = arith.constant 0 : index
    %313 = vector.load %arg26[%c0_132, %c0_133, %c0_134] : memref<1x8x32xbf16, #tpu.memory_space<vmem>>, vector<1x8x32xbf16>
    %314 = vector.shape_cast %313 : vector<1x8x32xbf16> to vector<8x32xbf16>
    %315 = vector.shape_cast %312 : vector<8x32xbf16> to vector<1x8x32xbf16>
    tpu.vector_store %arg26[%c0_132, %c0_133, %c0_134], %315 {strides = array<i32>} : memref<1x8x32xbf16, #tpu.memory_space<vmem>>, vector<1x8x32xbf16>,
    return
  }
  func.func @transform_0(%arg0: i32) -> (i32, i32, i32) {
    %c0_i32 = arith.constant 0 : i32
    %c0_i32_0 = arith.constant 0 : i32
    %c0_i32_1 = arith.constant 0 : i32
    return %arg0, %c0_i32, %c0_i32_0 : i32, i32, i32
  }
  func.func @transform_1(%arg0: i32) -> (i32, i32, i32) {
    %c0_i32 = arith.constant 0 : i32
    %c0_i32_0 = arith.constant 0 : i32
    %c0_i32_1 = arith.constant 0 : i32
    return %arg0, %c0_i32, %c0_i32_0 : i32, i32, i32
  }
  func.func @transform_2(%arg0: i32) -> (i32, i32, i32) {
    %c0_i32 = arith.constant 0 : i32
    %c0_i32_0 = arith.constant 0 : i32
    %c0_i32_1 = arith.constant 0 : i32
    return %arg0, %c0_i32, %c0_i32_0 : i32, i32, i32
  }
  func.func @transform_3(%arg0: i32) -> (i32, i32, i32) {
    %c0_i32 = arith.constant 0 : i32
    %c0_i32_0 = arith.constant 0 : i32
    %c0_i32_1 = arith.constant 0 : i32
    return %arg0, %c0_i32, %c0_i32_0 : i32, i32, i32
  }
  func.func @transform_4(%arg0: i32) -> (i32, i32, i32) {
    %c0_i32 = arith.constant 0 : i32
    %c0_i32_0 = arith.constant 0 : i32
    %c0_i32_1 = arith.constant 0 : i32
    return %arg0, %c0_i32, %c0_i32_0 : i32, i32, i32
  }
  func.func @transform_5(%arg0: i32) -> (i32, i32) {
    %c0_i32 = arith.constant 0 : i32
    %c0_i32_0 = arith.constant 0 : i32
    %c0_i32_1 = arith.constant 0 : i32
    return %c0_i32, %c0_i32_0 : i32, i32
  }
  func.func @transform_6(%arg0: i32) -> (i32, i32) {
    %c0_i32 = arith.constant 0 : i32
    %c0_i32_0 = arith.constant 0 : i32
    %c0_i32_1 = arith.constant 0 : i32
    return %c0_i32, %c0_i32_0 : i32, i32
  }
  func.func @transform_7(%arg0: i32) -> (i32, i32) {
    %c0_i32 = arith.constant 0 : i32
    %c0_i32_0 = arith.constant 0 : i32
    %c0_i32_1 = arith.constant 0 : i32
    return %c0_i32, %c0_i32_0 : i32, i32
  }
  func.func @transform_8(%arg0: i32) -> (i32, i32) {
    %c0_i32 = arith.constant 0 : i32
    %c0_i32_0 = arith.constant 0 : i32
    %c0_i32_1 = arith.constant 0 : i32
    return %c0_i32, %c0_i32_0 : i32, i32
  }
  func.func @transform_9(%arg0: i32) -> (i32, i32) {
    %c0_i32 = arith.constant 0 : i32
    %c0_i32_0 = arith.constant 0 : i32
    %c0_i32_1 = arith.constant 0 : i32
    return %c0_i32, %c0_i32_0 : i32, i32
  }
  func.func @transform_10(%arg0: i32) -> (i32, i32) {
    %c0_i32 = arith.constant 0 : i32
    %c0_i32_0 = arith.constant 0 : i32
    %c0_i32_1 = arith.constant 0 : i32
    return %c0_i32, %c0_i32_0 : i32, i32
  }
  func.func @transform_11(%arg0: i32) -> (i32, i32) {
    %c0_i32 = arith.constant 0 : i32
    %c0_i32_0 = arith.constant 0 : i32
    %c0_i32_1 = arith.constant 0 : i32
    return %c0_i32, %c0_i32_0 : i32, i32
  }
  func.func @transform_12(%arg0: i32) -> (i32, i32) {
    %c0_i32 = arith.constant 0 : i32
    %c0_i32_0 = arith.constant 0 : i32
    %c0_i32_1 = arith.constant 0 : i32
    return %c0_i32, %c0_i32_0 : i32, i32
  }
  func.func @transform_13(%arg0: i32) -> (i32, i32) {
    %c0_i32 = arith.constant 0 : i32
    %c0_i32_0 = arith.constant 0 : i32
    %c0_i32_1 = arith.constant 0 : i32
    return %c0_i32, %c0_i32_0 : i32, i32
  }
  func.func @transform_14(%arg0: i32) -> (i32, i32) {
    %c0_i32 = arith.constant 0 : i32
    %c0_i32_0 = arith.constant 0 : i32
    %c0_i32_1 = arith.constant 0 : i32
    return %c0_i32, %c0_i32_0 : i32, i32
  }
  func.func @transform_15(%arg0: i32) -> (i32, i32) {
    %c0_i32 = arith.constant 0 : i32
    %c0_i32_0 = arith.constant 0 : i32
    %c0_i32_1 = arith.constant 0 : i32
    return %c0_i32, %c0_i32_0 : i32, i32
  }
  func.func @transform_16(%arg0: i32) -> (i32, i32) {
    %c0_i32 = arith.constant 0 : i32
    %c0_i32_0 = arith.constant 0 : i32
    %c0_i32_1 = arith.constant 0 : i32
    return %c0_i32, %c0_i32_0 : i32, i32
  }
  func.func @transform_17(%arg0: i32) -> (i32, i32) {
    %c0_i32 = arith.constant 0 : i32
    %c0_i32_0 = arith.constant 0 : i32
    %c0_i32_1 = arith.constant 0 : i32
    return %c0_i32, %c0_i32_0 : i32, i32
  }
  func.func @transform_18(%arg0: i32) -> (i32, i32) {
    %c0_i32 = arith.constant 0 : i32
    %c0_i32_0 = arith.constant 0 : i32
    %c0_i32_1 = arith.constant 0 : i32
    return %c0_i32, %c0_i32_0 : i32, i32
  }
  func.func @transform_19(%arg0: i32) -> (i32, i32) {
    %c0_i32 = arith.constant 0 : i32
    %c0_i32_0 = arith.constant 0 : i32
    %c0_i32_1 = arith.constant 0 : i32
    return %c0_i32, %c0_i32_0 : i32, i32
  }
  func.func @transform_20(%arg0: i32) -> (i32, i32) {
    %c0_i32 = arith.constant 0 : i32
    %c0_i32_0 = arith.constant 0 : i32
    %c0_i32_1 = arith.constant 0 : i32
    return %c0_i32, %c0_i32_0 : i32, i32
  }
  func.func @transform_21(%arg0: i32) -> (i32, i32) {
    %c0_i32 = arith.constant 0 : i32
    %c0_i32_0 = arith.constant 0 : i32
    %c0_i32_1 = arith.constant 0 : i32
    return %c0_i32, %c0_i32_0 : i32, i32
  }
  func.func @transform_22(%arg0: i32) -> (i32, i32) {
    %c0_i32 = arith.constant 0 : i32
    %c0_i32_0 = arith.constant 0 : i32
    %c0_i32_1 = arith.constant 0 : i32
    return %c0_i32, %c0_i32_0 : i32, i32
  }
  func.func @transform_23(%arg0: i32) -> (i32, i32) {
    %c0_i32 = arith.constant 0 : i32
    %c0_i32_0 = arith.constant 0 : i32
    %c0_i32_1 = arith.constant 0 : i32
    return %c0_i32, %c0_i32_0 : i32, i32
  }
  func.func @transform_24(%arg0: i32) -> (i32, i32) {
    %c0_i32 = arith.constant 0 : i32
    %c0_i32_0 = arith.constant 0 : i32
    %c0_i32_1 = arith.constant 0 : i32
    return %c0_i32, %c0_i32_0 : i32, i32
  }
  func.func @transform_25(%arg0: i32) -> (i32, i32, i32) {
    %c0_i32 = arith.constant 0 : i32
    %c0_i32_0 = arith.constant 0 : i32
    %c0_i32_1 = arith.constant 0 : i32
    return %arg0, %c0_i32, %c0_i32_0 : i32, i32, i32
  }
}

module attributes {stable_mosaic.version = 11 : i64} {
  func.func @_decoder_layer_kernel(%arg0: i32, %arg1: memref<1x8x32xbf16, #tpu.memory_space<vmem>>, %arg2: memref<1x8x32xbf16, #tpu.memory_space<vmem>>, %arg3: memref<1x1x8xf32, #tpu.memory_space<vmem>>, %arg4: memref<1x1x8xf32, #tpu.memory_space<vmem>>, %arg5: memref<1x8x1xf32, #tpu.memory_space<vmem>>, %arg6: memref<1x32xf32, #tpu.memory_space<vmem>>, %arg7: memref<1x32xf32, #tpu.memory_space<vmem>>, %arg8: memref<32x96xbf16, #tpu.memory_space<vmem>>, %arg9: memref<1x96xf32, #tpu.memory_space<vmem>>, %arg10: memref<32x32xbf16, #tpu.memory_space<vmem>>, %arg11: memref<1x32xf32, #tpu.memory_space<vmem>>, %arg12: memref<1x32xf32, #tpu.memory_space<vmem>>, %arg13: memref<1x32xf32, #tpu.memory_space<vmem>>, %arg14: memref<32x32xbf16, #tpu.memory_space<vmem>>, %arg15: memref<1x32xf32, #tpu.memory_space<vmem>>, %arg16: memref<32x64xbf16, #tpu.memory_space<vmem>>, %arg17: memref<1x64xf32, #tpu.memory_space<vmem>>, %arg18: memref<32x32xbf16, #tpu.memory_space<vmem>>, %arg19: memref<1x32xf32, #tpu.memory_space<vmem>>, %arg20: memref<1x32xf32, #tpu.memory_space<vmem>>, %arg21: memref<1x32xf32, #tpu.memory_space<vmem>>, %arg22: memref<32x128xbf16, #tpu.memory_space<vmem>>, %arg23: memref<1x128xf32, #tpu.memory_space<vmem>>, %arg24: memref<128x32xbf16, #tpu.memory_space<vmem>>, %arg25: memref<1x32xf32, #tpu.memory_space<vmem>>, %arg26: memref<1x8x32xbf16, #tpu.memory_space<vmem>>, %arg27: memref<8x32xbf16, #tpu.memory_space<vmem>>) attributes {dimension_semantics = [#tpu.dimension_semantics<parallel>], iteration_bounds = array<i64: 2>, scalar_prefetch = 0 : i64, scratch_operands = 1 : i64, tpu.core_type = #tpu.core_type<tc>, window_params = [{transform_indices = @transform_0, window_bounds = array<i64: 1, 8, 32>}, {transform_indices = @transform_1, window_bounds = array<i64: 1, 8, 32>}, {transform_indices = @transform_2, window_bounds = array<i64: 1, 1, 8>}, {transform_indices = @transform_3, window_bounds = array<i64: 1, 1, 8>}, {transform_indices = @transform_4, window_bounds = array<i64: 1, 8, 1>}, {pipeline_mode = #tpu.pipeline_mode<synchronous>, transform_indices = @transform_5, window_bounds = array<i64: 1, 32>}, {pipeline_mode = #tpu.pipeline_mode<synchronous>, transform_indices = @transform_6, window_bounds = array<i64: 1, 32>}, {pipeline_mode = #tpu.pipeline_mode<synchronous>, transform_indices = @transform_7, window_bounds = array<i64: 32, 96>}, {pipeline_mode = #tpu.pipeline_mode<synchronous>, transform_indices = @transform_8, window_bounds = array<i64: 1, 96>}, {pipeline_mode = #tpu.pipeline_mode<synchronous>, transform_indices = @transform_9, window_bounds = array<i64: 32, 32>}, {pipeline_mode = #tpu.pipeline_mode<synchronous>, transform_indices = @transform_10, window_bounds = array<i64: 1, 32>}, {pipeline_mode = #tpu.pipeline_mode<synchronous>, transform_indices = @transform_11, window_bounds = array<i64: 1, 32>}, {pipeline_mode = #tpu.pipeline_mode<synchronous>, transform_indices = @transform_12, window_bounds = array<i64: 1, 32>}, {pipeline_mode = #tpu.pipeline_mode<synchronous>, transform_indices = @transform_13, window_bounds = array<i64: 32, 32>}, {pipeline_mode = #tpu.pipeline_mode<synchronous>, transform_indices = @transform_14, window_bounds = array<i64: 1, 32>}, {pipeline_mode = #tpu.pipeline_mode<synchronous>, transform_indices = @transform_15, window_bounds = array<i64: 32, 64>}, {pipeline_mode = #tpu.pipeline_mode<synchronous>, transform_indices = @transform_16, window_bounds = array<i64: 1, 64>}, {pipeline_mode = #tpu.pipeline_mode<synchronous>, transform_indices = @transform_17, window_bounds = array<i64: 32, 32>}, {pipeline_mode = #tpu.pipeline_mode<synchronous>, transform_indices = @transform_18, window_bounds = array<i64: 1, 32>}, {pipeline_mode = #tpu.pipeline_mode<synchronous>, transform_indices = @transform_19, window_bounds = array<i64: 1, 32>}, {pipeline_mode = #tpu.pipeline_mode<synchronous>, transform_indices = @transform_20, window_bounds = array<i64: 1, 32>}, {pipeline_mode = #tpu.pipeline_mode<synchronous>, transform_indices = @transform_21, window_bounds = array<i64: 32, 128>}, {pipeline_mode = #tpu.pipeline_mode<synchronous>, transform_indices = @transform_22, window_bounds = array<i64: 1, 128>}, {pipeline_mode = #tpu.pipeline_mode<synchronous>, transform_indices = @transform_23, window_bounds = array<i64: 128, 32>}, {pipeline_mode = #tpu.pipeline_mode<synchronous>, transform_indices = @transform_24, window_bounds = array<i64: 1, 32>}, {transform_indices = @transform_25, window_bounds = array<i64: 1, 8, 32>}]} {
    %c0 = arith.constant 0 : index
    %c0_0 = arith.constant 0 : index
    %c0_1 = arith.constant 0 : index
    %0 = vector.load %arg1[%c0, %c0_0, %c0_1] : memref<1x8x32xbf16, #tpu.memory_space<vmem>>, vector<1x8x32xbf16>
    %1 = vector.shape_cast %0 : vector<1x8x32xbf16> to vector<8x32xbf16>
    %2 = arith.extf %1 : vector<8x32xbf16> to vector<8x32xf32>
    %c0_2 = arith.constant 0 : index
    %c0_3 = arith.constant 0 : index
    %c0_4 = arith.constant 0 : index
    %3 = vector.load %arg2[%c0_2, %c0_3, %c0_4] : memref<1x8x32xbf16, #tpu.memory_space<vmem>>, vector<1x8x32xbf16>
    %4 = vector.shape_cast %3 : vector<1x8x32xbf16> to vector<8x32xbf16>
    %c0_5 = arith.constant 0 : index
    %c0_6 = arith.constant 0 : index
    %c0_7 = arith.constant 0 : index
    %5 = vector.load %arg3[%c0_5, %c0_6, %c0_7] : memref<1x1x8xf32, #tpu.memory_space<vmem>>, vector<1x1x8xf32>
    %6 = vector.shape_cast %5 : vector<1x1x8xf32> to vector<1x8xf32>
    %cst = arith.constant 0.000000e+00 : f32
    %7 = vector.broadcast %cst : f32 to vector<1x8xf32>
    %8 = arith.cmpf ogt, %6, %7 : vector<1x8xf32>
    %c0_8 = arith.constant 0 : index
    %c0_9 = arith.constant 0 : index
    %c0_10 = arith.constant 0 : index
    %9 = vector.load %arg4[%c0_8, %c0_9, %c0_10] : memref<1x1x8xf32, #tpu.memory_space<vmem>>, vector<1x1x8xf32>
    %10 = vector.shape_cast %9 : vector<1x1x8xf32> to vector<1x8xf32>
    %cst_11 = arith.constant 0.000000e+00 : f32
    %11 = vector.broadcast %cst_11 : f32 to vector<1x8xf32>
    %12 = arith.cmpf ogt, %10, %11 : vector<1x8xf32>
    %c0_12 = arith.constant 0 : index
    %c0_13 = arith.constant 0 : index
    %c0_14 = arith.constant 0 : index
    %13 = vector.load %arg5[%c0_12, %c0_13, %c0_14] : memref<1x8x1xf32, #tpu.memory_space<vmem>>, vector<1x8x1xf32>
    %14 = vector.shape_cast %13 : vector<1x8x1xf32> to vector<8x1xf32>
    %cst_15 = arith.constant 0.000000e+00 : f32
    %15 = vector.broadcast %cst_15 : f32 to vector<8x1xf32>
    %16 = arith.cmpf ogt, %14, %15 : vector<8x1xf32>
    %17 = tpu.iota {dimensions = array<i32: 0>} : vector<8x8xi32>
    %18 = tpu.iota {dimensions = array<i32: 1>} : vector<8x8xi32>
    %19 = arith.cmpi sge, %17, %18 : vector<8x8xi32>
    %20 = vector.broadcast %8 : vector<1x8xi1> to vector<8x8xi1>
    %21 = arith.andi %19, %20 : vector<8x8xi1>
    %cst_16 = arith.constant 0.000000e+00 : f32
    %cst_17 = arith.constant -1.000000e+30 : f32
    %22 = vector.broadcast %cst_16 : f32 to vector<8x8xf32>
    %23 = vector.broadcast %cst_17 : f32 to vector<8x8xf32>
    %24 = arith.select %21, %22, %23 : vector<8x8xi1>, vector<8x8xf32>
    %25 = vector.broadcast %12 : vector<1x8xi1> to vector<8x8xi1>
    %26 = vector.broadcast %16 : vector<8x1xi1> to vector<8x8xi1>
    %27 = arith.andi %25, %26 : vector<8x8xi1>
    %cst_18 = arith.constant 0.000000e+00 : f32
    %cst_19 = arith.constant -1.000000e+30 : f32
    %28 = vector.broadcast %cst_18 : f32 to vector<8x8xf32>
    %29 = vector.broadcast %cst_19 : f32 to vector<8x8xf32>
    %30 = arith.select %27, %28, %29 : vector<8x8xi1>, vector<8x8xf32>
    %c0_20 = arith.constant 0 : index
    %c0_21 = arith.constant 0 : index
    %31 = vector.load %arg6[%c0_20, %c0_21] : memref<1x32xf32, #tpu.memory_space<vmem>>, vector<1x32xf32>
    %c0_22 = arith.constant 0 : index
    %c0_23 = arith.constant 0 : index
    %32 = vector.load %arg7[%c0_22, %c0_23] : memref<1x32xf32, #tpu.memory_space<vmem>>, vector<1x32xf32>
    %cst_24 = arith.constant dense<0.000000e+00> : vector<8xf32>
    %33 = vector.multi_reduction <add>, %2, %cst_24 [1] : vector<8x32xf32> to vector<8xf32>
    %34 = vector.shape_cast %33 : vector<8xf32> to vector<8x1xf32>
    %cst_25 = arith.constant 3.200000e+01 : f32
    %35 = vector.broadcast %cst_25 : f32 to vector<8x1xf32>
    %36 = arith.divf %34, %35 : vector<8x1xf32>
    %37 = vector.broadcast %36 : vector<8x1xf32> to vector<8x32xf32>
    %38 = arith.subf %2, %37 : vector<8x32xf32>
    %39 = arith.mulf %38, %38 : vector<8x32xf32>
    %cst_26 = arith.constant dense<0.000000e+00> : vector<8xf32>
    %40 = vector.multi_reduction <add>, %39, %cst_26 [1] : vector<8x32xf32> to vector<8xf32>
    %41 = vector.shape_cast %40 : vector<8xf32> to vector<8x1xf32>
    %cst_27 = arith.constant 3.200000e+01 : f32
    %42 = vector.broadcast %cst_27 : f32 to vector<8x1xf32>
    %43 = arith.divf %41, %42 : vector<8x1xf32>
    %44 = vector.broadcast %36 : vector<8x1xf32> to vector<8x32xf32>
    %45 = arith.subf %2, %44 : vector<8x32xf32>
    %cst_28 = arith.constant 9.99999974E-6 : f32
    %46 = vector.broadcast %cst_28 : f32 to vector<8x1xf32>
    %47 = arith.addf %43, %46 : vector<8x1xf32>
    %48 = math.rsqrt %47 : vector<8x1xf32>
    %49 = vector.broadcast %48 : vector<8x1xf32> to vector<8x32xf32>
    %50 = arith.mulf %45, %49 : vector<8x32xf32>
    %51 = vector.broadcast %31 : vector<1x32xf32> to vector<8x32xf32>
    %52 = arith.mulf %50, %51 : vector<8x32xf32>
    %53 = vector.broadcast %32 : vector<1x32xf32> to vector<8x32xf32>
    %54 = arith.addf %52, %53 : vector<8x32xf32>
    %c0_29 = arith.constant 0 : index
    %c0_30 = arith.constant 0 : index
    %55 = vector.load %arg8[%c0_29, %c0_30] : memref<32x96xbf16, #tpu.memory_space<vmem>>, vector<32x96xbf16>
    %c0_31 = arith.constant 0 : index
    %c0_32 = arith.constant 0 : index
    %56 = vector.load %arg9[%c0_31, %c0_32] : memref<1x96xf32, #tpu.memory_space<vmem>>, vector<1x96xf32>
    %57 = arith.truncf %54 : vector<8x32xf32> to vector<8x32xbf16>
    %cst_33 = arith.constant dense<0.000000e+00> : vector<8x96xf32>
    %58 = tpu.matmul %57, %55, %cst_33 {dimension_numbers = #tpu.dot_dimension_numbers<[1], [0], [0], [1], [0, 0, 1, 1], [], []>} : vector<8x32xbf16>, vector<32x96xbf16>, vector<8x96xf32> -> vector<8x96xf32>
    %59 = vector.broadcast %56 : vector<1x96xf32> to vector<8x96xf32>
    %60 = arith.addf %58, %59 : vector<8x96xf32>
    %61 = vector.extract_strided_slice %60 {offsets = [0, 0], sizes = [8, 32], strides = [1, 1]} : vector<8x96xf32> to vector<8x32xf32>
    %62 = vector.extract_strided_slice %60 {offsets = [0, 32], sizes = [8, 32], strides = [1, 1]} : vector<8x96xf32> to vector<8x32xf32>
    %63 = vector.extract_strided_slice %60 {offsets = [0, 64], sizes = [8, 32], strides = [1, 1]} : vector<8x96xf32> to vector<8x32xf32>
    %64 = arith.truncf %61 : vector<8x32xf32> to vector<8x32xbf16>
    %65 = arith.truncf %62 : vector<8x32xf32> to vector<8x32xbf16>
    %66 = arith.truncf %63 : vector<8x32xf32> to vector<8x32xbf16>
    %67 = vector.extract_strided_slice %64 {offsets = [0, 0], sizes = [8, 8], strides = [1, 1]} : vector<8x32xbf16> to vector<8x8xbf16>
    %68 = vector.extract_strided_slice %65 {offsets = [0, 0], sizes = [8, 8], strides = [1, 1]} : vector<8x32xbf16> to vector<8x8xbf16>
    %69 = vector.extract_strided_slice %66 {offsets = [0, 0], sizes = [8, 8], strides = [1, 1]} : vector<8x32xbf16> to vector<8x8xbf16>
    %cst_34 = arith.constant dense<0.000000e+00> : vector<8x8xf32>
    %70 = tpu.matmul %67, %68, %cst_34 {dimension_numbers = #tpu.dot_dimension_numbers<[1], [1], [0], [0], [0, 0, 1, 0], [], []>} : vector<8x8xbf16>, vector<8x8xbf16>, vector<8x8xf32> -> vector<8x8xf32>
    %71 = arith.addf %70, %24 : vector<8x8xf32>
    %cst_35 = arith.constant dense<0xFF800000> : vector<8xf32>
    %72 = vector.multi_reduction <maximumf>, %71, %cst_35 [1] : vector<8x8xf32> to vector<8xf32>
    %73 = vector.shape_cast %72 : vector<8xf32> to vector<8x1xf32>
    %74 = vector.broadcast %73 : vector<8x1xf32> to vector<8x8xf32>
    %75 = arith.subf %71, %74 : vector<8x8xf32>
    %76 = math.exp %75 : vector<8x8xf32>
    %cst_36 = arith.constant dense<0.000000e+00> : vector<8xf32>
    %77 = vector.multi_reduction <add>, %76, %cst_36 [1] : vector<8x8xf32> to vector<8xf32>
    %78 = vector.shape_cast %77 : vector<8xf32> to vector<8x1xf32>
    %79 = tpu.reciprocal %78 {approx = true} : vector<8x1xf32> -> vector<8x1xf32>
    %80 = vector.broadcast %79 : vector<8x1xf32> to vector<8x8xf32>
    %81 = arith.mulf %76, %80 : vector<8x8xf32>
    %82 = arith.truncf %81 : vector<8x8xf32> to vector<8x8xbf16>
    %cst_37 = arith.constant dense<0.000000e+00> : vector<8x8xf32>
    %83 = tpu.matmul %82, %69, %cst_37 {dimension_numbers = #tpu.dot_dimension_numbers<[1], [0], [0], [1], [0, 0, 1, 1], [], []>} : vector<8x8xbf16>, vector<8x8xbf16>, vector<8x8xf32> -> vector<8x8xf32>
    %84 = arith.truncf %83 : vector<8x8xf32> to vector<8x8xbf16>
    %c0_38 = arith.constant 0 : index
    %c0_39 = arith.constant 0 : index
    %85 = vector.load %arg27[%c0_38, %c0_39] : memref<8x32xbf16, #tpu.memory_space<vmem>>, vector<8x8xbf16>
    tpu.vector_store %arg27[%c0_38, %c0_39], %84 {strides = array<i32>} : memref<8x32xbf16, #tpu.memory_space<vmem>>, vector<8x8xbf16>,
    %86 = vector.extract_strided_slice %64 {offsets = [0, 8], sizes = [8, 8], strides = [1, 1]} : vector<8x32xbf16> to vector<8x8xbf16>
    %87 = vector.extract_strided_slice %65 {offsets = [0, 8], sizes = [8, 8], strides = [1, 1]} : vector<8x32xbf16> to vector<8x8xbf16>
    %88 = vector.extract_strided_slice %66 {offsets = [0, 8], sizes = [8, 8], strides = [1, 1]} : vector<8x32xbf16> to vector<8x8xbf16>
    %cst_40 = arith.constant dense<0.000000e+00> : vector<8x8xf32>
    %89 = tpu.matmul %86, %87, %cst_40 {dimension_numbers = #tpu.dot_dimension_numbers<[1], [1], [0], [0], [0, 0, 1, 0], [], []>} : vector<8x8xbf16>, vector<8x8xbf16>, vector<8x8xf32> -> vector<8x8xf32>
    %90 = arith.addf %89, %24 : vector<8x8xf32>
    %cst_41 = arith.constant dense<0xFF800000> : vector<8xf32>
    %91 = vector.multi_reduction <maximumf>, %90, %cst_41 [1] : vector<8x8xf32> to vector<8xf32>
    %92 = vector.shape_cast %91 : vector<8xf32> to vector<8x1xf32>
    %93 = vector.broadcast %92 : vector<8x1xf32> to vector<8x8xf32>
    %94 = arith.subf %90, %93 : vector<8x8xf32>
    %95 = math.exp %94 : vector<8x8xf32>
    %cst_42 = arith.constant dense<0.000000e+00> : vector<8xf32>
    %96 = vector.multi_reduction <add>, %95, %cst_42 [1] : vector<8x8xf32> to vector<8xf32>
    %97 = vector.shape_cast %96 : vector<8xf32> to vector<8x1xf32>
    %98 = tpu.reciprocal %97 {approx = true} : vector<8x1xf32> -> vector<8x1xf32>
    %99 = vector.broadcast %98 : vector<8x1xf32> to vector<8x8xf32>
    %100 = arith.mulf %95, %99 : vector<8x8xf32>
    %101 = arith.truncf %100 : vector<8x8xf32> to vector<8x8xbf16>
    %cst_43 = arith.constant dense<0.000000e+00> : vector<8x8xf32>
    %102 = tpu.matmul %101, %88, %cst_43 {dimension_numbers = #tpu.dot_dimension_numbers<[1], [0], [0], [1], [0, 0, 1, 1], [], []>} : vector<8x8xbf16>, vector<8x8xbf16>, vector<8x8xf32> -> vector<8x8xf32>
    %103 = arith.truncf %102 : vector<8x8xf32> to vector<8x8xbf16>
    %c0_44 = arith.constant 0 : index
    %c8 = arith.constant 8 : index
    %104 = vector.load %arg27[%c0_44, %c8] : memref<8x32xbf16, #tpu.memory_space<vmem>>, vector<8x8xbf16>
    tpu.vector_store %arg27[%c0_44, %c8], %103 {strides = array<i32>} : memref<8x32xbf16, #tpu.memory_space<vmem>>, vector<8x8xbf16>,
    %105 = vector.extract_strided_slice %64 {offsets = [0, 16], sizes = [8, 8], strides = [1, 1]} : vector<8x32xbf16> to vector<8x8xbf16>
    %106 = vector.extract_strided_slice %65 {offsets = [0, 16], sizes = [8, 8], strides = [1, 1]} : vector<8x32xbf16> to vector<8x8xbf16>
    %107 = vector.extract_strided_slice %66 {offsets = [0, 16], sizes = [8, 8], strides = [1, 1]} : vector<8x32xbf16> to vector<8x8xbf16>
    %cst_45 = arith.constant dense<0.000000e+00> : vector<8x8xf32>
    %108 = tpu.matmul %105, %106, %cst_45 {dimension_numbers = #tpu.dot_dimension_numbers<[1], [1], [0], [0], [0, 0, 1, 0], [], []>} : vector<8x8xbf16>, vector<8x8xbf16>, vector<8x8xf32> -> vector<8x8xf32>
    %109 = arith.addf %108, %24 : vector<8x8xf32>
    %cst_46 = arith.constant dense<0xFF800000> : vector<8xf32>
    %110 = vector.multi_reduction <maximumf>, %109, %cst_46 [1] : vector<8x8xf32> to vector<8xf32>
    %111 = vector.shape_cast %110 : vector<8xf32> to vector<8x1xf32>
    %112 = vector.broadcast %111 : vector<8x1xf32> to vector<8x8xf32>
    %113 = arith.subf %109, %112 : vector<8x8xf32>
    %114 = math.exp %113 : vector<8x8xf32>
    %cst_47 = arith.constant dense<0.000000e+00> : vector<8xf32>
    %115 = vector.multi_reduction <add>, %114, %cst_47 [1] : vector<8x8xf32> to vector<8xf32>
    %116 = vector.shape_cast %115 : vector<8xf32> to vector<8x1xf32>
    %117 = tpu.reciprocal %116 {approx = true} : vector<8x1xf32> -> vector<8x1xf32>
    %118 = vector.broadcast %117 : vector<8x1xf32> to vector<8x8xf32>
    %119 = arith.mulf %114, %118 : vector<8x8xf32>
    %120 = arith.truncf %119 : vector<8x8xf32> to vector<8x8xbf16>
    %cst_48 = arith.constant dense<0.000000e+00> : vector<8x8xf32>
    %121 = tpu.matmul %120, %107, %cst_48 {dimension_numbers = #tpu.dot_dimension_numbers<[1], [0], [0], [1], [0, 0, 1, 1], [], []>} : vector<8x8xbf16>, vector<8x8xbf16>, vector<8x8xf32> -> vector<8x8xf32>
    %122 = arith.truncf %121 : vector<8x8xf32> to vector<8x8xbf16>
    %c0_49 = arith.constant 0 : index
    %c16 = arith.constant 16 : index
    %123 = vector.load %arg27[%c0_49, %c16] : memref<8x32xbf16, #tpu.memory_space<vmem>>, vector<8x8xbf16>
    tpu.vector_store %arg27[%c0_49, %c16], %122 {strides = array<i32>} : memref<8x32xbf16, #tpu.memory_space<vmem>>, vector<8x8xbf16>,
    %124 = vector.extract_strided_slice %64 {offsets = [0, 24], sizes = [8, 8], strides = [1, 1]} : vector<8x32xbf16> to vector<8x8xbf16>
    %125 = vector.extract_strided_slice %65 {offsets = [0, 24], sizes = [8, 8], strides = [1, 1]} : vector<8x32xbf16> to vector<8x8xbf16>
    %126 = vector.extract_strided_slice %66 {offsets = [0, 24], sizes = [8, 8], strides = [1, 1]} : vector<8x32xbf16> to vector<8x8xbf16>
    %cst_50 = arith.constant dense<0.000000e+00> : vector<8x8xf32>
    %127 = tpu.matmul %124, %125, %cst_50 {dimension_numbers = #tpu.dot_dimension_numbers<[1], [1], [0], [0], [0, 0, 1, 0], [], []>} : vector<8x8xbf16>, vector<8x8xbf16>, vector<8x8xf32> -> vector<8x8xf32>
    %128 = arith.addf %127, %24 : vector<8x8xf32>
    %cst_51 = arith.constant dense<0xFF800000> : vector<8xf32>
    %129 = vector.multi_reduction <maximumf>, %128, %cst_51 [1] : vector<8x8xf32> to vector<8xf32>
    %130 = vector.shape_cast %129 : vector<8xf32> to vector<8x1xf32>
    %131 = vector.broadcast %130 : vector<8x1xf32> to vector<8x8xf32>
    %132 = arith.subf %128, %131 : vector<8x8xf32>
    %133 = math.exp %132 : vector<8x8xf32>
    %cst_52 = arith.constant dense<0.000000e+00> : vector<8xf32>
    %134 = vector.multi_reduction <add>, %133, %cst_52 [1] : vector<8x8xf32> to vector<8xf32>
    %135 = vector.shape_cast %134 : vector<8xf32> to vector<8x1xf32>
    %136 = tpu.reciprocal %135 {approx = true} : vector<8x1xf32> -> vector<8x1xf32>
    %137 = vector.broadcast %136 : vector<8x1xf32> to vector<8x8xf32>
    %138 = arith.mulf %133, %137 : vector<8x8xf32>
    %139 = arith.truncf %138 : vector<8x8xf32> to vector<8x8xbf16>
    %cst_53 = arith.constant dense<0.000000e+00> : vector<8x8xf32>
    %140 = tpu.matmul %139, %126, %cst_53 {dimension_numbers = #tpu.dot_dimension_numbers<[1], [0], [0], [1], [0, 0, 1, 1], [], []>} : vector<8x8xbf16>, vector<8x8xbf16>, vector<8x8xf32> -> vector<8x8xf32>
    %141 = arith.truncf %140 : vector<8x8xf32> to vector<8x8xbf16>
    %c0_54 = arith.constant 0 : index
    %c24 = arith.constant 24 : index
    %142 = vector.load %arg27[%c0_54, %c24] : memref<8x32xbf16, #tpu.memory_space<vmem>>, vector<8x8xbf16>
    tpu.vector_store %arg27[%c0_54, %c24], %141 {strides = array<i32>} : memref<8x32xbf16, #tpu.memory_space<vmem>>, vector<8x8xbf16>,
    %c0_55 = arith.constant 0 : index
    %c0_56 = arith.constant 0 : index
    %143 = vector.load %arg27[%c0_55, %c0_56] : memref<8x32xbf16, #tpu.memory_space<vmem>>, vector<8x32xbf16>
    %c0_57 = arith.constant 0 : index
    %c0_58 = arith.constant 0 : index
    %144 = vector.load %arg10[%c0_57, %c0_58] : memref<32x32xbf16, #tpu.memory_space<vmem>>, vector<32x32xbf16>
    %c0_59 = arith.constant 0 : index
    %c0_60 = arith.constant 0 : index
    %145 = vector.load %arg11[%c0_59, %c0_60] : memref<1x32xf32, #tpu.memory_space<vmem>>, vector<1x32xf32>
    %cst_61 = arith.constant dense<0.000000e+00> : vector<8x32xf32>
    %146 = tpu.matmul %143, %144, %cst_61 {dimension_numbers = #tpu.dot_dimension_numbers<[1], [0], [0], [1], [0, 0, 1, 1], [], []>} : vector<8x32xbf16>, vector<32x32xbf16>, vector<8x32xf32> -> vector<8x32xf32>
    %147 = vector.broadcast %145 : vector<1x32xf32> to vector<8x32xf32>
    %148 = arith.addf %146, %147 : vector<8x32xf32>
    %149 = arith.addf %2, %148 : vector<8x32xf32>
    %c0_62 = arith.constant 0 : index
    %c0_63 = arith.constant 0 : index
    %150 = vector.load %arg12[%c0_62, %c0_63] : memref<1x32xf32, #tpu.memory_space<vmem>>, vector<1x32xf32>
    %c0_64 = arith.constant 0 : index
    %c0_65 = arith.constant 0 : index
    %151 = vector.load %arg13[%c0_64, %c0_65] : memref<1x32xf32, #tpu.memory_space<vmem>>, vector<1x32xf32>
    %cst_66 = arith.constant dense<0.000000e+00> : vector<8xf32>
    %152 = vector.multi_reduction <add>, %149, %cst_66 [1] : vector<8x32xf32> to vector<8xf32>
    %153 = vector.shape_cast %152 : vector<8xf32> to vector<8x1xf32>
    %cst_67 = arith.constant 3.200000e+01 : f32
    %154 = vector.broadcast %cst_67 : f32 to vector<8x1xf32>
    %155 = arith.divf %153, %154 : vector<8x1xf32>
    %156 = vector.broadcast %155 : vector<8x1xf32> to vector<8x32xf32>
    %157 = arith.subf %149, %156 : vector<8x32xf32>
    %158 = arith.mulf %157, %157 : vector<8x32xf32>
    %cst_68 = arith.constant dense<0.000000e+00> : vector<8xf32>
    %159 = vector.multi_reduction <add>, %158, %cst_68 [1] : vector<8x32xf32> to vector<8xf32>
    %160 = vector.shape_cast %159 : vector<8xf32> to vector<8x1xf32>
    %cst_69 = arith.constant 3.200000e+01 : f32
    %161 = vector.broadcast %cst_69 : f32 to vector<8x1xf32>
    %162 = arith.divf %160, %161 : vector<8x1xf32>
    %163 = vector.broadcast %155 : vector<8x1xf32> to vector<8x32xf32>
    %164 = arith.subf %149, %163 : vector<8x32xf32>
    %cst_70 = arith.constant 9.99999974E-6 : f32
    %165 = vector.broadcast %cst_70 : f32 to vector<8x1xf32>
    %166 = arith.addf %162, %165 : vector<8x1xf32>
    %167 = math.rsqrt %166 : vector<8x1xf32>
    %168 = vector.broadcast %167 : vector<8x1xf32> to vector<8x32xf32>
    %169 = arith.mulf %164, %168 : vector<8x32xf32>
    %170 = vector.broadcast %150 : vector<1x32xf32> to vector<8x32xf32>
    %171 = arith.mulf %169, %170 : vector<8x32xf32>
    %172 = vector.broadcast %151 : vector<1x32xf32> to vector<8x32xf32>
    %173 = arith.addf %171, %172 : vector<8x32xf32>
    %c0_71 = arith.constant 0 : index
    %c0_72 = arith.constant 0 : index
    %174 = vector.load %arg14[%c0_71, %c0_72] : memref<32x32xbf16, #tpu.memory_space<vmem>>, vector<32x32xbf16>
    %c0_73 = arith.constant 0 : index
    %c0_74 = arith.constant 0 : index
    %175 = vector.load %arg15[%c0_73, %c0_74] : memref<1x32xf32, #tpu.memory_space<vmem>>, vector<1x32xf32>
    %176 = arith.truncf %173 : vector<8x32xf32> to vector<8x32xbf16>
    %cst_75 = arith.constant dense<0.000000e+00> : vector<8x32xf32>
    %177 = tpu.matmul %176, %174, %cst_75 {dimension_numbers = #tpu.dot_dimension_numbers<[1], [0], [0], [1], [0, 0, 1, 1], [], []>} : vector<8x32xbf16>, vector<32x32xbf16>, vector<8x32xf32> -> vector<8x32xf32>
    %178 = vector.broadcast %175 : vector<1x32xf32> to vector<8x32xf32>
    %179 = arith.addf %177, %178 : vector<8x32xf32>
    %c0_76 = arith.constant 0 : index
    %c0_77 = arith.constant 0 : index
    %180 = vector.load %arg16[%c0_76, %c0_77] : memref<32x64xbf16, #tpu.memory_space<vmem>>, vector<32x64xbf16>
    %c0_78 = arith.constant 0 : index
    %c0_79 = arith.constant 0 : index
    %181 = vector.load %arg17[%c0_78, %c0_79] : memref<1x64xf32, #tpu.memory_space<vmem>>, vector<1x64xf32>
    %cst_80 = arith.constant dense<0.000000e+00> : vector<8x64xf32>
    %182 = tpu.matmul %4, %180, %cst_80 {dimension_numbers = #tpu.dot_dimension_numbers<[1], [0], [0], [1], [0, 0, 1, 1], [], []>} : vector<8x32xbf16>, vector<32x64xbf16>, vector<8x64xf32> -> vector<8x64xf32>
    %183 = vector.broadcast %181 : vector<1x64xf32> to vector<8x64xf32>
    %184 = arith.addf %182, %183 : vector<8x64xf32>
    %185 = vector.extract_strided_slice %184 {offsets = [0, 0], sizes = [8, 32], strides = [1, 1]} : vector<8x64xf32> to vector<8x32xf32>
    %186 = vector.extract_strided_slice %184 {offsets = [0, 32], sizes = [8, 32], strides = [1, 1]} : vector<8x64xf32> to vector<8x32xf32>
    %187 = arith.truncf %179 : vector<8x32xf32> to vector<8x32xbf16>
    %188 = arith.truncf %185 : vector<8x32xf32> to vector<8x32xbf16>
    %189 = arith.truncf %186 : vector<8x32xf32> to vector<8x32xbf16>
    %190 = vector.extract_strided_slice %187 {offsets = [0, 0], sizes = [8, 8], strides = [1, 1]} : vector<8x32xbf16> to vector<8x8xbf16>
    %191 = vector.extract_strided_slice %188 {offsets = [0, 0], sizes = [8, 8], strides = [1, 1]} : vector<8x32xbf16> to vector<8x8xbf16>
    %192 = vector.extract_strided_slice %189 {offsets = [0, 0], sizes = [8, 8], strides = [1, 1]} : vector<8x32xbf16> to vector<8x8xbf16>
    %cst_81 = arith.constant dense<0.000000e+00> : vector<8x8xf32>
    %193 = tpu.matmul %190, %191, %cst_81 {dimension_numbers = #tpu.dot_dimension_numbers<[1], [1], [0], [0], [0, 0, 1, 0], [], []>} : vector<8x8xbf16>, vector<8x8xbf16>, vector<8x8xf32> -> vector<8x8xf32>
    %194 = arith.addf %193, %30 : vector<8x8xf32>
    %cst_82 = arith.constant dense<0xFF800000> : vector<8xf32>
    %195 = vector.multi_reduction <maximumf>, %194, %cst_82 [1] : vector<8x8xf32> to vector<8xf32>
    %196 = vector.shape_cast %195 : vector<8xf32> to vector<8x1xf32>
    %197 = vector.broadcast %196 : vector<8x1xf32> to vector<8x8xf32>
    %198 = arith.subf %194, %197 : vector<8x8xf32>
    %199 = math.exp %198 : vector<8x8xf32>
    %cst_83 = arith.constant dense<0.000000e+00> : vector<8xf32>
    %200 = vector.multi_reduction <add>, %199, %cst_83 [1] : vector<8x8xf32> to vector<8xf32>
    %201 = vector.shape_cast %200 : vector<8xf32> to vector<8x1xf32>
    %202 = tpu.reciprocal %201 {approx = true} : vector<8x1xf32> -> vector<8x1xf32>
    %203 = vector.broadcast %202 : vector<8x1xf32> to vector<8x8xf32>
    %204 = arith.mulf %199, %203 : vector<8x8xf32>
    %205 = arith.truncf %204 : vector<8x8xf32> to vector<8x8xbf16>
    %cst_84 = arith.constant dense<0.000000e+00> : vector<8x8xf32>
    %206 = tpu.matmul %205, %192, %cst_84 {dimension_numbers = #tpu.dot_dimension_numbers<[1], [0], [0], [1], [0, 0, 1, 1], [], []>} : vector<8x8xbf16>, vector<8x8xbf16>, vector<8x8xf32> -> vector<8x8xf32>
    %207 = arith.truncf %206 : vector<8x8xf32> to vector<8x8xbf16>
    %c0_85 = arith.constant 0 : index
    %c0_86 = arith.constant 0 : index
    %208 = vector.load %arg27[%c0_85, %c0_86] : memref<8x32xbf16, #tpu.memory_space<vmem>>, vector<8x8xbf16>
    tpu.vector_store %arg27[%c0_85, %c0_86], %207 {strides = array<i32>} : memref<8x32xbf16, #tpu.memory_space<vmem>>, vector<8x8xbf16>,
    %209 = vector.extract_strided_slice %187 {offsets = [0, 8], sizes = [8, 8], strides = [1, 1]} : vector<8x32xbf16> to vector<8x8xbf16>
    %210 = vector.extract_strided_slice %188 {offsets = [0, 8], sizes = [8, 8], strides = [1, 1]} : vector<8x32xbf16> to vector<8x8xbf16>
    %211 = vector.extract_strided_slice %189 {offsets = [0, 8], sizes = [8, 8], strides = [1, 1]} : vector<8x32xbf16> to vector<8x8xbf16>
    %cst_87 = arith.constant dense<0.000000e+00> : vector<8x8xf32>
    %212 = tpu.matmul %209, %210, %cst_87 {dimension_numbers = #tpu.dot_dimension_numbers<[1], [1], [0], [0], [0, 0, 1, 0], [], []>} : vector<8x8xbf16>, vector<8x8xbf16>, vector<8x8xf32> -> vector<8x8xf32>
    %213 = arith.addf %212, %30 : vector<8x8xf32>
    %cst_88 = arith.constant dense<0xFF800000> : vector<8xf32>
    %214 = vector.multi_reduction <maximumf>, %213, %cst_88 [1] : vector<8x8xf32> to vector<8xf32>
    %215 = vector.shape_cast %214 : vector<8xf32> to vector<8x1xf32>
    %216 = vector.broadcast %215 : vector<8x1xf32> to vector<8x8xf32>
    %217 = arith.subf %213, %216 : vector<8x8xf32>
    %218 = math.exp %217 : vector<8x8xf32>
    %cst_89 = arith.constant dense<0.000000e+00> : vector<8xf32>
    %219 = vector.multi_reduction <add>, %218, %cst_89 [1] : vector<8x8xf32> to vector<8xf32>
    %220 = vector.shape_cast %219 : vector<8xf32> to vector<8x1xf32>
    %221 = tpu.reciprocal %220 {approx = true} : vector<8x1xf32> -> vector<8x1xf32>
    %222 = vector.broadcast %221 : vector<8x1xf32> to vector<8x8xf32>
    %223 = arith.mulf %218, %222 : vector<8x8xf32>
    %224 = arith.truncf %223 : vector<8x8xf32> to vector<8x8xbf16>
    %cst_90 = arith.constant dense<0.000000e+00> : vector<8x8xf32>
    %225 = tpu.matmul %224, %211, %cst_90 {dimension_numbers = #tpu.dot_dimension_numbers<[1], [0], [0], [1], [0, 0, 1, 1], [], []>} : vector<8x8xbf16>, vector<8x8xbf16>, vector<8x8xf32> -> vector<8x8xf32>
    %226 = arith.truncf %225 : vector<8x8xf32> to vector<8x8xbf16>
    %c0_91 = arith.constant 0 : index
    %c8_92 = arith.constant 8 : index
    %227 = vector.load %arg27[%c0_91, %c8_92] : memref<8x32xbf16, #tpu.memory_space<vmem>>, vector<8x8xbf16>
    tpu.vector_store %arg27[%c0_91, %c8_92], %226 {strides = array<i32>} : memref<8x32xbf16, #tpu.memory_space<vmem>>, vector<8x8xbf16>,
    %228 = vector.extract_strided_slice %187 {offsets = [0, 16], sizes = [8, 8], strides = [1, 1]} : vector<8x32xbf16> to vector<8x8xbf16>
    %229 = vector.extract_strided_slice %188 {offsets = [0, 16], sizes = [8, 8], strides = [1, 1]} : vector<8x32xbf16> to vector<8x8xbf16>
    %230 = vector.extract_strided_slice %189 {offsets = [0, 16], sizes = [8, 8], strides = [1, 1]} : vector<8x32xbf16> to vector<8x8xbf16>
    %cst_93 = arith.constant dense<0.000000e+00> : vector<8x8xf32>
    %231 = tpu.matmul %228, %229, %cst_93 {dimension_numbers = #tpu.dot_dimension_numbers<[1], [1], [0], [0], [0, 0, 1, 0], [], []>} : vector<8x8xbf16>, vector<8x8xbf16>, vector<8x8xf32> -> vector<8x8xf32>
    %232 = arith.addf %231, %30 : vector<8x8xf32>
    %cst_94 = arith.constant dense<0xFF800000> : vector<8xf32>
    %233 = vector.multi_reduction <maximumf>, %232, %cst_94 [1] : vector<8x8xf32> to vector<8xf32>
    %234 = vector.shape_cast %233 : vector<8xf32> to vector<8x1xf32>
    %235 = vector.broadcast %234 : vector<8x1xf32> to vector<8x8xf32>
    %236 = arith.subf %232, %235 : vector<8x8xf32>
    %237 = math.exp %236 : vector<8x8xf32>
    %cst_95 = arith.constant dense<0.000000e+00> : vector<8xf32>
    %238 = vector.multi_reduction <add>, %237, %cst_95 [1] : vector<8x8xf32> to vector<8xf32>
    %239 = vector.shape_cast %238 : vector<8xf32> to vector<8x1xf32>
    %240 = tpu.reciprocal %239 {approx = true} : vector<8x1xf32> -> vector<8x1xf32>
    %241 = vector.broadcast %240 : vector<8x1xf32> to vector<8x8xf32>
    %242 = arith.mulf %237, %241 : vector<8x8xf32>
    %243 = arith.truncf %242 : vector<8x8xf32> to vector<8x8xbf16>
    %cst_96 = arith.constant dense<0.000000e+00> : vector<8x8xf32>
    %244 = tpu.matmul %243, %230, %cst_96 {dimension_numbers = #tpu.dot_dimension_numbers<[1], [0], [0], [1], [0, 0, 1, 1], [], []>} : vector<8x8xbf16>, vector<8x8xbf16>, vector<8x8xf32> -> vector<8x8xf32>
    %245 = arith.truncf %244 : vector<8x8xf32> to vector<8x8xbf16>
    %c0_97 = arith.constant 0 : index
    %c16_98 = arith.constant 16 : index
    %246 = vector.load %arg27[%c0_97, %c16_98] : memref<8x32xbf16, #tpu.memory_space<vmem>>, vector<8x8xbf16>
    tpu.vector_store %arg27[%c0_97, %c16_98], %245 {strides = array<i32>} : memref<8x32xbf16, #tpu.memory_space<vmem>>, vector<8x8xbf16>,
    %247 = vector.extract_strided_slice %187 {offsets = [0, 24], sizes = [8, 8], strides = [1, 1]} : vector<8x32xbf16> to vector<8x8xbf16>
    %248 = vector.extract_strided_slice %188 {offsets = [0, 24], sizes = [8, 8], strides = [1, 1]} : vector<8x32xbf16> to vector<8x8xbf16>
    %249 = vector.extract_strided_slice %189 {offsets = [0, 24], sizes = [8, 8], strides = [1, 1]} : vector<8x32xbf16> to vector<8x8xbf16>
    %cst_99 = arith.constant dense<0.000000e+00> : vector<8x8xf32>
    %250 = tpu.matmul %247, %248, %cst_99 {dimension_numbers = #tpu.dot_dimension_numbers<[1], [1], [0], [0], [0, 0, 1, 0], [], []>} : vector<8x8xbf16>, vector<8x8xbf16>, vector<8x8xf32> -> vector<8x8xf32>
    %251 = arith.addf %250, %30 : vector<8x8xf32>
    %cst_100 = arith.constant dense<0xFF800000> : vector<8xf32>
    %252 = vector.multi_reduction <maximumf>, %251, %cst_100 [1] : vector<8x8xf32> to vector<8xf32>
    %253 = vector.shape_cast %252 : vector<8xf32> to vector<8x1xf32>
    %254 = vector.broadcast %253 : vector<8x1xf32> to vector<8x8xf32>
    %255 = arith.subf %251, %254 : vector<8x8xf32>
    %256 = math.exp %255 : vector<8x8xf32>
    %cst_101 = arith.constant dense<0.000000e+00> : vector<8xf32>
    %257 = vector.multi_reduction <add>, %256, %cst_101 [1] : vector<8x8xf32> to vector<8xf32>
    %258 = vector.shape_cast %257 : vector<8xf32> to vector<8x1xf32>
    %259 = tpu.reciprocal %258 {approx = true} : vector<8x1xf32> -> vector<8x1xf32>
    %260 = vector.broadcast %259 : vector<8x1xf32> to vector<8x8xf32>
    %261 = arith.mulf %256, %260 : vector<8x8xf32>
    %262 = arith.truncf %261 : vector<8x8xf32> to vector<8x8xbf16>
    %cst_102 = arith.constant dense<0.000000e+00> : vector<8x8xf32>
    %263 = tpu.matmul %262, %249, %cst_102 {dimension_numbers = #tpu.dot_dimension_numbers<[1], [0], [0], [1], [0, 0, 1, 1], [], []>} : vector<8x8xbf16>, vector<8x8xbf16>, vector<8x8xf32> -> vector<8x8xf32>
    %264 = arith.truncf %263 : vector<8x8xf32> to vector<8x8xbf16>
    %c0_103 = arith.constant 0 : index
    %c24_104 = arith.constant 24 : index
    %265 = vector.load %arg27[%c0_103, %c24_104] : memref<8x32xbf16, #tpu.memory_space<vmem>>, vector<8x8xbf16>
    tpu.vector_store %arg27[%c0_103, %c24_104], %264 {strides = array<i32>} : memref<8x32xbf16, #tpu.memory_space<vmem>>, vector<8x8xbf16>,
    %c0_105 = arith.constant 0 : index
    %c0_106 = arith.constant 0 : index
    %266 = vector.load %arg27[%c0_105, %c0_106] : memref<8x32xbf16, #tpu.memory_space<vmem>>, vector<8x32xbf16>
    %c0_107 = arith.constant 0 : index
    %c0_108 = arith.constant 0 : index
    %267 = vector.load %arg18[%c0_107, %c0_108] : memref<32x32xbf16, #tpu.memory_space<vmem>>, vector<32x32xbf16>
    %c0_109 = arith.constant 0 : index
    %c0_110 = arith.constant 0 : index
    %268 = vector.load %arg19[%c0_109, %c0_110] : memref<1x32xf32, #tpu.memory_space<vmem>>, vector<1x32xf32>
    %cst_111 = arith.constant dense<0.000000e+00> : vector<8x32xf32>
    %269 = tpu.matmul %266, %267, %cst_111 {dimension_numbers = #tpu.dot_dimension_numbers<[1], [0], [0], [1], [0, 0, 1, 1], [], []>} : vector<8x32xbf16>, vector<32x32xbf16>, vector<8x32xf32> -> vector<8x32xf32>
    %270 = vector.broadcast %268 : vector<1x32xf32> to vector<8x32xf32>
    %271 = arith.addf %269, %270 : vector<8x32xf32>
    %272 = arith.addf %149, %271 : vector<8x32xf32>
    %c0_112 = arith.constant 0 : index
    %c0_113 = arith.constant 0 : index
    %273 = vector.load %arg20[%c0_112, %c0_113] : memref<1x32xf32, #tpu.memory_space<vmem>>, vector<1x32xf32>
    %c0_114 = arith.constant 0 : index
    %c0_115 = arith.constant 0 : index
    %274 = vector.load %arg21[%c0_114, %c0_115] : memref<1x32xf32, #tpu.memory_space<vmem>>, vector<1x32xf32>
    %cst_116 = arith.constant dense<0.000000e+00> : vector<8xf32>
    %275 = vector.multi_reduction <add>, %272, %cst_116 [1] : vector<8x32xf32> to vector<8xf32>
    %276 = vector.shape_cast %275 : vector<8xf32> to vector<8x1xf32>
    %cst_117 = arith.constant 3.200000e+01 : f32
    %277 = vector.broadcast %cst_117 : f32 to vector<8x1xf32>
    %278 = arith.divf %276, %277 : vector<8x1xf32>
    %279 = vector.broadcast %278 : vector<8x1xf32> to vector<8x32xf32>
    %280 = arith.subf %272, %279 : vector<8x32xf32>
    %281 = arith.mulf %280, %280 : vector<8x32xf32>
    %cst_118 = arith.constant dense<0.000000e+00> : vector<8xf32>
    %282 = vector.multi_reduction <add>, %281, %cst_118 [1] : vector<8x32xf32> to vector<8xf32>
    %283 = vector.shape_cast %282 : vector<8xf32> to vector<8x1xf32>
    %cst_119 = arith.constant 3.200000e+01 : f32
    %284 = vector.broadcast %cst_119 : f32 to vector<8x1xf32>
    %285 = arith.divf %283, %284 : vector<8x1xf32>
    %286 = vector.broadcast %278 : vector<8x1xf32> to vector<8x32xf32>
    %287 = arith.subf %272, %286 : vector<8x32xf32>
    %cst_120 = arith.constant 9.99999974E-6 : f32
    %288 = vector.broadcast %cst_120 : f32 to vector<8x1xf32>
    %289 = arith.addf %285, %288 : vector<8x1xf32>
    %290 = math.rsqrt %289 : vector<8x1xf32>
    %291 = vector.broadcast %290 : vector<8x1xf32> to vector<8x32xf32>
    %292 = arith.mulf %287, %291 : vector<8x32xf32>
    %293 = vector.broadcast %273 : vector<1x32xf32> to vector<8x32xf32>
    %294 = arith.mulf %292, %293 : vector<8x32xf32>
    %295 = vector.broadcast %274 : vector<1x32xf32> to vector<8x32xf32>
    %296 = arith.addf %294, %295 : vector<8x32xf32>
    %c0_121 = arith.constant 0 : index
    %c0_122 = arith.constant 0 : index
    %297 = vector.load %arg22[%c0_121, %c0_122] : memref<32x128xbf16, #tpu.memory_space<vmem>>, vector<32x128xbf16>
    %c0_123 = arith.constant 0 : index
    %c0_124 = arith.constant 0 : index
    %298 = vector.load %arg23[%c0_123, %c0_124] : memref<1x128xf32, #tpu.memory_space<vmem>>, vector<1x128xf32>
    %299 = arith.truncf %296 : vector<8x32xf32> to vector<8x32xbf16>
    %cst_125 = arith.constant dense<0.000000e+00> : vector<8x128xf32>
    %300 = tpu.matmul %299, %297, %cst_125 {dimension_numbers = #tpu.dot_dimension_numbers<[1], [0], [0], [1], [0, 0, 1, 1], [], []>} : vector<8x32xbf16>, vector<32x128xbf16>, vector<8x128xf32> -> vector<8x128xf32>
    %301 = vector.broadcast %298 : vector<1x128xf32> to vector<8x128xf32>
    %302 = arith.addf %300, %301 : vector<8x128xf32>
    %cst_126 = arith.constant 0.000000e+00 : f32
    %303 = vector.broadcast %cst_126 : f32 to vector<8x128xf32>
    %304 = arith.maximumf %302, %303 : vector<8x128xf32>
    %c0_127 = arith.constant 0 : index
    %c0_128 = arith.constant 0 : index
    %305 = vector.load %arg24[%c0_127, %c0_128] : memref<128x32xbf16, #tpu.memory_space<vmem>>, vector<128x32xbf16>
    %c0_129 = arith.constant 0 : index
    %c0_130 = arith.constant 0 : index
    %306 = vector.load %arg25[%c0_129, %c0_130] : memref<1x32xf32, #tpu.memory_space<vmem>>, vector<1x32xf32>
    %307 = arith.truncf %304 : vector<8x128xf32> to vector<8x128xbf16>
    %cst_131 = arith.constant dense<0.000000e+00> : vector<8x32xf32>
    %308 = tpu.matmul %307, %305, %cst_131 {dimension_numbers = #tpu.dot_dimension_numbers<[1], [0], [0], [1], [0, 0, 1, 1], [], []>} : vector<8x128xbf16>, vector<128x32xbf16>, vector<8x32xf32> -> vector<8x32xf32>
    %309 = vector.broadcast %306 : vector<1x32xf32> to vector<8x32xf32>
    %310 = arith.addf %308, %309 : vector<8x32xf32>
    %311 = arith.addf %272, %310 : vector<8x32xf32>
    %312 = arith.truncf %311 : vector<8x32xf32> to vector<8x32xbf16>
    %c0_132 = arith.constant 0 : index
    %c0_133 = arith.constant 0 : index
    %c0_134 = arith.constant 0 : index
    %313 = vector.load %arg26[%c0_132, %c0_133, %c0_134] : memref<1x8x32xbf16, #tpu.memory_space<vmem>>, vector<1x8x32xbf16>
    %314 = vector.shape_cast %313 : vector<1x8x32xbf16> to vector<8x32xbf16>
    %315 = vector.shape_cast %312 : vector<8x32xbf16> to vector<1x8x32xbf16>
    tpu.vector_store %arg26[%c0_132, %c0_133, %c0_134], %315 {strides = array<i32>} : memref<1x8x32xbf16, #tpu.memory_space<vmem>>, vector<1x8x32xbf16>,
    return
  }
  func.func @transform_0(%arg0: i32) -> (i32, i32, i32) {
    %c0_i32 = arith.constant 0 : i32
    %c0_i32_0 = arith.constant 0 : i32
    %c0_i32_1 = arith.constant 0 : i32
    return %arg0, %c0_i32, %c0_i32_0 : i32, i32, i32
  }
  func.func @transform_1(%arg0: i32) -> (i32, i32, i32) {
    %c0_i32 = arith.constant 0 : i32
    %c0_i32_0 = arith.constant 0 : i32
    %c0_i32_1 = arith.constant 0 : i32
    return %arg0, %c0_i32, %c0_i32_0 : i32, i32, i32
  }
  func.func @transform_2(%arg0: i32) -> (i32, i32, i32) {
    %c0_i32 = arith.constant 0 : i32
    %c0_i32_0 = arith.constant 0 : i32
    %c0_i32_1 = arith.constant 0 : i32
    return %arg0, %c0_i32, %c0_i32_0 : i32, i32, i32
  }
  func.func @transform_3(%arg0: i32) -> (i32, i32, i32) {
    %c0_i32 = arith.constant 0 : i32
    %c0_i32_0 = arith.constant 0 : i32
    %c0_i32_1 = arith.constant 0 : i32
    return %arg0, %c0_i32, %c0_i32_0 : i32, i32, i32
  }
  func.func @transform_4(%arg0: i32) -> (i32, i32, i32) {
    %c0_i32 = arith.constant 0 : i32
    %c0_i32_0 = arith.constant 0 : i32
    %c0_i32_1 = arith.constant 0 : i32
    return %arg0, %c0_i32, %c0_i32_0 : i32, i32, i32
  }
  func.func @transform_5(%arg0: i32) -> (i32, i32) {
    %c0_i32 = arith.constant 0 : i32
    %c0_i32_0 = arith.constant 0 : i32
    %c0_i32_1 = arith.constant 0 : i32
    return %c0_i32, %c0_i32_0 : i32, i32
  }
  func.func @transform_6(%arg0: i32) -> (i32, i32) {
    %c0_i32 = arith.constant 0 : i32
    %c0_i32_0 = arith.constant 0 : i32
    %c0_i32_1 = arith.constant 0 : i32
    return %c0_i32, %c0_i32_0 : i32, i32
  }
  func.func @transform_7(%arg0: i32) -> (i32, i32) {
    %c0_i32 = arith.constant 0 : i32
    %c0_i32_0 = arith.constant 0 : i32
    %c0_i32_1 = arith.constant 0 : i32
    return %c0_i32, %c0_i32_0 : i32, i32
  }
  func.func @transform_8(%arg0: i32) -> (i32, i32) {
    %c0_i32 = arith.constant 0 : i32
    %c0_i32_0 = arith.constant 0 : i32
    %c0_i32_1 = arith.constant 0 : i32
    return %c0_i32, %c0_i32_0 : i32, i32
  }
  func.func @transform_9(%arg0: i32) -> (i32, i32) {
    %c0_i32 = arith.constant 0 : i32
    %c0_i32_0 = arith.constant 0 : i32
    %c0_i32_1 = arith.constant 0 : i32
    return %c0_i32, %c0_i32_0 : i32, i32
  }
  func.func @transform_10(%arg0: i32) -> (i32, i32) {
    %c0_i32 = arith.constant 0 : i32
    %c0_i32_0 = arith.constant 0 : i32
    %c0_i32_1 = arith.constant 0 : i32
    return %c0_i32, %c0_i32_0 : i32, i32
  }
  func.func @transform_11(%arg0: i32) -> (i32, i32) {
    %c0_i32 = arith.constant 0 : i32
    %c0_i32_0 = arith.constant 0 : i32
    %c0_i32_1 = arith.constant 0 : i32
    return %c0_i32, %c0_i32_0 : i32, i32
  }
  func.func @transform_12(%arg0: i32) -> (i32, i32) {
    %c0_i32 = arith.constant 0 : i32
    %c0_i32_0 = arith.constant 0 : i32
    %c0_i32_1 = arith.constant 0 : i32
    return %c0_i32, %c0_i32_0 : i32, i32
  }
  func.func @transform_13(%arg0: i32) -> (i32, i32) {
    %c0_i32 = arith.constant 0 : i32
    %c0_i32_0 = arith.constant 0 : i32
    %c0_i32_1 = arith.constant 0 : i32
    return %c0_i32, %c0_i32_0 : i32, i32
  }
  func.func @transform_14(%arg0: i32) -> (i32, i32) {
    %c0_i32 = arith.constant 0 : i32
    %c0_i32_0 = arith.constant 0 : i32
    %c0_i32_1 = arith.constant 0 : i32
    return %c0_i32, %c0_i32_0 : i32, i32
  }
  func.func @transform_15(%arg0: i32) -> (i32, i32) {
    %c0_i32 = arith.constant 0 : i32
    %c0_i32_0 = arith.constant 0 : i32
    %c0_i32_1 = arith.constant 0 : i32
    return %c0_i32, %c0_i32_0 : i32, i32
  }
  func.func @transform_16(%arg0: i32) -> (i32, i32) {
    %c0_i32 = arith.constant 0 : i32
    %c0_i32_0 = arith.constant 0 : i32
    %c0_i32_1 = arith.constant 0 : i32
    return %c0_i32, %c0_i32_0 : i32, i32
  }
  func.func @transform_17(%arg0: i32) -> (i32, i32) {
    %c0_i32 = arith.constant 0 : i32
    %c0_i32_0 = arith.constant 0 : i32
    %c0_i32_1 = arith.constant 0 : i32
    return %c0_i32, %c0_i32_0 : i32, i32
  }
  func.func @transform_18(%arg0: i32) -> (i32, i32) {
    %c0_i32 = arith.constant 0 : i32
    %c0_i32_0 = arith.constant 0 : i32
    %c0_i32_1 = arith.constant 0 : i32
    return %c0_i32, %c0_i32_0 : i32, i32
  }
  func.func @transform_19(%arg0: i32) -> (i32, i32) {
    %c0_i32 = arith.constant 0 : i32
    %c0_i32_0 = arith.constant 0 : i32
    %c0_i32_1 = arith.constant 0 : i32
    return %c0_i32, %c0_i32_0 : i32, i32
  }
  func.func @transform_20(%arg0: i32) -> (i32, i32) {
    %c0_i32 = arith.constant 0 : i32
    %c0_i32_0 = arith.constant 0 : i32
    %c0_i32_1 = arith.constant 0 : i32
    return %c0_i32, %c0_i32_0 : i32, i32
  }
  func.func @transform_21(%arg0: i32) -> (i32, i32) {
    %c0_i32 = arith.constant 0 : i32
    %c0_i32_0 = arith.constant 0 : i32
    %c0_i32_1 = arith.constant 0 : i32
    return %c0_i32, %c0_i32_0 : i32, i32
  }
  func.func @transform_22(%arg0: i32) -> (i32, i32) {
    %c0_i32 = arith.constant 0 : i32
    %c0_i32_0 = arith.constant 0 : i32
    %c0_i32_1 = arith.constant 0 : i32
    return %c0_i32, %c0_i32_0 : i32, i32
  }
  func.func @transform_23(%arg0: i32) -> (i32, i32) {
    %c0_i32 = arith.constant 0 : i32
    %c0_i32_0 = arith.constant 0 : i32
    %c0_i32_1 = arith.constant 0 : i32
    return %c0_i32, %c0_i32_0 : i32, i32
  }
  func.func @transform_24(%arg0: i32) -> (i32, i32) {
    %c0_i32 = arith.constant 0 : i32
    %c0_i32_0 = arith.constant 0 : i32
    %c0_i32_1 = arith.constant 0 : i32
    return %c0_i32, %c0_i32_0 : i32, i32
  }
  func.func @transform_25(%arg0: i32) -> (i32, i32, i32) {
    %c0_i32 = arith.constant 0 : i32
    %c0_i32_0 = arith.constant 0 : i32
    %c0_i32_1 = arith.constant 0 : i32
    return %arg0, %c0_i32, %c0_i32_0 : i32, i32, i32
  }
}

</mosaic_0001>

<bundles_post_ra>
// kernel: transformer_forward.9
= control target key start
LH: loop header
LB: loop body
LE: loop exit
PB: predicated region body
PF: predicated region fallthrough
CT: control target
= control target key end

     0   :  { %vm42_vm0 = vcmask 261120   ;;  %s149_s1 = inlined_call_operand.vmem [shape: bf16[32,128], index: 1, kind: input, shape index: {}]   ;;  %s150_s2 = inlined_call_operand.vmem [shape: f32[1,128], index: 2, kind: input, shape index: {}]   ;;  %s151_s0 = inlined_call_operand.vmem [shape: bf16[16,32], index: 0, kind: input, shape index: {}]   ;;  %s152_s3 = inlined_call_operand.vmem [shape: f32[16,128], index: 3, kind: output, shape index: {}]  }
   0x1   :  { %v101_v0 = vld [vmem:[%s149_s1 + $0x8] sm:$0xff]  ;;  %v100_v1 = vld [vmem:[%s149_s1] sm:$0xff] }
   0x2   :  { %52 = vmatpush.bf16.msra.mxu0 %v101_v0  ;;  %v99_v2 = vld [vmem:[%s151_s0] sm:$0xff] }
   0x3   :  { %v102_v3 = vld [vmem:[%s150_s2] ss:$0 sm:$0xff] }
   0x6   :  { %53 = vmatpush.bf16.msra.mxu0 %v100_v1 }
   0x9   :  { %98 = vmatmul.msk.bf16.vlgmr.msra.gmra.mxu0 %vm42_vm0, %v99_v2 }
  0x86   :  { %v55_v4 = vpop.f32.mrf.mxu0 }
  0x87   :  { %v56_v5 = vadd.f32 %v102_v3, %v55_v4 }
  0x89   :  { %60 = vmax.xlane.f32.xlu0 %v56_v5 }
  0x8e   :  { %v57_v6 = vpop.f32.mrf.mxu0 }
  0x8f   :  { %v58_v7 = vadd.f32 %v102_v3, %v57_v6 }
  0x91   :  { %62 = vmax.xlane.f32.xlu0 %v58_v7 }
  0xfc   :  { %v61_v8 = vpop.xlane.xlu0 %60 }
  0xfd   :  { %v64_v9 = vsub.f32 %v56_v5, %v61_v8 }
  0xff   :  { %v66_v10 = vmul.f32 1.442695, %v64_v9 }
 0x101   :  { %103 = vpow2.f32 %v66_v10 }
 0x104   :  { %v63_v11 = vpop.xlane.xlu0 %62 }
 0x105   :  { %v65_v12 = vsub.f32 %v58_v7, %v63_v11 }
 0x107   :  { %v104_v13 = vpop.eup %103  ;;  %v68_v14 = vmul.f32 1.442695, %v65_v12 }
 0x108   :  { %70 = vadd.xlane.f32.xlu1 %v104_v13 }
 0x109   :  { %105 = vpow2.f32 %v68_v14 }
 0x10f   :  { %v106_v15 = vpop.eup %105 }
 0x110   :  { %72 = vadd.xlane.f32.xlu1 %v106_v15 }
 0x17b   :  { %v71_v16 = vpop.xlane.xlu1 %70 }
 0x17c   :  { %107 = vlog2.f32 %v71_v16 }
 0x182   :  { %v108_v17 = vpop.eup %107 }
 0x183   :  { %v75_v18 = vmul.f32 0.6931472, %v108_v17  ;;  %v73_v19 = vpop.xlane.xlu1 %72 }
 0x184   :  { %109 = vlog2.f32 %v73_v19 }
 0x185   :  { %v78_v20 = vsub.f32 %v64_v9, %v75_v18 }
 0x187   :  { %80 = vst [vmem:[%s152_s3] sm:$0xff] %v78_v20 }
 0x18a   :  { %v110_v21 = vpop.eup %109 }
 0x18b   :  { %v77_v22 = vmul.f32 0.6931472, %v110_v21 }
 0x18d   :  { %v79_v23 = vsub.f32 %v65_v12, %v77_v22 }
 0x18f   :  { %81 = vst [vmem:[%s152_s3 + $0x8] sm:$0xff] %v79_v23 }

// kernel: transformer_forward.5
= control target key start
LH: loop header
LB: loop body
LE: loop exit
PB: predicated region body
PF: predicated region fallthrough
CT: control target
= control target key end

     0   :  { %s1314_s29 = smov 0   ;;  %s1463_s0 = inlined_call_operand.vmem [shape: bf16[2,8,32], index: 0, kind: input, shape index: {}]   ;;  %s1464_s1 = inlined_call_operand.vmem [shape: f32[2,1,8], index: 1, kind: input, shape index: {}]   ;;  %s1465_s2 = inlined_call_operand.vmem [shape: f32[1,32], index: 2, kind: input, shape index: {}]   ;;  %s1466_s3 = inlined_call_operand.vmem [shape: f32[1,32], index: 3, kind: input, shape index: {}]   ;;  %s1467_s4 = inlined_call_operand.vmem [shape: bf16[32,96], index: 4, kind: input, shape index: {}]   ;;  %s1468_s5 = inlined_call_operand.vmem [shape: f32[1,96], index: 5, kind: input, shape index: {}]   ;;  %s1469_s6 = inlined_call_operand.vmem [shape: bf16[32,32], index: 6, kind: input, shape index: {}]   ;;  %s1470_s7 = inlined_call_operand.vmem [shape: f32[1,32], index: 7, kind: input, shape index: {}]   ;;  %s1471_s8 = inlined_call_operand.vmem [shape: f32[1,32], index: 8, kind: input, shape index: {}]   ;;  %s1472_s9 = inlined_call_operand.vmem [shape: f32[1,32], index: 9, kind: input, shape index: {}]   ;;  %s1473_s10 = inlined_call_operand.vmem [shape: bf16[32,128], index: 10, kind: input, shape index: {}]   ;;  %s1474_s11 = inlined_call_operand.vmem [shape: f32[1,128], index: 11, kind: input, shape index: {}]   ;;  %s1475_s12 = inlined_call_operand.vmem [shape: bf16[128,32], index: 12, kind: input, shape index: {}]   ;;  %s1476_s13 = inlined_call_operand.vmem [shape: f32[1,32], index: 13, kind: input, shape index: {}]   ;;  %s1477_s14 = inlined_call_operand.vmem [shape: bf16[2,8,32], index: 14, kind: output, shape index: {}]  }
   0x1 LB: > { %s1071_s30 = sadd.s32 4294967295, %s1221_s29   ;;  %p1075_p0 = scmp.ge.s32.totalorder %s1221_s29, 1  ;;  %s1221_s29 = sphi %s1314_s29, %s24_s29  }
   0x2   : > { %p419_p1 = scmp.lt.s32.totalorder %s1221_s29, 3 }
   0x4   : > { %p420_p2 = pnand %p1075_p0, %p419_p1 }
   0x5   : > { %p466_p3 = scmp.lt.s32.totalorder (!%p420_p2), %s1071_s30, 1  ;;  %s1224_s16 = smov (!%p420_p2), 88  }
   0x6   : > { %423 = sbr.rel (%p420_p2) target bundleno = 2307 (0x903), region = 76  ;;  %s1225_s17 = smov (!%p420_p2), 64  }
   0x7   : > { %s1227_s19 = smov (!%p420_p2), 72   ;;  %s1228_s20 = smov (!%p420_p2), 80  }
   0x8   : > { %s1230_s24 = smov (!%p420_p2), 120   ;;  %s1231_s25 = smov (!%p420_p2), 104  }
   0x9   : > { %s1232_s26 = smov (!%p420_p2), 112   ;;  %s1233_s27 = smov (!%p420_p2), 40  }
   0xa   : > { %s1234_s28 = smov (!%p420_p2), 48  }
   0xb   : > { %s1479_s30 = smov (!%p466_p3, %s1071_s30), 1  ;;  %vm485_vm0 = vcmask 261120   ;;  %v1223_v3 = vmov 32.0   ;;  %v1148_v15 = vld [vmem:[%s1467_s4 + $0x8] sm:$0xff]  ;;  %v1147_v16 = vld [vmem:[%s1467_s4] sm:$0xff]  ;;  %vm606_vm5 = vcmask 1043456  }
   0xc   : > { %s1076_s15 = sshll.u32 %s1479_s30, 2  ;;  %1193 = vrcp.f32 %v1223_v3  ;;  %553 = vmatpush.bf16.msra.mxu0 %v1148_v15  ;;  %v1185_v26 = vld [vmem:[%s1465_s2] ss:$0 sm:$0xff]  ;;  %vm569_vm6 = vcmask 64512   ;;  %s472_s23 = scalar_lea.vmem %s1464_s1, %s1479_s30  ;;  %v1229_v51 = vmov -1e+30  }
   0xd   : > { %s469_s18 = scalar_lea.vmem %s1463_s0, %s1076_s15  ;;  %v1186_v29 = vld [vmem:[%s1466_s3] ss:$0 sm:$0xff]  ;;  %vm624_vm8 = vcmask 60416   ;;  %vm687_vm9 = vcmask 126016   ;;  %vm750_vm10 = vcmask 191616   ;;  %vm813_vm11 = vcmask 257216  }
   0xe   : > { %v478_v0 = vld [vmem:[%s469_s18] sm:$0xf]  ;;  %s1226_s18 = smov 96   ;;  %vm1007_vm15 = vcmask 257024  }
   0xf   : > { %v1330_v1 = vunpack.c.l.bf16 %v478_v0  ;;  %v1187_v33 = vld [vmem:[%s1468_s5] ss:$0 sm:$0xff] }
  0x10   : > { %554 = vmatpush.bf16.msra.mxu0 %v1147_v16  ;;  %v480_v50 = vld [vmem:[%s472_s23] sm:$0x1] }
  0x11   : > { %v486_v2 = vsel %vm485_vm0, %v1330_v1, 0.0  ;;  %vm481_vm7 = vcmp.gt.f32.partialorder %v480_v50, 0.0 }
  0x12   : > { %487 = vadd.xlane.f32.xlu0 %v486_v2  ;;  %v1194_v4 = vpop.eup %1193  ;;  %v482_v52 = vsel %vm481_vm7, 0.0, %v1229_v51 }
  0x13   : > { %v490_v5 = vmul.f32 32.0, %v1194_v4  ;;  %vm494_vm1 = vweird.f32 %v1194_v4  ;;  %v562_v53 = vperm.slane %v482_v52, 0 }
  0x15   : > { %v491_v6 = vsub.f32 1.0, %v490_v5 }
  0x17   : > { %v492_v7 = vmul.f32 %v1194_v4, %v491_v6 }
  0x19   : > { %v493_v8 = vadd.f32 %v1194_v4, %v492_v7 }
  0x1b   : > { %v1334_v9 = vsel %vm494_vm1, %v1194_v4, %v493_v8 }
  0x85   : > { %v488_v10 = vpop.xlane.xlu0 %487 }
  0x86   : > { %v496_v11 = vmul.f32 %v1334_v9, %v488_v10 }
  0x88   : > { %v497_v12 = vsub.f32 %v1330_v1, %v496_v11 }
  0x8a   : > { %v498_v13 = vmul.f32 %v497_v12, %v497_v12 }
  0x8c   : > { %v499_v14 = vsel %vm485_vm0, %v498_v13, 0.0 }
  0x8d   : > { %500 = vadd.xlane.f32.xlu0 %v499_v14 }
 0x100   : > { %v501_v17 = vpop.xlane.xlu0 %500 }
 0x101   : > { %v502_v18 = vmul.f32 %v501_v17, %v1334_v9 }
 0x103   : > { %v503_v19 = vadd.f32 1e-05, %v502_v18 }
 0x105   : > { %1195 = vrsqrt.f32 %v503_v19  ;;  %vm510_vm3 = vweird.f32 %v503_v19 }
 0x10b   : > { %v1196_v20 = vpop.eup %1195 }
 0x10c   : > { %v505_v21 = vmul.f32 %v1196_v20, %v503_v19  ;;  %vm511_vm2 = vweird.f32 %v1196_v20 }
 0x10d   : > { %vm512_vm4 = vmor %vm510_vm3, %vm511_vm2 }
 0x10e   : > { %v506_v22 = vmul.f32 %v1196_v20, %v505_v21 }
 0x110   : > { %v507_v23 = vmul.f32 0.5, %v506_v22 }
 0x112   : > { %v508_v24 = vsub.f32 1.5, %v507_v23 }
 0x114   : > { %v509_v25 = vmul.f32 %v1196_v20, %v508_v24 }
 0x116   : > { %v513_v27 = vsel %vm512_vm4, %v1196_v20, %v509_v25 }
 0x117   : > { %v514_v28 = vmul.f32 %v513_v27, %v497_v12 }
 0x119   : > { %v518_v30 = vmul.f32 %v1185_v26, %v514_v28 }
 0x11b   : > { %v522_v31 = vadd.f32 %v1186_v29, %v518_v30 }
 0x11d   : > { %v528_v32 = vpack.c.bf16 %v522_v31, %v522_v31 }
 0x11f   : > { %1086 = vmatmul.msk.bf16.vlgmr.msra.gmra.mxu0 %vm485_vm0, %v528_v32 }
 0x19c   : > { %v556_v34 = vpop.f32.mrf.mxu0 }
 0x19d   : > { %v557_v35 = vadd.f32 %v1187_v33, %v556_v34 }
 0x19f   : > { %v560_v36 = vpack.c.bf16 %v557_v35, %v557_v35 }
 0x1a1   : > { %v565_v37 = vunpack.c.l.b16 %v560_v36 }
 0x1a3   : > { %v1356_v38 = vpack.c.b16 %v565_v37, %v565_v37 }
 0x1a4   : > { %v558_v39 = vpop.f32.mrf.mxu0 }
 0x1a5   : > { %628 = vrot.lane.b32.xlu0 %v1356_v38, %s1224_s16  ;;  %601 = vrot.lane.b32.xlu2 %v1356_v38, %s1225_s17  ;;  %s1235_s16 = smov 56   ;;  %s1236_s17 = smov 16  }
 0x1a6   : > { %567 = vrot.lane.b32.xlu1 %v1356_v38, %s1226_s18  ;;  %s1237_s18 = smov 8  }
 0x1ad   : > { %754 = vrot.lane.b32.xlu0 %v1356_v38, %s1227_s19  ;;  %s1238_s19 = smov 24  }
 0x1b5   : > { %691 = vrot.lane.b32.xlu0 %v1356_v38, %s1228_s20 }
 0x1ff   : > { %v602_v40 = vpop.permute.xlu2 %601 }
 0x200   : > { %v608_v41 = vsel %vm606_vm5, %v602_v40, 0 }
 0x201   : > { %617 = vmatpush.bf16.msra.mxu2 %v608_v41 }
 0x217   : > { %v629_v42 = vpop.permute.xlu0 %628 }
 0x218   : > { %v568_v43 = vpop.permute.xlu1 %567  ;;  %v634_v44 = vsel %vm569_vm6, %v629_v42, 0 }
 0x219   : > { %v574_v45 = vsel %vm569_vm6, %v568_v43, 0  ;;  %643 = vmatpush.bf16.xpose.msrb.mxu2 %v634_v44 }
 0x21a   : > { %583 = vmatpush.bf16.xpose.msra.mxu1 %v574_v45 }
 0x21f   : > { %v755_v46 = vpop.permute.xlu0 %754 }
 0x220   : > { %v760_v47 = vsel %vm569_vm6, %v755_v46, 0 }
 0x221   : > { %1087 = vmatmul.msk.bf16.vlgmr.msra.gmra.mxu1 %vm569_vm6, %v560_v36  ;;  %769 = vmatpush.bf16.xpose.msra.mxu3 %v760_v47 }
 0x227   : > { %v692_v48 = vpop.permute.xlu0 %691 }
 0x228   : > { %v697_v49 = vsel %vm569_vm6, %v692_v48, 0 }
 0x229   : > { %706 = vmatpush.bf16.xpose.msrb.mxu0 %v697_v49 }
 0x29e   : > { %v585_v54 = vpop.f32.mrf.mxu1 }
 0x29f   : > { %v586_v55 = vadd.f32 %v585_v54, %v562_v53 }
 0x2a1   : > { %v589_v56 = vsel %vm569_vm6, %v586_v55, -inf }
 0x2a2   : > { %590 = vmax.xlane.f32.xlu1 %v589_v56 }
 0x2a6   : > { %v587_v57 = vpop.f32.mrf.mxu1 }
 0x315   : > { %v591_v58 = vpop.xlane.xlu1 %590 }
 0x316   : > { %v592_v59 = vsub.f32 %v586_v55, %v591_v58 }
 0x318   : > { %v593_v60 = vmul.f32 1.442695, %v592_v59 }
 0x31a   : > { %1197 = vpow2.f32 %v593_v60 }
 0x320   : > { %v1198_v61 = vpop.eup %1197 }
 0x321   : > { %v595_v62 = vsel %vm569_vm6, %v1198_v61, 0.0 }
 0x322   : > { %596 = vadd.xlane.f32.xlu2 %v595_v62 }
 0x33a   : > { %626 = vrot.lane.b32.xlu2 %v1356_v38, %s1230_s24 }
 0x342   : > { %752 = vrot.lane.b32.xlu2 %v1356_v38, %s1231_s25 }
 0x34a   : > { %689 = vrot.lane.b32.xlu2 %v1356_v38, %s1232_s26 }
 0x395   : > { %v597_v63 = vpop.xlane.xlu2 %596 }
 0x396   : > { %1199 = vrcp.f32 %v597_v63 }
 0x39c   : > { %v1200_v0 = vpop.eup %1199 }
 0x39d   : > { %v627_v2 = vpop.permute.xlu2 %626  ;;  %v599_v3 = vmul.f32 %v1200_v0, %v1198_v61 }
 0x39f   : > { %v600_v4 = vpack.c.bf16 %v599_v3, %v599_v3 }
 0x3a1   : > { %1088 = vmatmul.msk.bf16.vlgmr.msra.gmra.mxu2 %vm569_vm6, %v600_v4 }
 0x3a5   : > { %v753_v5 = vpop.permute.xlu2 %752 }
 0x3a6   : > { %1093 = vmatmul.msk.bf16.vlgmr.msra.gmra.mxu3 %vm569_vm6, %v753_v5  ;;  %v1149_v5 = vld [vmem:[%s1469_s6] sm:$0xff] }
 0x3ad   : > { %v690_v6 = vpop.permute.xlu2 %689 }
 0x3ae   : > { %1091 = vmatmul.msk.bf16.vlgmr.msrb.gmra.mxu0 %vm569_vm6, %v690_v6 }
 0x3b1   : > { %1089 = vmatmul.msk.bf16.vlgmr.msrb.gmra.mxu2 %vm569_vm6, %v627_v2  ;;  %v1150_v2 = vld [vmem:[%s1469_s6 + $0x8] sm:$0xff] }
 0x3b2   : > { %845 = vmatpush.bf16.msra.mxu0 %v1150_v2 }
 0x3b6   : > { %846 = vmatpush.bf16.msra.mxu0 %v1149_v5 }
 0x424   : > { %v619_v7 = vpop.f32.mrf.mxu2 }
 0x425   : > { %v623_v8 = vpack.c.bf16 %v619_v7, %v619_v7 }
 0x427   : > { %625 = vst.msk [vmem:[#allocation2] sm:$0xf] %vm624_vm8, %v623_v8  ;;  %v1188_v8 = vld [vmem:[%s1470_s7] ss:$0 sm:$0xff] }
 0x429   : > { %v771_v10 = vpop.f32.mrf.mxu3 }
 0x42a   : > { %v772_v11 = vadd.f32 %v771_v10, %v562_v53 }
 0x42b   : > { %v708_v12 = vpop.f32.mrf.mxu0 }
 0x42c   : > { %v709_v13 = vadd.f32 %v708_v12, %v562_v53  ;;  %v621_v14 = vpop.f32.mrf.mxu2  ;;  %v775_v15 = vsel %vm569_vm6, %v772_v11, -inf }
 0x42d   : > { %776 = vmax.xlane.f32.xlu0 %v775_v15 }
 0x42e   : > { %v712_v16 = vsel %vm569_vm6, %v709_v13, -inf }
 0x42f   : > { %713 = vmax.xlane.f32.xlu2 %v712_v16 }
 0x431   : > { %v773_v17 = vpop.f32.mrf.mxu3 }
 0x433   : > { %v710_v18 = vpop.f32.mrf.mxu0 }
 0x434   : > { %v645_v19 = vpop.f32.mrf.mxu2 }
 0x435   : > { %v646_v20 = vadd.f32 %v645_v19, %v562_v53 }
 0x437   : > { %v649_v21 = vsel %vm569_vm6, %v646_v20, -inf }
 0x438   : > { %650 = vmax.xlane.f32.xlu1 %v649_v21  ;;  %v1160_v21 = vld [vmem:[%s1475_s12 + $0x38] sm:$0xff] }
 0x439   : > { %992 = vmatpush.bf16.msrb.mxu3 %v1160_v21 }
 0x43c   : > { %v647_v22 = vpop.f32.mrf.mxu2 }
 0x447   : > { %787 = vrot.lane.b32.xlu2 %v1356_v38, %s1233_s27 }
 0x4a0   : > { %v777_v33 = vpop.xlane.xlu0 %776 }
 0x4a1   : > { %v778_v34 = vsub.f32 %v772_v11, %v777_v33 }
 0x4a2   : > { %v714_v23 = vpop.xlane.xlu2 %713 }
 0x4a3   : > { %v715_v24 = vsub.f32 %v709_v13, %v714_v23  ;;  %v779_v35 = vmul.f32 1.442695, %v778_v34 }
 0x4a5   : > { %v716_v25 = vmul.f32 1.442695, %v715_v24  ;;  %v1159_v24 = vld [vmem:[%s1475_s12 + $0x30] sm:$0xff] }
 0x4a6   : > { %993 = vmatpush.bf16.msrb.mxu3 %v1159_v24 }
 0x4a7   : > { %1201 = vpow2.f32 %v716_v25 }
 0x4aa   : > { %v788_v46 = vpop.permute.xlu2 %787 }
 0x4ab   : > { %v651_v26 = vpop.xlane.xlu1 %650  ;;  %v793_v50 = vsel %vm606_vm5, %v788_v46, 0 }
 0x4ac   : > { %v652_v27 = vsub.f32 %v646_v20, %v651_v26  ;;  %v1152_v20 = vld [vmem:[%s1473_s10 + $0x8] sm:$0xff] }
 0x4ad   : > { %v1202_v28 = vpop.eup %1201  ;;  %v1158_v26 = vld [vmem:[%s1475_s12 + $0x28] sm:$0xff] }
 0x4ae   : > { %v653_v29 = vmul.f32 1.442695, %v652_v27  ;;  %v718_v30 = vsel %vm569_vm6, %v1202_v28, 0.0  ;;  %994 = vmatpush.bf16.msrb.mxu3 %v1158_v26  ;;  %v1157_v27 = vld [vmem:[%s1475_s12 + $0x20] sm:$0xff] }
 0x4af   : > { %719 = vadd.xlane.f32.xlu0 %v718_v30 }
 0x4b0   : > { %1203 = vpow2.f32 %v653_v29 }
 0x4b1   : > { %1205 = vpow2.f32 %v779_v35  ;;  %v1189_v35 = vld [vmem:[%s1471_s8] ss:$0 sm:$0xff] }
 0x4b2   : > { %995 = vmatpush.bf16.msrb.mxu3 %v1157_v27 }
 0x4b6   : > { %v1204_v31 = vpop.eup %1203 }
 0x4b7   : > { %v655_v32 = vsel %vm569_vm6, %v1204_v31, 0.0  ;;  %v1206_v36 = vpop.eup %1205 }
 0x4b8   : > { %656 = vadd.xlane.f32.xlu1 %v655_v32  ;;  %v781_v37 = vsel %vm569_vm6, %v1206_v36, 0.0  ;;  %v1155_v32 = vld [vmem:[%s1475_s12 + $0x10] sm:$0xff] }
 0x4c3   : > { %724 = vrot.lane.b32.xlu0 %v1356_v38, %s1234_s28 }
 0x4d1   : > { %661 = vrot.lane.b32.xlu1 %v1356_v38, %s1235_s16 }
 0x4fb   : > { %782 = vadd.xlane.f32.xlu1 %v781_v37 }
 0x522   : > { %v720_v39 = vpop.xlane.xlu0 %719 }
 0x523   : > { %1207 = vrcp.f32 %v720_v39  ;;  %v1190_v39 = vld [vmem:[%s1472_s9] ss:$0 sm:$0xff] }
 0x529   : > { %v1208_v40 = vpop.eup %1207 }
 0x52a   : > { %v722_v41 = vmul.f32 %v1208_v40, %v1202_v28 }
 0x52b   : > { %v657_v43 = vpop.xlane.xlu1 %656 }
 0x52c   : > { %v723_v45 = vpack.c.bf16 %v722_v41, %v722_v41  ;;  %1209 = vrcp.f32 %v657_v43  ;;  %v1154_v43 = vld [vmem:[%s1475_s12 + $0x8] sm:$0xff] }
 0x532   : > { %v1210_v38 = vpop.eup %1209 }
 0x533   : > { %v659_v47 = vmul.f32 %v1210_v38, %v1204_v31 }
 0x535   : > { %v725_v42 = vpop.permute.xlu0 %724  ;;  %v660_v51 = vpack.c.bf16 %v659_v47, %v659_v47 }
 0x536   : > { %v730_v44 = vsel %vm606_vm5, %v725_v42, 0 }
 0x537   : > { %739 = vmatpush.bf16.msrb.mxu1 %v730_v44  ;;  %v1153_v44 = vld [vmem:[%s1475_s12] sm:$0xff] }
 0x53a   : > { %1092 = vmatmul.msk.bf16.vlgmr.msrb.gmra.mxu1 %vm569_vm6, %v723_v45  ;;  %v1191_v45 = vld [vmem:[%s1474_s11] ss:$0 sm:$0xff] }
 0x53b   : > { %915 = vmatpush.bf16.msra.mxu1 %v1152_v20 }
 0x543   : > { %v662_v48 = vpop.permute.xlu1 %661 }
 0x544   : > { %v667_v49 = vsel %vm606_vm5, %v662_v48, 0 }
 0x545   : > { %676 = vmatpush.bf16.msra.mxu2 %v667_v49 }
 0x548   : > { %1090 = vmatmul.msk.bf16.vlgmr.msra.gmra.mxu2 %vm569_vm6, %v660_v51 }
 0x549   : > { %802 = vmatpush.bf16.msrb.mxu2 %v793_v50  ;;  %v1192_v50 = vld [vmem:[%s1476_s13] ss:$0 sm:$0xff] }
 0x56e   : > { %v783_v52 = vpop.xlane.xlu1 %782 }
 0x56f   : > { %1211 = vrcp.f32 %v783_v52 }
 0x575   : > { %v1212_v53 = vpop.eup %1211 }
 0x576   : > { %v785_v54 = vmul.f32 %v1212_v53, %v1206_v36 }
 0x578   : > { %v786_v55 = vpack.c.bf16 %v785_v54, %v785_v54 }
 0x57a   : > { %1094 = vmatmul.msk.bf16.vlgmr.msrb.gmra.mxu2 %vm569_vm6, %v786_v55 }
 0x5b7   : > { %v741_v56 = vpop.f32.mrf.mxu1 }
 0x5b8   : > { %v745_v57 = vpack.c.bf16 %v741_v56, %v741_v56 }
 0x5ba   : > { %747 = vrot.lane.b32.xlu0 %v745_v57, %s1236_s17  ;;  %s476_s17 = scalar_lea.vmem %s1477_s14, %s1076_s15 }
 0x5bf   : > { %v743_v58 = vpop.f32.mrf.mxu1 }
 0x5cb   : > { %v678_v59 = vpop.f32.mrf.mxu2 }
 0x5cc   : > { %v682_v60 = vpack.c.bf16 %v678_v59, %v678_v59 }
 0x5ce   : > { %684 = vrot.lane.b32.xlu2 %v682_v60, %s1237_s18 }
 0x5d3   : > { %v680_v61 = vpop.f32.mrf.mxu2 }
 0x5fd   : > { %v804_v62 = vpop.f32.mrf.mxu2 }
 0x5fe   : > { %v808_v63 = vpack.c.bf16 %v804_v62, %v804_v62 }
 0x600   : > { %810 = vrot.lane.b32.xlu2 %v808_v63, %s1238_s19 }
 0x605   : > { %v806_v0 = vpop.f32.mrf.mxu2 }
 0x628   : > { %v685_v3 = vpop.permute.xlu2 %684 }
 0x629   : > { %688 = vst.msk [vmem:[#allocation2] sm:$0xf] %vm687_vm9, %v685_v3 }
 0x62c   : > { %v748_v4 = vpop.permute.xlu0 %747 }
 0x62d   : > { %751 = vst.msk [vmem:[#allocation2] sm:$0xf] %vm750_vm10, %v748_v4 }
 0x65a   : > { %v811_v6 = vpop.permute.xlu2 %810 }
 0x65b   : > { %814 = vst.msk [vmem:[#allocation2] sm:$0xf] %vm813_vm11, %v811_v6 }
 0x662   : > { %v815_v7 = vld [vmem:[#allocation2] sm:$0xf] }
 0x663   : > { %1103 = vmatmul.msk.bf16.vlgmr.msra.gmra.mxu0 %vm485_vm0, %v815_v7 }
 0x6e0   : > { %v848_v10 = vpop.f32.mrf.mxu0 }
 0x6e1   : > { %v849_v11 = vadd.f32 %v1188_v8, %v848_v10 }
 0x6e3   : > { %v852_v12 = vadd.f32 %v849_v11, %v1330_v1  ;;  %v1151_v1 = vld [vmem:[%s1473_s10] sm:$0xff] }
 0x6e4   : > { %916 = vmatpush.bf16.msra.mxu1 %v1151_v1 }
 0x6e5   : > { %v855_v13 = vsel %vm485_vm0, %v852_v12, 0.0 }
 0x6e6   : > { %856 = vadd.xlane.f32.xlu0 %v855_v13 }
 0x6e8   : > { %v850_v14 = vpop.f32.mrf.mxu0 }
 0x759   : > { %v857_v15 = vpop.xlane.xlu0 %856 }
 0x75a   : > { %v858_v16 = vmul.f32 %v857_v15, %v1334_v9 }
 0x75c   : > { %v859_v17 = vsub.f32 %v852_v12, %v858_v16 }
 0x75e   : > { %v860_v18 = vmul.f32 %v859_v17, %v859_v17 }
 0x760   : > { %v861_v19 = vsel %vm485_vm0, %v860_v18, 0.0 }
 0x761   : > { %862 = vadd.xlane.f32.xlu1 %v861_v19 }
 0x7d4   : > { %v863_v22 = vpop.xlane.xlu1 %862 }
 0x7d5   : > { %v864_v23 = vmul.f32 %v863_v22, %v1334_v9  ;;  %v1156_v9 = vld [vmem:[%s1475_s12 + $0x18] sm:$0xff] }
 0x7d6   : > { %996 = vmatpush.bf16.msrb.mxu3 %v1156_v9 }
 0x7d7   : > { %v865_v25 = vadd.f32 1e-05, %v864_v23 }
 0x7d9   : > { %1213 = vrsqrt.f32 %v865_v25  ;;  %vm872_vm13 = vweird.f32 %v865_v25 }
 0x7da   : > { %997 = vmatpush.bf16.msrb.mxu3 %v1155_v32 }
 0x7de   : > { %998 = vmatpush.bf16.msrb.mxu3 %v1154_v43 }
 0x7df   : > { %v1214_v28 = vpop.eup %1213 }
 0x7e0   : > { %v867_v29 = vmul.f32 %v1214_v28, %v865_v25  ;;  %vm873_vm12 = vweird.f32 %v1214_v28 }
 0x7e1   : > { %vm874_vm14 = vmor %vm872_vm13, %vm873_vm12 }
 0x7e2   : > { %v868_v30 = vmul.f32 %v1214_v28, %v867_v29  ;;  %999 = vmatpush.bf16.msrb.mxu3 %v1153_v44 }
 0x7e4   : > { %v869_v31 = vmul.f32 0.5, %v868_v30 }
 0x7e6   : > { %v870_v33 = vsub.f32 1.5, %v869_v31 }
 0x7e8   : > { %v871_v34 = vmul.f32 %v1214_v28, %v870_v33 }
 0x7ea   : > { %v875_v36 = vsel %vm874_vm14, %v1214_v28, %v871_v34 }
 0x7eb   : > { %v876_v37 = vmul.f32 %v875_v36, %v859_v17 }
 0x7ed   : > { %v880_v40 = vmul.f32 %v1189_v35, %v876_v37 }
 0x7ef   : > { %v884_v41 = vadd.f32 %v1190_v39, %v880_v40 }
 0x7f1   : > { %v890_v42 = vpack.c.bf16 %v884_v41, %v884_v41 }
 0x7f3   : > { %1112 = vmatmul.msk.bf16.vlgmr.msra.gmra.mxu1 %vm485_vm0, %v890_v42 }
 0x870   : > { %v918_v38 = vpop.f32.mrf.mxu1 }
 0x871   : > { %v919_v46 = vadd.f32 %v1191_v45, %v918_v38 }
 0x873   : > { %v922_v47 = vmax.f32 %v919_v46, 0.0 }
 0x875   : > { %v940_v48 = vpack.c.bf16 %v922_v47, %v922_v47 }
 0x877   : > { %1000 = vmatmul.bf16.vlgmr.msrb.gmra.mxu3 %v940_v48 }
 0x878   : > { %v920_v49 = vpop.f32.mrf.mxu1 }
 0x8fa   : > { %v1001_v51 = vpop.f32.mrf.mxu3 }
 0x8fb   : > { %v1002_v52 = vadd.f32 %v1192_v50, %v1001_v51 }
 0x8fd   : > { %v1005_v53 = vadd.f32 %v1002_v52, %v852_v12 }
 0x8ff   : > { %v1006_v54 = vpack.c.bf16 %v1005_v53, %v1005_v53 }
 0x901   : > { %1008 = vst.msk [vmem:[%s476_s17] sm:$0xf] %vm1007_vm15, %v1006_v54 }
 0x902   : > { %v1003_v55 = vpop.f32.mrf.mxu3 }
 0x903 PF: > { %s24_s29 = sadd.s32 1, %s1221_s29  }
 0x904   : > { %p21_p4 = scmp.ge.s32.totalorder %s24_s29, 4  }
 0x906   :  { %23 = sbr.rel (!%p21_p4) target bundleno = 1 (0x1), region = 109 }

// kernel: transformer_forward.7
= control target key start
LH: loop header
LB: loop body
LE: loop exit
PB: predicated region body
PF: predicated region fallthrough
CT: control target
= control target key end

     0   :  { %s3120_s0 = inlined_call_operand.vmem [shape: bf16[2,8,32], index: 0, kind: input, shape index: {}]   ;;  %s3121_s1 = inlined_call_operand.vmem [shape: bf16[2,8,32], index: 1, kind: input, shape index: {}]   ;;  %s3122_s2 = inlined_call_operand.vmem [shape: f32[2,1,8], index: 2, kind: input, shape index: {}]   ;;  %s3123_s3 = inlined_call_operand.vmem [shape: f32[2,1,8], index: 3, kind: input, shape index: {}]   ;;  %s3124_s4 = inlined_call_operand.vmem [shape: f32[2,8,1], index: 4, kind: input, shape index: {}]   ;;  %s3125_s5 = inlined_call_operand.vmem [shape: f32[1,32], index: 5, kind: input, shape index: {}]   ;;  %s3126_s6 = inlined_call_operand.vmem [shape: f32[1,32], index: 6, kind: input, shape index: {}]   ;;  %s3127_s7 = inlined_call_operand.vmem [shape: bf16[32,96], index: 7, kind: input, shape index: {}]   ;;  %s3128_s8 = inlined_call_operand.vmem [shape: f32[1,96], index: 8, kind: input, shape index: {}]   ;;  %s3129_s9 = inlined_call_operand.vmem [shape: bf16[32,32], index: 9, kind: input, shape index: {}]   ;;  %s3130_s10 = inlined_call_operand.vmem [shape: f32[1,32], index: 10, kind: input, shape index: {}]   ;;  %s3131_s11 = inlined_call_operand.vmem [shape: f32[1,32], index: 11, kind: input, shape index: {}]   ;;  %s3132_s12 = inlined_call_operand.hbm [shape: f32[1,32], index: 12, kind: input, shape index: {}]   ;;  %s3133_s13 = inlined_call_operand.vmem [shape: bf16[32,32], index: 13, kind: input, shape index: {}]   ;;  %s3134_s14 = inlined_call_operand.hbm [shape: f32[1,32], index: 14, kind: input, shape index: {}]   ;;  %s3135_s15 = inlined_call_operand.vmem [shape: bf16[32,64], index: 15, kind: input, shape index: {}]   ;;  %s3136_s16 = inlined_call_operand.hbm [shape: f32[1,64], index: 16, kind: input, shape index: {}]   ;;  %s3137_s17 = inlined_call_operand.vmem [shape: bf16[32,32], index: 17, kind: input, shape index: {}]   ;;  %s3138_s18 = inlined_call_operand.hbm [shape: f32[1,32], index: 18, kind: input, shape index: {}]   ;;  %s3139_s19 = inlined_call_operand.hbm [shape: f32[1,32], index: 19, kind: input, shape index: {}]   ;;  %s3140_s20 = inlined_call_operand.hbm [shape: f32[1,32], index: 20, kind: input, shape index: {}]   ;;  %s3141_s21 = inlined_call_operand.vmem [shape: bf16[32,128], index: 21, kind: input, shape index: {}]   ;;  %s3142_s22 = inlined_call_operand.hbm [shape: f32[1,128], index: 22, kind: input, shape index: {}]   ;;  %s3143_s23 = inlined_call_operand.vmem [shape: bf16[128,32], index: 23, kind: input, shape index: {}]   ;;  %s3144_s24 = inlined_call_operand.hbm [shape: f32[1,32], index: 24, kind: input, shape index: {}]   ;;  %s3145_s25 = inlined_call_operand.vmem [shape: bf16[2,8,32], index: 25, kind: output, shape index: {}]  }
   0x1   :  { %3153 = sst [smem:[#allocation21_spill]] %s3120_s0 }
   0x2   :  { %3154 = sst [smem:[#allocation22_spill]] %s3121_s1 }
   0x3   :  { %3155 = sst [smem:[#allocation23_spill]] %s3122_s2 }
   0x4   :  { %3156 = sst [smem:[#allocation24_spill]] %s3123_s3 }
   0x5   :  { %3157 = sst [smem:[#allocation25_spill]] %s3124_s4 }
   0x6   :  { %3158 = sst [smem:[#allocation26_spill]] %s3125_s5 }
   0x7   :  { %3159 = sst [smem:[#allocation27_spill]] %s3126_s6 }
   0x8   :  { %3160 = sst [smem:[#allocation28_spill]] %s3127_s7 }
   0x9   :  { %3161 = sst [smem:[#allocation29_spill]] %s3128_s8 }
   0xa   :  { %3162 = sst [smem:[#allocation30_spill]] %s3129_s9 }
   0xb   :  { %3163 = sst [smem:[#allocation31_spill]] %s3134_s14 }
   0xc   :  { %3164 = sst [smem:[#allocation32_spill]] %s3138_s18 }
   0xd   :  { %3165 = sst [smem:[#allocation33_spill]] %s3140_s20 }
   0xe   :  { %30 = vsyncpa [#allocation4], 0 }
   0xf   :  { %31 = vsyncpa [#allocation6], 0 }
  0x10   :  { %32 = vsyncpa [#allocation9], 0 }
  0x11   :  { %33 = vsyncpa [#allocation12], 0 }
  0x12   :  { %34 = vsyncpa [#allocation15], 0  ;;  %s2789_s29 = smov 0  }
  0x13 LB: > { %s3166_s14 = sld [smem:[#allocation31_spill]]  ;;  %s2798_s7 = sadd.s32 4294967295, %s2632_s29   ;;  %s2632_s29 = sphi %s2789_s29, %s40_s29  }
  0x14   : > { %p2059_p0 = scmp.ge.s32.totalorder %s2632_s29, 1  ;;  %p621_p1 = scmp.lt.s32.totalorder %s2632_s29, 3 }
  0x15   : > { %p2263_p2 = scmp.eq.s32.totalorder %s2798_s7, 0  ;;  %s2634_s26 = smov [#allocation5]  }
  0x16   : > { %p2803_p3 = pnand %p2059_p0, %p621_p1  ;;  %s671_s1 = sshll.u32 %s2634_s26, 4  ;;  %s672_s1 = int_to_ptr.vmem [resolvable:$true] %s671_s1 }
  0x17   : > { %s3168_s18 = sld [smem:[#allocation32_spill]]  ;;  %s2635_s2 = smov [#allocation8]  }
  0x18   : > { %p2238_p4 = pneg %p2803_p3  ;;  %s3169_s20 = sld [smem:[#allocation33_spill]] }
  0x19   : > { %s669_s30 = sshll.u32 %s3166_s14, 4  ;;  %s701_s6 = sshll.u32 %s2635_s2, 4  ;;  %s670_s30 = int_to_ptr.hbm [resolvable:$true] %s669_s30  ;;  %s702_s6 = int_to_ptr.vmem [resolvable:$true] %s701_s6 }
  0x1a   : > { %p2817_p5 = pnand %p2263_p2, %p2238_p4  ;;  %s2636_s26 = smov [#allocation11]  }
  0x1b   : > { %s725_s8 = sshll.u32 %s2636_s26, 4  ;;  %s654_s9 = sshll.u32 %s3132_s12, 4  ;;  %s726_s8 = int_to_ptr.vmem [resolvable:$true] %s725_s8  ;;  %s655_s9 = int_to_ptr.hbm [resolvable:$true] %s654_s9 }
  0x1c   : > { %2244 = dma.hbm_to_vmem [thread:$0]  (!%p2817_p5), %s670_s30, 16, %s672_s1, [#allocation6]  }
  0x1d   : > { %s699_s4 = sshll.u32 %s3168_s18, 4  ;;  %s684_s18 = sshll.u32 %s3136_s16, 4  ;;  %s700_s4 = int_to_ptr.hbm [resolvable:$true] %s699_s4  ;;  %s685_s18 = int_to_ptr.hbm [resolvable:$true] %s684_s18 }
  0x1e   : > { %s723_s5 = sshll.u32 %s3169_s20, 4  ;;  %s2637_s20 = smov [#allocation3]   ;;  %s724_s5 = int_to_ptr.hbm [resolvable:$true] %s723_s5 }
  0x1f   : > { %2250 = dma.hbm_to_vmem [thread:$0]  (!%p2817_p5), %s700_s4, 16, %s702_s6, [#allocation9]  }
  0x20   : > { %2256 = dma.hbm_to_vmem [thread:$0]  (!%p2817_p5), %s724_s5, 16, %s726_s8, [#allocation12]  }
  0x21   : > { %s656_s30 = sshll.u32 %s2637_s20, 4  ;;  %s2638_s1 = smov [#allocation7]   ;;  %s657_s30 = int_to_ptr.vmem [resolvable:$true] %s656_s30 }
  0x22   : > { %2241 = dma.hbm_to_vmem [thread:$0]  (!%p2817_p5), %s655_s9, 16, %s657_s30, [#allocation4]  }
  0x23   : > { %s686_s4 = sshll.u32 %s2638_s1, 4  ;;  %s711_s27 = sshll.u32 %s3139_s19, 4  ;;  %s687_s4 = int_to_ptr.vmem [resolvable:$true] %s686_s4  ;;  %s712_s27 = int_to_ptr.hbm [resolvable:$true] %s711_s27 }
  0x24   : > { %2247 = dma.hbm_to_vmem [thread:$0]  (!%p2817_p5), %s685_s18, 16, %s687_s4, [#allocation6]  }
  0x25   : > { %s738_s20 = sshll.u32 %s3142_s22, 4  ;;  %s2639_s8 = smov [#allocation10]   ;;  %s739_s20 = int_to_ptr.hbm [resolvable:$true] %s738_s20 }
  0x26   : > { %s713_s28 = sshll.u32 %s2639_s8, 4  ;;  %s2640_s9 = smov [#allocation13]   ;;  %s714_s28 = int_to_ptr.vmem [resolvable:$true] %s713_s28 }
  0x27   : > { %2253 = dma.hbm_to_vmem [thread:$0]  (!%p2817_p5), %s712_s27, 16, %s714_s28, [#allocation9]  }
  0x28   : > { %s740_s2 = sshll.u32 %s2640_s9, 4  ;;  %s753_s6 = sshll.u32 %s3144_s24, 4  ;;  %s741_s2 = int_to_ptr.vmem [resolvable:$true] %s740_s2  ;;  %s754_s6 = int_to_ptr.hbm [resolvable:$true] %s753_s6 }
  0x29   : > { %2259 = dma.hbm_to_vmem [thread:$0]  (!%p2817_p5), %s739_s20, 16, %s741_s2, [#allocation12]  }
  0x2a   : > { %s2641_s18 = smov [#allocation14]   ;;  %801 = sbr.rel (%p2803_p3) target bundleno = 3254 (0xcb6), region = 120 }
  0x2b   : > { %s755_s4 = sshll.u32 %s2641_s18, 4  ;;  %s756_s4 = int_to_ptr.vmem [resolvable:$true] %s755_s4 }
  0x2c   : > { %2262 = dma.hbm_to_vmem [thread:$0]  (!%p2817_p5), %s754_s6, 16, %s756_s4, [#allocation15]  }
  0x2f   : > { %2611 = dma.done.wait (%p2263_p2), [#allocation4], 16  }
  0x30   : > { %2613 = vsyncadd (%p2263_p2), [#allocation4], 4294967280 }
  0x31   : > { %2615 = dma.done.wait (%p2263_p2), [#allocation6], 32  }
  0x32   : > { %2617 = vsyncadd (%p2263_p2), [#allocation6], 4294967264 }
  0x33   : > { %2619 = dma.done.wait (%p2263_p2), [#allocation9], 32  }
  0x34   : > { %2621 = vsyncadd (%p2263_p2), [#allocation9], 4294967264 }
  0x35   : > { %2623 = dma.done.wait (%p2263_p2), [#allocation12], 32  }
  0x36   : > { %2625 = vsyncadd (%p2263_p2), [#allocation12], 4294967264 }
  0x37   : > { %2627 = dma.done.wait (%p2263_p2), [#allocation15], 16  }
  0x38   : > { %2629 = vsyncadd (%p2263_p2), [#allocation15], 4294967280  ;;  %p917_p6 = scmp.lt.s32.totalorder %s2798_s7, 1  ;;  %s3171_s27 = sld [smem:[#allocation21_spill]]  ;;  %vm971_vm0 = vcmask 261120   ;;  %v2642_v3 = vmov 32.0   ;;  %v949_v53 = vlaneseq }
  0x39   : > { %2326 = vrcp.f32 %v2642_v3  ;;  %s3172_s8 = sld [smem:[#allocation28_spill]]  ;;  %s2644_s5 = smov 120   ;;  %vm1052_vm5 = vcmask 64512   ;;  %v2650_v47 = vmov 0   ;;  %v2651_v58 = vmov -1e+30  }
  0x3a   : > { %s3187_s7 = smov (!%p917_p6, %s2798_s7), 1  ;;  %s3173_s1 = sld [smem:[#allocation26_spill]]  ;;  %2312 = vset.pattern.permute.xlu0 %v2650_v47  ;;  %v950_v55 = vshrl.u32 %v949_v53, 7  ;;  %v952_v56 = vand.u32 127, %v949_v53  ;;  %vm1089_vm10 = vcmask 1043456   ;;  %vm1107_vm11 = vcmask 60416  }
  0x3b   : > { %s2879_s3 = sshll.u32 %s3187_s7, 2  ;;  %s3174_s4 = sld [smem:[#allocation27_spill]]  ;;  %vm1170_vm12 = vcmask 126016   ;;  %vm1233_vm13 = vcmask 191616   ;;  %vm1296_vm14 = vcmask 257216  }
  0x3c   : > { %s2645_s20 = smov 96   ;;  %s3151_s28 = smov 72   ;;  %vm953_vm7 = vcmp.ge.s32.totalorder %v950_v55, %v952_v56 }
  0x3d   : > { %s2647_s9 = smov 88   ;;  %s2648_s2 = smov 112  }
  0x3e   : > { %s920_s14 = scalar_lea.vmem %s3171_s27, %s2879_s3  ;;  %s3175_s27 = sld [smem:[#allocation29_spill]] }
  0x3f   : > { %v940_v0 = vld [vmem:[%s920_s14] sm:$0xf]  ;;  %v2327_v4 = vpop.eup %2326  ;;  %v2187_v15 = vld [vmem:[%s3172_s8 + $0x8] sm:$0xff]  ;;  %s2643_s14 = smov 104   ;;  %s3152_s30 = smov 80  }
  0x40   : > { %v2885_v1 = vunpack.c.l.bf16 %v940_v0  ;;  %v976_v5 = vmul.f32 32.0, %v2327_v4  ;;  %vm980_vm1 = vweird.f32 %v2327_v4  ;;  %1039 = vmatpush.bf16.msra.mxu0 %v2187_v15  ;;  %v2186_v16 = vld [vmem:[%s3172_s8] sm:$0xff]  ;;  %s3176_s18 = sld [smem:[#allocation23_spill]]  ;;  %s2652_s0 = smov 64  }
  0x41   : > { %v2313_v26 = vld [vmem:[%s3173_s1] ss:$0 sm:$0xff]  ;;  %s2653_s26 = smov 56   ;;  %s2655_s1 = smov 48  }
  0x42   : > { %v972_v2 = vsel %vm971_vm0, %v2885_v1, 0.0  ;;  %v977_v6 = vsub.f32 1.0, %v976_v5  ;;  %v2314_v29 = vld [vmem:[%s3174_s4] ss:$0 sm:$0xff]  ;;  %s3148_s6 = smov 8  }
  0x43   : > { %973 = vadd.xlane.f32.xlu0 %v972_v2 }
  0x44   : > { %v978_v7 = vmul.f32 %v2327_v4, %v977_v6  ;;  %1040 = vmatpush.bf16.msra.mxu0 %v2186_v16  ;;  %v2315_v33 = vld [vmem:[%s3175_s27] ss:$0 sm:$0xff]  ;;  %s2654_s27 = smov 40  }
  0x46   : > { %v979_v8 = vadd.f32 %v2327_v4, %v978_v7  ;;  %s927_s4 = scalar_lea.vmem %s3176_s18, %s3187_s7  ;;  %s3150_s18 = smov 24  }
  0x47   : > { %v943_v52 = vld [vmem:[%s927_s4] sm:$0x1]  ;;  %s3149_s4 = smov 16  }
  0x48   : > { %v2889_v9 = vsel %vm980_vm1, %v2327_v4, %v979_v8  ;;  %vm944_vm6 = vcmp.gt.f32.partialorder %v943_v52, 0.0 }
  0x49   : > { %v954_v54 = vsel %vm944_vm6, 1, %v2650_v47 }
  0x4a   : > { %v955_v57 = vperm.slane %v954_v54, 0 }
  0x4c   : > { %vm956_vm8 = vcmp.eq.s32.totalorder %v955_v57, 1 }
  0x4d   : > { %vm957_vm9 = vmand %vm953_vm7, %vm956_vm8 }
  0x4e   : > { %v958_v59 = vsel %vm957_vm9, 0.0, %v2651_v58 }
  0xb6   : > { %v974_v10 = vpop.xlane.xlu0 %973 }
  0xb7   : > { %v982_v11 = vmul.f32 %v2889_v9, %v974_v10 }
  0xb9   : > { %v983_v12 = vsub.f32 %v2885_v1, %v982_v11 }
  0xbb   : > { %v984_v13 = vmul.f32 %v983_v12, %v983_v12 }
  0xbd   : > { %v985_v14 = vsel %vm971_vm0, %v984_v13, 0.0 }
  0xbe   : > { %986 = vadd.xlane.f32.xlu0 %v985_v14 }
 0x131   : > { %v987_v17 = vpop.xlane.xlu0 %986 }
 0x132   : > { %v988_v18 = vmul.f32 %v987_v17, %v2889_v9 }
 0x134   : > { %v989_v19 = vadd.f32 1e-05, %v988_v18 }
 0x136   : > { %2328 = vrsqrt.f32 %v989_v19  ;;  %vm996_vm3 = vweird.f32 %v989_v19 }
 0x13c   : > { %v2329_v20 = vpop.eup %2328 }
 0x13d   : > { %v991_v21 = vmul.f32 %v2329_v20, %v989_v19  ;;  %vm997_vm2 = vweird.f32 %v2329_v20 }
 0x13e   : > { %vm998_vm4 = vmor %vm996_vm3, %vm997_vm2 }
 0x13f   : > { %v992_v22 = vmul.f32 %v2329_v20, %v991_v21 }
 0x141   : > { %v993_v23 = vmul.f32 0.5, %v992_v22 }
 0x143   : > { %v994_v24 = vsub.f32 1.5, %v993_v23 }
 0x145   : > { %v995_v25 = vmul.f32 %v2329_v20, %v994_v24 }
 0x147   : > { %v999_v27 = vsel %vm998_vm4, %v2329_v20, %v995_v25 }
 0x148   : > { %v1000_v28 = vmul.f32 %v999_v27, %v983_v12 }
 0x14a   : > { %v1004_v30 = vmul.f32 %v2313_v26, %v1000_v28 }
 0x14c   : > { %v1008_v31 = vadd.f32 %v2314_v29, %v1004_v30 }
 0x14e   : > { %v1014_v32 = vpack.c.bf16 %v1008_v31, %v1008_v31 }
 0x150   : > { %2090 = vmatmul.msk.bf16.vlgmr.msra.gmra.mxu0 %vm971_vm0, %v1014_v32 }
 0x1cd   : > { %v1042_v34 = vpop.f32.mrf.mxu0 }
 0x1ce   : > { %v1043_v35 = vadd.f32 %v2315_v33, %v1042_v34 }
 0x1d0   : > { %v1046_v36 = vpack.c.bf16 %v1043_v35, %v1043_v35 }
 0x1d2   : > { %v1048_v37 = vunpack.c.l.b16 %v1046_v36 }
 0x1d4   : > { %v2911_v38 = vpack.c.b16 %v1048_v37, %v1048_v37 }
 0x1d5   : > { %v1044_v39 = vpop.f32.mrf.mxu0 }
 0x1d6   : > { %1235 = vrot.lane.b32.xlu0 %v2911_v38, %s2643_s14  ;;  %1109 = vrot.lane.b32.xlu2 %v2911_v38, %s2644_s5 }
 0x1d7   : > { %1050 = vrot.lane.b32.xlu1 %v2911_v38, %s2645_s20 }
 0x1de   : > { %1237 = vrot.lane.b32.xlu2 %v2911_v38, %s3151_s28  ;;  %s3178_s28 = sld [smem:[#allocation22_spill]] }
 0x1df   : > { %1111 = vrot.lane.b32.xlu1 %v2911_v38, %s2647_s9 }
 0x1e6   : > { %1172 = vrot.lane.b32.xlu2 %v2911_v38, %s2648_s2 }
 0x1e7   : > { %1174 = vrot.lane.b32.xlu1 %v2911_v38, %s3152_s30  ;;  %s924_s30 = scalar_lea.vmem %s3178_s28, %s2879_s3 }
 0x230   : > { %v1110_v40 = vpop.permute.xlu2 %1109 }
 0x238   : > { %v1238_v43 = vpop.permute.xlu2 %1237 }
 0x239   : > { %v1243_v46 = vsel %vm1052_vm5, %v1238_v43, 0 }
 0x240   : > { %v1173_v50 = vpop.permute.xlu2 %1172 }
 0x248   : > { %v1236_v51 = vpop.permute.xlu0 %1235 }
 0x249   : > { %v1051_v41 = vpop.permute.xlu1 %1050 }
 0x24a   : > { %v1057_v42 = vsel %vm1052_vm5, %v1051_v41, 0 }
 0x24b   : > { %1066 = vmatpush.bf16.xpose.msra.mxu3 %v1057_v42 }
 0x251   : > { %v1112_v44 = vpop.permute.xlu1 %1111 }
 0x252   : > { %2091 = vmatmul.msk.bf16.vlgmr.msra.gmra.mxu3 %vm1052_vm5, %v1046_v36  ;;  %v1117_v45 = vsel %vm1052_vm5, %v1112_v44, 0 }
 0x253   : > { %1126 = vmatpush.bf16.xpose.msrb.mxu3 %v1117_v45 }
 0x259   : > { %v1175_v48 = vpop.permute.xlu1 %1174 }
 0x25a   : > { %v1180_v49 = vsel %vm1052_vm5, %v1175_v48, 0 }
 0x25b   : > { %1252 = vmatpush.bf16.xpose.msra.mxu3 %v1243_v46  ;;  %1189 = vmatpush.bf16.xpose.msrb.mxu0 %v1180_v49 }
 0x262   : > { %2093 = vmatmul.msk.bf16.vlgmr.msrb.gmra.mxu3 %vm1052_vm5, %v1110_v40  ;;  %2095 = vmatmul.msk.bf16.vlgmr.msrb.gmra.mxu0 %vm1052_vm5, %v1173_v50 }
 0x272   : > { %2097 = vmatmul.msk.bf16.vlgmr.msra.gmra.mxu3 %vm1052_vm5, %v1236_v51 }
 0x2d5   : > { %v1068_v60 = vpop.f32.mrf.mxu3 }
 0x2d6   : > { %v1069_v61 = vadd.f32 %v1068_v60, %v958_v59 }
 0x2d8   : > { %v1072_v62 = vsel %vm1052_vm5, %v1069_v61, -inf }
 0x2d9   : > { %1073 = vmax.xlane.f32.xlu1 %v1072_v62 }
 0x2dd   : > { %v1070_v63 = vpop.f32.mrf.mxu3 }
 0x2df   : > { %v1191_v0 = vpop.f32.mrf.mxu0 }
 0x2e0   : > { %v1192_v6 = vadd.f32 %v1191_v0, %v958_v59 }
 0x2e2   : > { %v1195_v8 = vsel %vm1052_vm5, %v1192_v6, -inf }
 0x2e5   : > { %v1128_v2 = vpop.f32.mrf.mxu3 }
 0x2e6   : > { %v1129_v3 = vadd.f32 %v1128_v2, %v958_v59 }
 0x2e7   : > { %v1193_v4 = vpop.f32.mrf.mxu0 }
 0x2e8   : > { %v1132_v5 = vsel %vm1052_vm5, %v1129_v3, -inf }
 0x2e9   : > { %1133 = vmax.xlane.f32.xlu2 %v1132_v5 }
 0x2ed   : > { %v1130_v7 = vpop.f32.mrf.mxu3 }
 0x2f1   : > { %1196 = vmax.xlane.f32.xlu2 %v1195_v8 }
 0x2f5   : > { %v1254_v10 = vpop.f32.mrf.mxu3 }
 0x2f6   : > { %v1255_v11 = vadd.f32 %v1254_v10, %v958_v59 }
 0x2f8   : > { %v1258_v12 = vsel %vm1052_vm5, %v1255_v11, -inf }
 0x2f9   : > { %1259 = vmax.xlane.f32.xlu0 %v1258_v12 }
 0x2fd   : > { %v1256_v13 = vpop.f32.mrf.mxu3 }
 0x309   : > { %1084 = vrot.lane.b32.xlu2 %v2911_v38, %s2652_s0  ;;  %s2080_s0 = sshll.u32 %s3187_s7, 3 }
 0x30d   : > { %1144 = vrot.lane.b32.xlu0 %v2911_v38, %s2653_s26 }
 0x311   : > { %1270 = vrot.lane.b32.xlu2 %v2911_v38, %s2654_s27  ;;  %s3177_s27 = sld [smem:[#allocation30_spill]] }
 0x315   : > { %1207 = vrot.lane.b32.xlu0 %v2911_v38, %s2655_s1  ;;  %s3180_s1 = sld [smem:[#allocation24_spill]] }
 0x317   : > { %v2189_v10 = vld [vmem:[%s3177_s27 + $0x8] sm:$0xff] }
 0x318   : > { %1328 = vmatpush.bf16.msra.mxu0 %v2189_v10 }
 0x34c   : > { %v1074_v14 = vpop.xlane.xlu1 %1073 }
 0x34d   : > { %v1075_v15 = vsub.f32 %v1069_v61, %v1074_v14 }
 0x34f   : > { %v1076_v16 = vmul.f32 1.442695, %v1075_v15 }
 0x351   : > { %2330 = vpow2.f32 %v1076_v16  ;;  %v2316_v16 = vld [vmem:[%s3130_s10] ss:$0 sm:$0xff] }
 0x357   : > { %v2331_v17 = vpop.eup %2330 }
 0x358   : > { %v1078_v18 = vsel %vm1052_vm5, %v2331_v17, 0.0 }
 0x359   : > { %1079 = vadd.xlane.f32.xlu1 %v1078_v18 }
 0x35c   : > { %v1134_v19 = vpop.xlane.xlu2 %1133 }
 0x35d   : > { %v1135_v20 = vsub.f32 %v1129_v3, %v1134_v19 }
 0x35f   : > { %v1136_v21 = vmul.f32 1.442695, %v1135_v20 }
 0x361   : > { %2332 = vpow2.f32 %v1136_v21 }
 0x364   : > { %v1197_v22 = vpop.xlane.xlu2 %1196 }
 0x365   : > { %v1198_v29 = vsub.f32 %v1192_v6, %v1197_v22  ;;  %v2193_v22 = vld [vmem:[%s3135_s15 + $0x8] sm:$0xff] }
 0x366   : > { %1434 = vmatpush.bf16.msrb.mxu3 %v2193_v22 }
 0x367   : > { %v2333_v23 = vpop.eup %2332  ;;  %v1199_v31 = vmul.f32 1.442695, %v1198_v29  ;;  %v2191_v29 = vld [vmem:[%s3133_s13 + $0x8] sm:$0xff] }
 0x368   : > { %v1138_v24 = vsel %vm1052_vm5, %v2333_v23, 0.0 }
 0x369   : > { %1139 = vadd.xlane.f32.xlu1 %v1138_v24 }
 0x36c   : > { %v1260_v25 = vpop.xlane.xlu0 %1259  ;;  %v1085_v26 = vpop.permute.xlu2 %1084 }
 0x36d   : > { %v1261_v27 = vsub.f32 %v1255_v11, %v1260_v25  ;;  %v1091_v28 = vsel %vm1089_vm10, %v1085_v26, 0  ;;  %v2188_v11 = vld [vmem:[%s3177_s27] sm:$0xff] }
 0x36e   : > { %1100 = vmatpush.bf16.msra.mxu2 %v1091_v28  ;;  %1329 = vmatpush.bf16.msra.mxu0 %v2188_v11 }
 0x36f   : > { %v1262_v30 = vmul.f32 1.442695, %v1261_v27 }
 0x371   : > { %2334 = vpow2.f32 %v1262_v30  ;;  %v2190_v30 = vld [vmem:[%s3133_s13] sm:$0xff] }
 0x372   : > { %2336 = vpow2.f32 %v1199_v31  ;;  %v2319_v31 = vld [vmem:[#allocation7] ss:$0 sm:$0xff] }
 0x374   : > { %v1271_v43 = vpop.permute.xlu2 %1270 }
 0x375   : > { %v1276_v45 = vsel %vm1089_vm10, %v1271_v43, 0 }
 0x377   : > { %v2335_v32 = vpop.eup %2334 }
 0x378   : > { %v1264_v33 = vsel %vm1052_vm5, %v2335_v32, 0.0  ;;  %v2337_v34 = vpop.eup %2336 }
 0x379   : > { %1265 = vadd.xlane.f32.xlu1 %v1264_v33  ;;  %v1201_v37 = vsel %vm1052_vm5, %v2337_v34, 0.0 }
 0x37f   : > { %v1145_v35 = vpop.permute.xlu0 %1144 }
 0x380   : > { %v1150_v36 = vsel %vm1089_vm10, %v1145_v35, 0 }
 0x381   : > { %1159 = vmatpush.bf16.msrb.mxu2 %v1150_v36  ;;  %1202 = vadd.xlane.f32.xlu1 %v1201_v37 }
 0x387   : > { %v1208_v38 = vpop.permute.xlu0 %1207 }
 0x388   : > { %v1213_v39 = vsel %vm1089_vm10, %v1208_v38, 0 }
 0x389   : > { %1222 = vmatpush.bf16.msra.mxu1 %v1213_v39 }
 0x38d   : > { %1398 = vmatpush.bf16.msrb.mxu1 %v2191_v29 }
 0x391   : > { %1399 = vmatpush.bf16.msrb.mxu1 %v2190_v30 }
 0x3cc   : > { %v1080_v40 = vpop.xlane.xlu1 %1079 }
 0x3cd   : > { %2338 = vrcp.f32 %v1080_v40 }
 0x3d3   : > { %v2339_v41 = vpop.eup %2338 }
 0x3d4   : > { %v1082_v42 = vmul.f32 %v2339_v41, %v2331_v17 }
 0x3d6   : > { %v1083_v44 = vpack.c.bf16 %v1082_v42, %v1082_v42 }
 0x3d8   : > { %2092 = vmatmul.msk.bf16.vlgmr.msra.gmra.mxu2 %vm1052_vm5, %v1083_v44 }
 0x3d9   : > { %1285 = vmatpush.bf16.msra.mxu2 %v1276_v45 }
 0x3dc   : > { %v1140_v46 = vpop.xlane.xlu1 %1139 }
 0x3dd   : > { %2340 = vrcp.f32 %v1140_v46 }
 0x3e3   : > { %v2341_v48 = vpop.eup %2340 }
 0x3e4   : > { %v1142_v49 = vmul.f32 %v2341_v48, %v2333_v23  ;;  %v2192_v23 = vld [vmem:[%s3135_s15] sm:$0xff] }
 0x3e5   : > { %1435 = vmatpush.bf16.msrb.mxu3 %v2192_v23 }
 0x3e6   : > { %v1143_v50 = vpack.c.bf16 %v1142_v49, %v1142_v49  ;;  %v2317_v49 = vld [vmem:[%s3131_s11] ss:$0 sm:$0xff] }
 0x3e8   : > { %2094 = vmatmul.msk.bf16.vlgmr.msrb.gmra.mxu2 %vm1052_vm5, %v1143_v50 }
 0x3ec   : > { %v1266_v51 = vpop.xlane.xlu1 %1265 }
 0x3ed   : > { %2342 = vrcp.f32 %v1266_v51 }
 0x3f3   : > { %v2343_v52 = vpop.eup %2342 }
 0x3f4   : > { %v1268_v53 = vmul.f32 %v2343_v52, %v2335_v32  ;;  %v1203_v54 = vpop.xlane.xlu1 %1202  ;;  %v2318_v52 = vld [vmem:[#allocation3] ss:$0 sm:$0xff] }
 0x3f5   : > { %2344 = vrcp.f32 %v1203_v54 }
 0x3f6   : > { %v1269_v55 = vpack.c.bf16 %v1268_v53, %v1268_v53 }
 0x3f8   : > { %2098 = vmatmul.msk.bf16.vlgmr.msra.gmra.mxu2 %vm1052_vm5, %v1269_v55 }
 0x3fb   : > { %v2345_v56 = vpop.eup %2344 }
 0x3fc   : > { %v1205_v57 = vmul.f32 %v2345_v56, %v2337_v34 }
 0x3fe   : > { %v1206_v59 = vpack.c.bf16 %v1205_v57, %v1205_v57 }
 0x400   : > { %2096 = vmatmul.msk.bf16.vlgmr.msra.gmra.mxu1 %vm1052_vm5, %v1206_v59 }
 0x45b   : > { %v1102_v60 = vpop.f32.mrf.mxu2 }
 0x45c   : > { %v1106_v61 = vpack.c.bf16 %v1102_v60, %v1102_v60 }
 0x45e   : > { %1108 = vst.msk [vmem:[#allocation2] sm:$0xf] %vm1107_vm11, %v1106_v61  ;;  %v2320_v61 = vld [vmem:[#allocation5] ss:$0 sm:$0xff] }
 0x463   : > { %v1104_v62 = vpop.f32.mrf.mxu2 }
 0x46b   : > { %v1161_v63 = vpop.f32.mrf.mxu2 }
 0x46c   : > { %v1165_v0 = vpack.c.bf16 %v1161_v63, %v1161_v63 }
 0x46e   : > { %1167 = vrot.lane.b32.xlu1 %v1165_v0, %s3148_s6 }
 0x473   : > { %v1163_v2 = vpop.f32.mrf.mxu2 }
 0x47b   : > { %v1287_v3 = vpop.f32.mrf.mxu2 }
 0x47c   : > { %v1291_v4 = vpack.c.bf16 %v1287_v3, %v1287_v3 }
 0x47d   : > { %v1224_v5 = vpop.f32.mrf.mxu1 }
 0x47e   : > { %v1228_v6 = vpack.c.bf16 %v1224_v5, %v1224_v5  ;;  %1293 = vrot.lane.b32.xlu0 %v1291_v4, %s3150_s18  ;;  %s3179_s18 = sld [smem:[#allocation25_spill]] }
 0x480   : > { %1230 = vrot.lane.b32.xlu2 %v1228_v6, %s3149_s4 }
 0x483   : > { %v1289_v7 = vpop.f32.mrf.mxu2 }
 0x484   : > { %s934_s4 = scalar_lea.vmem %s3179_s18, %s2080_s0  ;;  %s930_s0 = scalar_lea.vmem %s3180_s1, %s3187_s7 }
 0x485   : > { %v1226_v8 = vpop.f32.mrf.mxu1  ;;  %v947_v56 = vld [vmem:[%s934_s4] sm:$0xff]  ;;  %s3181_s7 = smov 80  }
 0x486   : > { %vm948_vm3 = vcmp.gt.f32.partialorder %v947_v56, 0.0  ;;  %v945_v8 = vld [vmem:[%s930_s0] sm:$0x1] }
 0x487   : > { %v962_v57 = vsel %vm948_vm3, 1, %v2650_v47  ;;  %vm946_vm4 = vcmp.gt.f32.partialorder %v945_v8, 0.0 }
 0x488   : > { %v959_v10 = vsel %vm946_vm4, 1, %v2650_v47 }
 0x4da   : > { %v1231_v13 = vpop.permute.xlu2 %1230 }
 0x4e0   : > { %v1168_v12 = vpop.permute.xlu1 %1167 }
 0x4e1   : > { %1171 = vst.msk [vmem:[#allocation2] sm:$0xf] %vm1170_vm12, %v1168_v12  ;;  %v960_v12 = vperm.slane %v959_v10, 0 }
 0x4e2   : > { %1234 = vst.msk [vmem:[#allocation2] sm:$0xf] %vm1233_vm13, %v1231_v13 }
 0x4e3   : > { %vm961_vm6 = vcmp.eq.s32.totalorder %v960_v12, 1 }
 0x4f0   : > { %v1294_v14 = vpop.permute.xlu0 %1293 }
 0x4f1   : > { %1297 = vst.msk [vmem:[#allocation2] sm:$0xf] %vm1296_vm14, %v1294_v14 }
 0x4f8   : > { %v1298_v15 = vld [vmem:[#allocation2] sm:$0xf] }
 0x4f9   : > { %2107 = vmatmul.msk.bf16.vlgmr.msra.gmra.mxu0 %vm971_vm0, %v1298_v15 }
 0x576   : > { %v1331_v17 = vpop.f32.mrf.mxu0 }
 0x577   : > { %v1332_v18 = vadd.f32 %v2316_v16, %v1331_v17 }
 0x579   : > { %v2980_v19 = vadd.f32 %v1332_v18, %v2885_v1  ;;  %v942_v1 = vld [vmem:[%s924_s30] sm:$0xf] }
 0x57a   : > { %2125 = vmatmul.msk.bf16.vlgmr.msrb.gmra.mxu3 %vm971_vm0, %v942_v1 }
 0x57b   : > { %v1338_v20 = vsel %vm971_vm0, %v2980_v19, 0.0 }
 0x57c   : > { %1339 = vadd.xlane.f32.xlu2 %v1338_v20 }
 0x57e   : > { %v1333_v21 = vpop.f32.mrf.mxu0 }
 0x5ef   : > { %v1340_v24 = vpop.xlane.xlu2 %1339 }
 0x5f0   : > { %v1341_v25 = vmul.f32 %v1340_v24, %v2889_v9 }
 0x5f2   : > { %v1342_v26 = vsub.f32 %v2980_v19, %v1341_v25 }
 0x5f4   : > { %v1343_v27 = vmul.f32 %v1342_v26, %v1342_v26 }
 0x5f6   : > { %v1344_v28 = vsel %vm971_vm0, %v1343_v27, 0.0 }
 0x5f7   : > { %1345 = vadd.xlane.f32.xlu0 %v1344_v28 }
 0x5fd   : > { %v1437_v32 = vpop.f32.mrf.mxu3 }
 0x5fe   : > { %v1438_v35 = vadd.f32 %v2319_v31, %v1437_v32 }
 0x600   : > { %v1442_v37 = vpack.c.bf16 %v1438_v35, %v1438_v35 }
 0x602   : > { %v1447_v38 = vsel %vm1052_vm5, %v1442_v37, 0  ;;  %v1475_v39 = vunpack.c.l.b16 %v1442_v37 }
 0x603   : > { %1456 = vmatpush.bf16.xpose.msrb.mxu2 %v1447_v38 }
 0x604   : > { %v3006_v40 = vpack.c.b16 %v1475_v39, %v1475_v39 }
 0x605   : > { %v1439_v41 = vpop.f32.mrf.mxu3 }
 0x606   : > { %1505 = vrot.lane.b32.xlu1 %v3006_v40, %s2644_s5 }
 0x60b   : > { %964 = vperm.xlu0 %2312, %v962_v57  }
 0x60e   : > { %1567 = vrot.lane.b32.xlu1 %v3006_v40, %s2648_s2 }
 0x66a   : > { %v1346_v33 = vpop.xlane.xlu0 %1345 }
 0x66b   : > { %v1347_v34 = vmul.f32 %v1346_v33, %v2889_v9 }
 0x66d   : > { %v1348_v36 = vadd.f32 1e-05, %v1347_v34 }
 0x66f   : > { %2346 = vrsqrt.f32 %v1348_v36  ;;  %vm1355_vm1 = vweird.f32 %v1348_v36 }
 0x675   : > { %v2347_v42 = vpop.eup %2346 }
 0x676   : > { %v1350_v43 = vmul.f32 %v2347_v42, %v1348_v36  ;;  %vm1356_vm15 = vweird.f32 %v2347_v42 }
 0x677   : > { %vm1357_vm2 = vmor %vm1355_vm1, %vm1356_vm15 }
 0x678   : > { %v1351_v44 = vmul.f32 %v2347_v42, %v1350_v43  ;;  %v1506_v59 = vpop.permute.xlu1 %1505 }
 0x679   : > { %v1511_v60 = vsel %vm1052_vm5, %v1506_v59, 0 }
 0x67a   : > { %v1352_v45 = vmul.f32 0.5, %v1351_v44  ;;  %1520 = vmatpush.bf16.xpose.msra.mxu1 %v1511_v60 }
 0x67c   : > { %v1353_v46 = vsub.f32 1.5, %v1352_v45 }
 0x67d   : > { %v965_v13 = vpop.permute.xlu0 %964 }
 0x67e   : > { %v1354_v48 = vmul.f32 %v2347_v42, %v1353_v46  ;;  %vm966_vm7 = vcmp.eq.s32.totalorder %v965_v13, 1 }
 0x67f   : > { %vm967_vm8 = vmand %vm961_vm6, %vm966_vm7 }
 0x680   : > { %v1358_v50 = vsel %vm1357_vm2, %v2347_v42, %v1354_v48  ;;  %v1568_v0 = vpop.permute.xlu1 %1567  ;;  %v968_v16 = vsel %vm967_vm8, 0.0, %v2651_v58 }
 0x681   : > { %v1359_v51 = vmul.f32 %v1358_v50, %v1342_v26  ;;  %v1573_v2 = vsel %vm1052_vm5, %v1568_v0, 0 }
 0x682   : > { %1582 = vmatpush.bf16.xpose.msra.mxu2 %v1573_v2 }
 0x683   : > { %v1363_v53 = vmul.f32 %v2317_v49, %v1359_v51 }
 0x685   : > { %v1367_v54 = vadd.f32 %v2318_v52, %v1363_v53 }
 0x687   : > { %v1373_v55 = vpack.c.bf16 %v1367_v54, %v1367_v54 }
 0x689   : > { %2116 = vmatmul.msk.bf16.vlgmr.msrb.gmra.mxu1 %vm971_vm0, %v1373_v55 }
 0x706   : > { %v1401_v62 = vpop.f32.mrf.mxu1 }
 0x707   : > { %v1402_v63 = vadd.f32 %v2320_v61, %v1401_v62 }
 0x709   : > { %v1441_v3 = vpack.c.bf16 %v1402_v63, %v1402_v63 }
 0x70b   : > { %v1501_v4 = vunpack.c.l.b16 %v1441_v3  ;;  %2126 = vmatmul.msk.bf16.vlgmr.msrb.gmra.mxu2 %vm1052_vm5, %v1441_v3 }
 0x70d   : > { %v1502_v5 = vpack.c.b16 %v1501_v4, %v1501_v4 }
 0x70e   : > { %v1403_v6 = vpop.f32.mrf.mxu1 }
 0x70f   : > { %1565 = vrot.lane.b32.xlu2 %v1502_v5, %s2648_s2  ;;  %1503 = vrot.lane.b32.xlu1 %v1502_v5, %s2644_s5  ;;  %s3183_s5 = smov 8  }
 0x717   : > { %1629 = vrot.lane.b32.xlu1 %v3006_v40, %s2643_s14 }
 0x71f   : > { %1627 = vrot.lane.b32.xlu1 %v1502_v5, %s2643_s14  ;;  %s3182_s14 = smov 72  }
 0x769   : > { %v1566_v7 = vpop.permute.xlu2 %1565 }
 0x76a   : > { %2130 = vmatmul.msk.bf16.vlgmr.msra.gmra.mxu2 %vm1052_vm5, %v1566_v7 }
 0x781   : > { %v1504_v11 = vpop.permute.xlu1 %1503 }
 0x782   : > { %2128 = vmatmul.msk.bf16.vlgmr.msra.gmra.mxu1 %vm1052_vm5, %v1504_v11 }
 0x789   : > { %v1630_v14 = vpop.permute.xlu1 %1629 }
 0x78a   : > { %v1635_v15 = vsel %vm1052_vm5, %v1630_v14, 0 }
 0x78b   : > { %1644 = vmatpush.bf16.xpose.msrb.mxu1 %v1635_v15 }
 0x78e   : > { %v1458_v17 = vpop.f32.mrf.mxu2 }
 0x78f   : > { %v1459_v18 = vadd.f32 %v1458_v17, %v968_v16 }
 0x791   : > { %v1628_v20 = vpop.permute.xlu1 %1627  ;;  %v1462_v21 = vsel %vm1052_vm5, %v1459_v18, -inf }
 0x792   : > { %1463 = vmax.xlane.f32.xlu2 %v1462_v21  ;;  %2132 = vmatmul.msk.bf16.vlgmr.msrb.gmra.mxu1 %vm1052_vm5, %v1628_v20 }
 0x796   : > { %v1460_v47 = vpop.f32.mrf.mxu2 }
 0x7ed   : > { %v1584_v22 = vpop.f32.mrf.mxu2 }
 0x7ee   : > { %v1585_v27 = vadd.f32 %v1584_v22, %v968_v16 }
 0x7f0   : > { %v1588_v30 = vsel %vm1052_vm5, %v1585_v27, -inf }
 0x7f5   : > { %v1586_v23 = vpop.f32.mrf.mxu2 }
 0x7ff   : > { %v1522_v1 = vpop.f32.mrf.mxu1 }
 0x800   : > { %v1523_v24 = vadd.f32 %v1522_v1, %v968_v16 }
 0x802   : > { %v1526_v25 = vsel %vm1052_vm5, %v1523_v24, -inf }
 0x803   : > { %1527 = vmax.xlane.f32.xlu1 %v1526_v25 }
 0x805   : > { %v1464_v26 = vpop.xlane.xlu2 %1463 }
 0x806   : > { %v1465_v28 = vsub.f32 %v1459_v18, %v1464_v26 }
 0x807   : > { %v1524_v58 = vpop.f32.mrf.mxu1 }
 0x808   : > { %v1466_v29 = vmul.f32 1.442695, %v1465_v28  ;;  %v2194_v28 = vld [vmem:[%s3137_s17] sm:$0xff] }
 0x80a   : > { %2348 = vpow2.f32 %v1466_v29 }
 0x80b   : > { %1589 = vmax.xlane.f32.xlu1 %v1588_v30 }
 0x80f   : > { %v1646_v31 = vpop.f32.mrf.mxu1 }
 0x810   : > { %v2349_v32 = vpop.eup %2348  ;;  %v1647_v33 = vadd.f32 %v1646_v31, %v968_v16 }
 0x811   : > { %v1468_v34 = vsel %vm1052_vm5, %v2349_v32, 0.0 }
 0x812   : > { %1469 = vadd.xlane.f32.xlu2 %v1468_v34  ;;  %v1650_v35 = vsel %vm1052_vm5, %v1647_v33, -inf }
 0x813   : > { %1651 = vmax.xlane.f32.xlu0 %v1650_v35 }
 0x817   : > { %v1648_v36 = vpop.f32.mrf.mxu1 }
 0x824   : > { %1538 = vrot.lane.b32.xlu1 %v3006_v40, %s2647_s9  ;;  %s3185_s9 = smov 16  }
 0x82a   : > { %1477 = vrot.lane.b32.xlu2 %v3006_v40, %s2645_s20  ;;  %s3184_s20 = smov 24  }
 0x832   : > { %1600 = vrot.lane.b32.xlu2 %v3006_v40, %s3181_s7 }
 0x876   : > { %v1528_v37 = vpop.xlane.xlu1 %1527 }
 0x877   : > { %v1529_v38 = vsub.f32 %v1523_v24, %v1528_v37 }
 0x879   : > { %v1530_v39 = vmul.f32 1.442695, %v1529_v38 }
 0x87b   : > { %2350 = vpow2.f32 %v1530_v39 }
 0x87e   : > { %v1590_v44 = vpop.xlane.xlu1 %1589 }
 0x87f   : > { %v1591_v48 = vsub.f32 %v1585_v27, %v1590_v44  ;;  %v2195_v27 = vld [vmem:[%s3137_s17 + $0x8] sm:$0xff] }
 0x880   : > { %1719 = vmatpush.bf16.msrb.mxu2 %v2195_v27  ;;  %v2197_v44 = vld [vmem:[%s3141_s21 + $0x8] sm:$0xff] }
 0x881   : > { %v2351_v41 = vpop.eup %2350  ;;  %v1592_v51 = vmul.f32 1.442695, %v1591_v48 }
 0x882   : > { %v1532_v42 = vsel %vm1052_vm5, %v2351_v41, 0.0 }
 0x883   : > { %1533 = vadd.xlane.f32.xlu1 %v1532_v42 }
 0x884   : > { %1720 = vmatpush.bf16.msrb.mxu2 %v2194_v28 }
 0x885   : > { %v1470_v43 = vpop.xlane.xlu2 %1469 }
 0x886   : > { %2352 = vrcp.f32 %v1470_v43  ;;  %v1652_v45 = vpop.xlane.xlu0 %1651 }
 0x887   : > { %v1653_v46 = vsub.f32 %v1647_v33, %v1652_v45  ;;  %v2205_v45 = vld [vmem:[%s3143_s23 + $0x38] sm:$0xff] }
 0x888   : > { %1866 = vmatpush.bf16.msra.mxu1 %v2205_v45 }
 0x889   : > { %v1654_v49 = vmul.f32 1.442695, %v1653_v46 }
 0x88b   : > { %2354 = vpow2.f32 %v1654_v49  ;;  %v2204_v49 = vld [vmem:[%s3143_s23 + $0x30] sm:$0xff] }
 0x88c   : > { %v2353_v50 = vpop.eup %2352  ;;  %2356 = vpow2.f32 %v1592_v51  ;;  %1867 = vmatpush.bf16.msra.mxu1 %v2204_v49  ;;  %v2203_v51 = vld [vmem:[%s3143_s23 + $0x28] sm:$0xff] }
 0x88d   : > { %v1472_v52 = vmul.f32 %v2353_v50, %v2349_v32  ;;  %v1478_v53 = vpop.permute.xlu2 %1477  ;;  %v2321_v32 = vld [vmem:[#allocation8] ss:$0 sm:$0xff] }
 0x88e   : > { %v1483_v54 = vsel %vm1089_vm10, %v1478_v53, 0 }
 0x88f   : > { %v1473_v55 = vpack.c.bf16 %v1472_v52, %v1472_v52  ;;  %1492 = vmatpush.bf16.msrb.mxu0 %v1483_v54  ;;  %v2202_v52 = vld [vmem:[%s3143_s23 + $0x20] sm:$0xff] }
 0x890   : > { %1868 = vmatpush.bf16.msra.mxu1 %v2203_v51 }
 0x891   : > { %v2355_v56 = vpop.eup %2354 }
 0x892   : > { %2127 = vmatmul.msk.bf16.vlgmr.msrb.gmra.mxu0 %vm1052_vm5, %v1473_v55  ;;  %v1656_v57 = vsel %vm1052_vm5, %v2355_v56, 0.0  ;;  %v2357_v62 = vpop.eup %2356 }
 0x893   : > { %1657 = vadd.xlane.f32.xlu0 %v1656_v57  ;;  %v1594_v0 = vsel %vm1052_vm5, %v2357_v62, 0.0  ;;  %v2200_v57 = vld [vmem:[%s3143_s23 + $0x10] sm:$0xff] }
 0x894   : > { %1869 = vmatpush.bf16.msra.mxu1 %v2202_v52 }
 0x895   : > { %v1601_v59 = vpop.permute.xlu2 %1600 }
 0x896   : > { %v1606_v60 = vsel %vm1089_vm10, %v1601_v59, 0  ;;  %v1539_v61 = vpop.permute.xlu1 %1538 }
 0x897   : > { %v1544_v63 = vsel %vm1089_vm10, %v1539_v61, 0  ;;  %1615 = vmatpush.bf16.msra.mxu0 %v1606_v60  ;;  %v2322_v61 = vld [vmem:[#allocation10] ss:$0 sm:$0xff] }
 0x898   : > { %1553 = vmatpush.bf16.msra.mxu3 %v1544_v63 }
 0x89b   : > { %1595 = vadd.xlane.f32.xlu0 %v1594_v0  ;;  %1789 = vmatpush.bf16.msrb.mxu0 %v2197_v44  ;;  %v2323_v0 = vld [vmem:[#allocation11] ss:$0 sm:$0xff] }
 0x89c   : > { %1662 = vrot.lane.b32.xlu1 %v3006_v40, %s3182_s14 }
 0x8f6   : > { %v1534_v2 = vpop.xlane.xlu1 %1533 }
 0x8f7   : > { %2358 = vrcp.f32 %v1534_v2 }
 0x8fd   : > { %v2359_v3 = vpop.eup %2358 }
 0x8fe   : > { %v1536_v4 = vmul.f32 %v2359_v3, %v2351_v41 }
 0x900   : > { %v1537_v5 = vpack.c.bf16 %v1536_v4, %v1536_v4 }
 0x902   : > { %2129 = vmatmul.msk.bf16.vlgmr.msra.gmra.mxu3 %vm1052_vm5, %v1537_v5  ;;  %v2199_v5 = vld [vmem:[%s3143_s23 + $0x8] sm:$0xff] }
 0x906   : > { %v1658_v6 = vpop.xlane.xlu0 %1657 }
 0x907   : > { %2360 = vrcp.f32 %v1658_v6  ;;  %v2198_v6 = vld [vmem:[%s3143_s23] sm:$0xff] }
 0x90d   : > { %v2361_v7 = vpop.eup %2360 }
 0x90e   : > { %v1660_v8 = vmul.f32 %v2361_v7, %v2355_v56  ;;  %v1596_v10 = vpop.xlane.xlu0 %1595  ;;  %v1663_v11 = vpop.permute.xlu1 %1662  ;;  %v2324_v7 = vld [vmem:[#allocation13] ss:$0 sm:$0xff] }
 0x90f   : > { %2362 = vrcp.f32 %v1596_v10  ;;  %v1668_v12 = vsel %vm1089_vm10, %v1663_v11, 0  ;;  %v1494_v13 = vpop.f32.mrf.mxu0 }
 0x910   : > { %v1661_v14 = vpack.c.bf16 %v1660_v8, %v1660_v8  ;;  %v1498_v15 = vpack.c.bf16 %v1494_v13, %v1494_v13  ;;  %1677 = vmatpush.bf16.msrb.mxu3 %v1668_v12 }
 0x912   : > { %1499 = vst.msk [vmem:[#allocation2] sm:$0xf] %vm1107_vm11, %v1498_v15 }
 0x913   : > { %2133 = vmatmul.msk.bf16.vlgmr.msrb.gmra.mxu3 %vm1052_vm5, %v1661_v14  ;;  %v2325_v14 = vld [vmem:[#allocation14] ss:$0 sm:$0xff] }
 0x915   : > { %v2363_v40 = vpop.eup %2362 }
 0x916   : > { %v1598_v16 = vmul.f32 %v2363_v40, %v2357_v62 }
 0x917   : > { %v1496_v17 = vpop.f32.mrf.mxu0 }
 0x918   : > { %v1599_v18 = vpack.c.bf16 %v1598_v16, %v1598_v16 }
 0x91a   : > { %2131 = vmatmul.msk.bf16.vlgmr.msra.gmra.mxu0 %vm1052_vm5, %v1599_v18 }
 0x985   : > { %v1555_v20 = vpop.f32.mrf.mxu3 }
 0x986   : > { %v1559_v21 = vpack.c.bf16 %v1555_v20, %v1555_v20 }
 0x988   : > { %1561 = vrot.lane.b32.xlu0 %v1559_v21, %s3183_s5 }
 0x98d   : > { %v1557_v47 = vpop.f32.mrf.mxu3 }
 0x996   : > { %v1679_v22 = vpop.f32.mrf.mxu3 }
 0x997   : > { %v1683_v23 = vpack.c.bf16 %v1679_v22, %v1679_v22  ;;  %v1617_v1 = vpop.f32.mrf.mxu0 }
 0x998   : > { %v1621_v24 = vpack.c.bf16 %v1617_v1, %v1617_v1 }
 0x999   : > { %1685 = vrot.lane.b32.xlu2 %v1683_v23, %s3184_s20  ;;  %s938_s20 = scalar_lea.vmem %s3145_s25, %s2879_s3 }
 0x99a   : > { %1623 = vrot.lane.b32.xlu1 %v1621_v24, %s3185_s9 }
 0x99e   : > { %v1681_v25 = vpop.f32.mrf.mxu3 }
 0x99f   : > { %v1619_v26 = vpop.f32.mrf.mxu0 }
 0x9f3   : > { %v1686_v30 = vpop.permute.xlu2 %1685 }
 0x9fa   : > { %v1562_v58 = vpop.permute.xlu0 %1561 }
 0x9fb   : > { %1564 = vst.msk [vmem:[#allocation2] sm:$0xf] %vm1170_vm12, %v1562_v58 }
 0xa0c   : > { %v1624_v29 = vpop.permute.xlu1 %1623 }
 0xa0d   : > { %1626 = vst.msk [vmem:[#allocation2] sm:$0xf] %vm1233_vm13, %v1624_v29 }
 0xa0e   : > { %1688 = vst.msk [vmem:[#allocation2] sm:$0xf] %vm1296_vm14, %v1686_v30 }
 0xa15   : > { %v1689_v31 = vld [vmem:[#allocation2] sm:$0xf] }
 0xa16   : > { %2142 = vmatmul.msk.bf16.vlgmr.msrb.gmra.mxu2 %vm971_vm0, %v1689_v31 }
 0xa99   : > { %v1722_v33 = vpop.f32.mrf.mxu2 }
 0xa9a   : > { %v1723_v34 = vadd.f32 %v2321_v32, %v1722_v33 }
 0xa9c   : > { %v1726_v35 = vadd.f32 %v1723_v34, %v2980_v19  ;;  %v2196_v19 = vld [vmem:[%s3141_s21] sm:$0xff] }
 0xa9d   : > { %1790 = vmatpush.bf16.msrb.mxu0 %v2196_v19 }
 0xa9e   : > { %v1729_v36 = vsel %vm971_vm0, %v1726_v35, 0.0 }
 0xa9f   : > { %1730 = vadd.xlane.f32.xlu1 %v1729_v36 }
 0xaa1   : > { %v1724_v37 = vpop.f32.mrf.mxu2 }
 0xb12   : > { %v1731_v38 = vpop.xlane.xlu1 %1730 }
 0xb13   : > { %v1732_v39 = vmul.f32 %v1731_v38, %v2889_v9 }
 0xb15   : > { %v1733_v41 = vsub.f32 %v1726_v35, %v1732_v39 }
 0xb17   : > { %v1734_v42 = vmul.f32 %v1733_v41, %v1733_v41 }
 0xb19   : > { %v1735_v43 = vsel %vm971_vm0, %v1734_v42, 0.0 }
 0xb1a   : > { %1736 = vadd.xlane.f32.xlu2 %v1735_v43 }
 0xb8d   : > { %v1737_v46 = vpop.xlane.xlu2 %1736 }
 0xb8e   : > { %v1738_v48 = vmul.f32 %v1737_v46, %v2889_v9  ;;  %v2201_v9 = vld [vmem:[%s3143_s23 + $0x18] sm:$0xff] }
 0xb8f   : > { %1870 = vmatpush.bf16.msra.mxu1 %v2201_v9 }
 0xb90   : > { %v1739_v50 = vadd.f32 1e-05, %v1738_v48 }
 0xb92   : > { %2364 = vrsqrt.f32 %v1739_v50  ;;  %vm1746_vm9 = vweird.f32 %v1739_v50 }
 0xb93   : > { %1871 = vmatpush.bf16.msra.mxu1 %v2200_v57 }
 0xb97   : > { %1872 = vmatpush.bf16.msra.mxu1 %v2199_v5 }
 0xb98   : > { %v2365_v53 = vpop.eup %2364 }
 0xb99   : > { %v1741_v54 = vmul.f32 %v2365_v53, %v1739_v50  ;;  %vm1747_vm5 = vweird.f32 %v2365_v53 }
 0xb9a   : > { %vm1748_vm10 = vmor %vm1746_vm9, %vm1747_vm5 }
 0xb9b   : > { %v1742_v55 = vmul.f32 %v2365_v53, %v1741_v54  ;;  %1873 = vmatpush.bf16.msra.mxu1 %v2198_v6 }
 0xb9d   : > { %v1743_v56 = vmul.f32 0.5, %v1742_v55 }
 0xb9f   : > { %v1744_v59 = vsub.f32 1.5, %v1743_v56 }
 0xba1   : > { %v1745_v60 = vmul.f32 %v2365_v53, %v1744_v59 }
 0xba3   : > { %v1749_v62 = vsel %vm1748_vm10, %v2365_v53, %v1745_v60 }
 0xba4   : > { %v1750_v63 = vmul.f32 %v1749_v62, %v1733_v41 }
 0xba6   : > { %v1754_v2 = vmul.f32 %v2322_v61, %v1750_v63 }
 0xba8   : > { %v1758_v3 = vadd.f32 %v2323_v0, %v1754_v2 }
 0xbaa   : > { %v1764_v4 = vpack.c.bf16 %v1758_v3, %v1758_v3 }
 0xbac   : > { %2151 = vmatmul.msk.bf16.vlgmr.msrb.gmra.mxu0 %vm971_vm0, %v1764_v4  ;;  %vm1881_vm0 = vcmask 257024  }
 0xc29   : > { %v1792_v8 = vpop.f32.mrf.mxu0 }
 0xc2a   : > { %v1793_v10 = vadd.f32 %v2324_v7, %v1792_v8 }
 0xc2c   : > { %v1796_v11 = vmax.f32 %v1793_v10, 0.0 }
 0xc2e   : > { %v1814_v12 = vpack.c.bf16 %v1796_v11, %v1796_v11 }
 0xc30   : > { %1874 = vmatmul.bf16.vlgmr.msra.gmra.mxu1 %v1814_v12 }
 0xc31   : > { %v1794_v13 = vpop.f32.mrf.mxu0 }
 0xcad   : > { %v1875_v15 = vpop.f32.mrf.mxu1 }
 0xcae   : > { %v1876_v40 = vadd.f32 %v2325_v14, %v1875_v15 }
 0xcb0   : > { %v1879_v16 = vadd.f32 %v1876_v40, %v1726_v35 }
 0xcb2   : > { %v1880_v17 = vpack.c.bf16 %v1879_v16, %v1879_v16 }
 0xcb4   : > { %1882 = vst.msk [vmem:[%s938_s20] sm:$0xf] %vm1881_vm0, %v1880_v17 }
 0xcb5   : > { %v1877_v18 = vpop.f32.mrf.mxu1 }
 0xcb6 PF: > { %s40_s29 = sadd.s32 1, %s2632_s29  }
 0xcb7   : > { %p37_p7 = scmp.ge.s32.totalorder %s40_s29, 4  }
 0xcb9   :  { %39 = sbr.rel (!%p37_p7) target bundleno = 19 (0x13), region = 195 }
 0xcbe   :  { %1902 = vsyncpa [#allocation4], 1 }
 0xcbf   :  { %1904 = vsyncpa [#allocation4 + $0x1], 1 }
 0xcc0   :  { %1905 = vsyncpa [#allocation6], 1 }
 0xcc1   :  { %1906 = vsyncpa [#allocation9], 1 }
 0xcc2   :  { %1907 = vsyncpa [#allocation12], 1 }
 0xcc3   :  { %1908 = vsyncpa [#allocation15], 1 }

// kernel: transformer_forward.8
= control target key start
LH: loop header
LB: loop body
LE: loop exit
PB: predicated region body
PF: predicated region fallthrough
CT: control target
= control target key end

     0   :  { %s3480_s0 = inlined_call_operand.vmem [shape: bf16[2,8,32], index: 0, kind: input, shape index: {}]   ;;  %s3481_s1 = inlined_call_operand.vmem [shape: bf16[2,8,32], index: 1, kind: input, shape index: {}]   ;;  %s3482_s2 = inlined_call_operand.vmem [shape: f32[2,1,8], index: 2, kind: input, shape index: {}]   ;;  %s3483_s3 = inlined_call_operand.vmem [shape: f32[2,1,8], index: 3, kind: input, shape index: {}]   ;;  %s3484_s4 = inlined_call_operand.vmem [shape: f32[2,8,1], index: 4, kind: input, shape index: {}]   ;;  %s3485_s5 = inlined_call_operand.hbm [shape: f32[1,32], index: 5, kind: input, shape index: {}]   ;;  %s3486_s6 = inlined_call_operand.hbm [shape: f32[1,32], index: 6, kind: input, shape index: {}]   ;;  %s3487_s7 = inlined_call_operand.vmem [shape: bf16[32,96], index: 7, kind: input, shape index: {}]   ;;  %s3488_s8 = inlined_call_operand.hbm [shape: f32[1,96], index: 8, kind: input, shape index: {}]   ;;  %s3489_s9 = inlined_call_operand.vmem [shape: bf16[32,32], index: 9, kind: input, shape index: {}]   ;;  %s3490_s10 = inlined_call_operand.hbm [shape: f32[1,32], index: 10, kind: input, shape index: {}]   ;;  %s3491_s11 = inlined_call_operand.hbm [shape: f32[1,32], index: 11, kind: input, shape index: {}]   ;;  %s3492_s12 = inlined_call_operand.hbm [shape: f32[1,32], index: 12, kind: input, shape index: {}]   ;;  %s3493_s13 = inlined_call_operand.vmem [shape: bf16[32,32], index: 13, kind: input, shape index: {}]   ;;  %s3494_s14 = inlined_call_operand.hbm [shape: f32[1,32], index: 14, kind: input, shape index: {}]   ;;  %s3495_s15 = inlined_call_operand.vmem [shape: bf16[32,64], index: 15, kind: input, shape index: {}]   ;;  %s3496_s16 = inlined_call_operand.hbm [shape: f32[1,64], index: 16, kind: input, shape index: {}]   ;;  %s3497_s17 = inlined_call_operand.vmem [shape: bf16[32,32], index: 17, kind: input, shape index: {}]   ;;  %s3498_s18 = inlined_call_operand.hbm [shape: f32[1,32], index: 18, kind: input, shape index: {}]   ;;  %s3499_s19 = inlined_call_operand.hbm [shape: f32[1,32], index: 19, kind: input, shape index: {}]   ;;  %s3500_s20 = inlined_call_operand.hbm [shape: f32[1,32], index: 20, kind: input, shape index: {}]   ;;  %s3501_s21 = inlined_call_operand.vmem [shape: bf16[32,128], index: 21, kind: input, shape index: {}]   ;;  %s3502_s22 = inlined_call_operand.hbm [shape: f32[1,128], index: 22, kind: input, shape index: {}]   ;;  %s3503_s23 = inlined_call_operand.vmem [shape: bf16[128,32], index: 23, kind: input, shape index: {}]   ;;  %s3504_s24 = inlined_call_operand.hbm [shape: f32[1,32], index: 24, kind: input, shape index: {}]   ;;  %s3505_s25 = inlined_call_operand.vmem [shape: bf16[2,8,32], index: 25, kind: output, shape index: {}]  }
   0x1   :  { %3513 = sst [smem:[#allocation31_spill]] %s3480_s0 }
   0x2   :  { %3514 = sst [smem:[#allocation32_spill]] %s3481_s1 }
   0x3   :  { %3515 = sst [smem:[#allocation33_spill]] %s3482_s2 }
   0x4   :  { %3516 = sst [smem:[#allocation34_spill]] %s3483_s3 }
   0x5   :  { %3517 = sst [smem:[#allocation35_spill]] %s3484_s4 }
   0x6   :  { %3518 = sst [smem:[#allocation36_spill]] %s3485_s5 }
   0x7   :  { %3519 = sst [smem:[#allocation37_spill]] %s3486_s6 }
   0x8   :  { %3520 = sst [smem:[#allocation38_spill]] %s3487_s7 }
   0x9   :  { %3521 = sst [smem:[#allocation39_spill]] %s3488_s8 }
   0xa   :  { %3522 = sst [smem:[#allocation40_spill]] %s3489_s9 }
   0xb   :  { %3523 = sst [smem:[#allocation41_spill]] %s3490_s10 }
   0xc   :  { %3524 = sst [smem:[#allocation42_spill]] %s3492_s12 }
   0xd   :  { %3525 = sst [smem:[#allocation43_spill]] %s3496_s16 }
   0xe   :  { %30 = vsyncpa [#allocation4], 0 }
   0xf   :  { %31 = vsyncpa [#allocation6], 0 }
  0x10   :  { %32 = vsyncpa [#allocation9], 0 }
  0x11   :  { %33 = vsyncpa [#allocation12], 0 }
  0x12   :  { %34 = vsyncpa [#allocation15], 0 }
  0x13   :  { %35 = vsyncpa [#allocation18], 0 }
  0x14   :  { %36 = vsyncpa [#allocation21], 0  ;;  %s3131_s29 = smov 0  }
  0x15 LB: > { %3526 = sst [smem:[#allocation30_spill]] %s2969_s29  ;;  %s3140_s3 = sadd.s32 4294967295, %s2969_s29   ;;  %s2969_s29 = sphi %s3131_s29, %s42_s29  }
  0x16   : > { %s3527_s30 = sld [smem:[#allocation37_spill]]  ;;  %p2178_p0 = scmp.ge.s32.totalorder %s2969_s29, 1 }
  0x17   : > { %p623_p1 = scmp.lt.s32.totalorder %s2969_s29, 3  ;;  %p2427_p2 = scmp.eq.s32.totalorder %s3140_s3, 0 }
  0x18   : > { %s2971_s1 = smov [#allocation5]   ;;  %s3529_s10 = sld [smem:[#allocation41_spill]] }
  0x19   : > { %p3145_p3 = pnand %p2178_p0, %p623_p1  ;;  %s649_s8 = sshll.u32 %s2971_s1, 4  ;;  %s650_s8 = int_to_ptr.vmem [resolvable:$true] %s649_s8 }
  0x1a   : > { %s3530_s12 = sld [smem:[#allocation42_spill]]  ;;  %s2972_s6 = smov [#allocation8]  }
  0x1b   : > { %p2387_p4 = pneg %p3145_p3  ;;  %s2973_s1 = smov [#allocation11]  }
  0x1c   : > { %s647_s7 = sshll.u32 %s3527_s30, 4  ;;  %s679_s30 = sshll.u32 %s2972_s6, 4  ;;  %s648_s7 = int_to_ptr.hbm [resolvable:$true] %s647_s7  ;;  %s680_s30 = int_to_ptr.vmem [resolvable:$true] %s679_s30 }
  0x1d   : > { %p3159_p5 = pnand %p2427_p2, %p2387_p4  ;;  %s703_s27 = sshll.u32 %s2973_s1, 4  ;;  %s704_s27 = int_to_ptr.vmem [resolvable:$true] %s703_s27 }
  0x1e   : > { %s677_s28 = sshll.u32 %s3529_s10, 4  ;;  %s3532_s16 = sld [smem:[#allocation43_spill]]  ;;  %s678_s28 = int_to_ptr.hbm [resolvable:$true] %s677_s28 }
  0x1f   : > { %2393 = dma.hbm_to_vmem [thread:$0]  (!%p3159_p5), %s648_s7, 16, %s650_s8, [#allocation6]  }
  0x20   : > { %s701_s0 = sshll.u32 %s3530_s12, 4  ;;  %s758_s12 = sshll.u32 %s3499_s19, 4  ;;  %s702_s0 = int_to_ptr.hbm [resolvable:$true] %s701_s0  ;;  %s759_s12 = int_to_ptr.hbm [resolvable:$true] %s758_s12 }
  0x21   : > { %2399 = dma.hbm_to_vmem [thread:$0]  (!%p3159_p5), %s678_s28, 16, %s680_s30, [#allocation9]  }
  0x22   : > { %2405 = dma.hbm_to_vmem [thread:$0]  (!%p3159_p5), %s702_s0, 16, %s704_s27, [#allocation12]  }
  0x23   : > { %s2974_s29 = smov [#allocation14]   ;;  %s2975_s8 = smov [#allocation17]  }
  0x24   : > { %s731_s5 = sshll.u32 %s3532_s16, 4  ;;  %s733_s7 = sshll.u32 %s2974_s29, 4  ;;  %s732_s5 = int_to_ptr.hbm [resolvable:$true] %s731_s5  ;;  %s734_s7 = int_to_ptr.vmem [resolvable:$true] %s733_s7 }
  0x25   : > { %2411 = dma.hbm_to_vmem [thread:$0]  (!%p3159_p5), %s732_s5, 16, %s734_s7, [#allocation15]  }
  0x26   : > { %s760_s28 = sshll.u32 %s2975_s8, 4  ;;  %s785_s4 = sshll.u32 %s3502_s22, 4  ;;  %s761_s28 = int_to_ptr.vmem [resolvable:$true] %s760_s28  ;;  %s786_s4 = int_to_ptr.hbm [resolvable:$true] %s785_s4 }
  0x27   : > { %2417 = dma.hbm_to_vmem [thread:$0]  (!%p3159_p5), %s759_s12, 16, %s761_s28, [#allocation18]  }
  0x28   : > { %s3533_s27 = sld [smem:[#allocation36_spill]]  ;;  %s2976_s29 = smov [#allocation20]  }
  0x29   : > { %s787_s6 = sshll.u32 %s2976_s29, 4  ;;  %s2977_s5 = smov [#allocation3]   ;;  %s788_s6 = int_to_ptr.vmem [resolvable:$true] %s787_s6 }
  0x2a   : > { %2423 = dma.hbm_to_vmem [thread:$0]  (!%p3159_p5), %s786_s4, 16, %s788_s6, [#allocation21]  }
  0x2b   : > { %s637_s7 = sshll.u32 %s2977_s5, 4  ;;  %s3534_s1 = sld [smem:[#allocation39_spill]]  ;;  %s638_s7 = int_to_ptr.vmem [resolvable:$true] %s637_s7 }
  0x2c   : > { %s689_s10 = sshll.u32 %s3491_s11, 4  ;;  %s2978_s0 = smov [#allocation7]   ;;  %s690_s10 = int_to_ptr.hbm [resolvable:$true] %s689_s10 }
  0x2d   : > { %s2979_s4 = smov [#allocation10]   ;;  %s716_s8 = sshll.u32 %s3494_s14, 4  ;;  %s717_s8 = int_to_ptr.hbm [resolvable:$true] %s716_s8 }
  0x2e   : > { %s635_s9 = sshll.u32 %s3533_s27, 4  ;;  %s664_s27 = sshll.u32 %s2978_s0, 4  ;;  %s636_s9 = int_to_ptr.hbm [resolvable:$true] %s635_s9  ;;  %s665_s27 = int_to_ptr.vmem [resolvable:$true] %s664_s27 }
  0x2f   : > { %2390 = dma.hbm_to_vmem [thread:$0]  (!%p3159_p5), %s636_s9, 16, %s638_s7, [#allocation4]  }
  0x30   : > { %s691_s29 = sshll.u32 %s2979_s4, 4  ;;  %s746_s30 = sshll.u32 %s3498_s18, 4  ;;  %s692_s29 = int_to_ptr.vmem [resolvable:$true] %s691_s29  ;;  %s747_s30 = int_to_ptr.hbm [resolvable:$true] %s746_s30 }
  0x31   : > { %s662_s16 = sshll.u32 %s3534_s1, 4  ;;  %s2980_s1 = smov [#allocation13]   ;;  %s663_s16 = int_to_ptr.hbm [resolvable:$true] %s662_s16 }
  0x32   : > { %2396 = dma.hbm_to_vmem [thread:$0]  (!%p3159_p5), %s663_s16, 16, %s665_s27, [#allocation6]  }
  0x33   : > { %2402 = dma.hbm_to_vmem [thread:$0]  (!%p3159_p5), %s690_s10, 16, %s692_s29, [#allocation9]  }
  0x34   : > { %s718_s12 = sshll.u32 %s2980_s1, 4  ;;  %s2981_s16 = smov [#allocation16]   ;;  %s719_s12 = int_to_ptr.vmem [resolvable:$true] %s718_s12 }
  0x35   : > { %2408 = dma.hbm_to_vmem [thread:$0]  (!%p3159_p5), %s717_s8, 16, %s719_s12, [#allocation12]  }
  0x36   : > { %s748_s28 = sshll.u32 %s2981_s16, 4  ;;  %s770_s4 = sshll.u32 %s3500_s20, 4  ;;  %s749_s28 = int_to_ptr.vmem [resolvable:$true] %s748_s28  ;;  %s771_s4 = int_to_ptr.hbm [resolvable:$true] %s770_s4 }
  0x37   : > { %2414 = dma.hbm_to_vmem [thread:$0]  (!%p3159_p5), %s747_s30, 16, %s749_s28, [#allocation15]  }
  0x38   : > { %s800_s6 = sshll.u32 %s3504_s24, 4  ;;  %s2982_s5 = smov [#allocation19]   ;;  %s801_s6 = int_to_ptr.hbm [resolvable:$true] %s800_s6 }
  0x39   : > { %s772_s9 = sshll.u32 %s2982_s5, 4  ;;  %s2983_s8 = smov [#allocation22]   ;;  %s773_s9 = int_to_ptr.vmem [resolvable:$true] %s772_s9 }
  0x3a   : > { %2420 = dma.hbm_to_vmem [thread:$0]  (!%p3159_p5), %s771_s4, 16, %s773_s9, [#allocation18]  }
  0x3b   : > { %s802_s7 = sshll.u32 %s2983_s8, 4  ;;  %848 = sbr.rel (%p3145_p3) target bundleno = 3275 (0xccb), region = 120  ;;  %s803_s7 = int_to_ptr.vmem [resolvable:$true] %s802_s7 }
  0x3c   : > { %2426 = dma.hbm_to_vmem [thread:$0]  (!%p3159_p5), %s801_s6, 16, %s803_s7, [#allocation21]  }
  0x40   : > { %2940 = dma.done.wait (%p2427_p2), [#allocation4], 16  }
  0x41   : > { %2942 = vsyncadd (%p2427_p2), [#allocation4], 4294967280 }
  0x42   : > { %2944 = dma.done.wait (%p2427_p2), [#allocation6], 32  }
  0x43   : > { %2946 = vsyncadd (%p2427_p2), [#allocation6], 4294967264 }
  0x44   : > { %2948 = dma.done.wait (%p2427_p2), [#allocation9], 32  }
  0x45   : > { %2950 = vsyncadd (%p2427_p2), [#allocation9], 4294967264 }
  0x46   : > { %2952 = dma.done.wait (%p2427_p2), [#allocation12], 32  }
  0x47   : > { %2954 = vsyncadd (%p2427_p2), [#allocation12], 4294967264 }
  0x48   : > { %2956 = dma.done.wait (%p2427_p2), [#allocation15], 32  }
  0x49   : > { %2958 = vsyncadd (%p2427_p2), [#allocation15], 4294967264 }
  0x4a   : > { %2960 = dma.done.wait (%p2427_p2), [#allocation18], 32  }
  0x4b   : > { %2962 = vsyncadd (%p2427_p2), [#allocation18], 4294967264 }
  0x4c   : > { %2964 = dma.done.wait (%p2427_p2), [#allocation21], 32  }
  0x4d   : > { %2966 = vsyncadd (%p2427_p2), [#allocation21], 4294967264  ;;  %p989_p6 = scmp.lt.s32.totalorder %s3140_s3, 1  ;;  %s3535_s1 = sld [smem:[#allocation31_spill]]  ;;  %vm1043_vm0 = vcmask 261120   ;;  %v2984_v3 = vmov 32.0   ;;  %v1021_v53 = vlaneseq }
  0x4e   : > { %2505 = vrcp.f32 %v2984_v3  ;;  %s3536_s0 = sld [smem:[#allocation38_spill]]  ;;  %v2492_v26 = vld [vmem:[#allocation3] ss:$0 sm:$0xff]  ;;  %v2493_v29 = vld [vmem:[#allocation5] ss:$0 sm:$0xff]  ;;  %s2985_s10 = smov 104  }
  0x4f   : > { %s3548_s3 = smov (!%p989_p6, %s3140_s3), 1  ;;  %v2494_v33 = vld [vmem:[#allocation7] ss:$0 sm:$0xff]  ;;  %s2986_s29 = smov 120   ;;  %vm1124_vm5 = vcmask 64512   ;;  %v2992_v47 = vmov 0  }
  0x50   : > { %s3254_s26 = sshll.u32 %s3548_s3, 2  ;;  %s2987_s6 = smov 96   ;;  %2491 = vset.pattern.permute.xlu0 %v2992_v47  ;;  %v1022_v55 = vshrl.u32 %v1021_v53, 7  ;;  %v1024_v56 = vand.u32 127, %v1021_v53  ;;  %v2993_v58 = vmov -1e+30  }
  0x51   : > { %s3512_s5 = smov 72   ;;  %s2989_s9 = smov 88   ;;  %vm1161_vm10 = vcmask 1043456   ;;  %vm1179_vm11 = vcmask 60416   ;;  %vm1242_vm12 = vcmask 126016   ;;  %vm1305_vm13 = vcmask 191616  }
  0x52   : > { %s2990_s8 = smov 112   ;;  %s2991_s7 = smov 80   ;;  %vm1025_vm7 = vcmp.ge.s32.totalorder %v1022_v55, %v1024_v56  ;;  %vm1368_vm14 = vcmask 257216  }
  0x53   : > { %s992_s12 = scalar_lea.vmem %s3535_s1, %s3254_s26  ;;  %s3537_s1 = sld [smem:[#allocation33_spill]] }
  0x54   : > { %v1012_v0 = vld [vmem:[%s992_s12] sm:$0xf]  ;;  %v2506_v4 = vpop.eup %2505  ;;  %v2316_v15 = vld [vmem:[%s3536_s0 + $0x8] sm:$0xff]  ;;  %s2994_s16 = smov 64   ;;  %s2995_s28 = smov 56  }
  0x55   : > { %v3260_v1 = vunpack.c.l.bf16 %v1012_v0  ;;  %v1048_v5 = vmul.f32 32.0, %v2506_v4  ;;  %vm1052_vm1 = vweird.f32 %v2506_v4  ;;  %1111 = vmatpush.bf16.msra.mxu0 %v2316_v15  ;;  %v2315_v16 = vld [vmem:[%s3536_s0] sm:$0xff]  ;;  %s2996_s27 = smov 40   ;;  %s2997_s4 = smov 48  }
  0x56   : > { %s3511_s2 = smov 8   ;;  %s3510_s30 = smov 24  }
  0x57   : > { %v1044_v2 = vsel %vm1043_vm0, %v3260_v1, 0.0  ;;  %v1049_v6 = vsub.f32 1.0, %v1048_v5 }
  0x58   : > { %1045 = vadd.xlane.f32.xlu0 %v1044_v2 }
  0x59   : > { %v1050_v7 = vmul.f32 %v2506_v4, %v1049_v6  ;;  %1112 = vmatpush.bf16.msra.mxu0 %v2315_v16  ;;  %s999_s12 = scalar_lea.vmem %s3537_s1, %s3548_s3  ;;  %s3509_s1 = smov 16  }
  0x5a   : > { %v1015_v52 = vld [vmem:[%s999_s12] sm:$0x1] }
  0x5b   : > { %v1051_v8 = vadd.f32 %v2506_v4, %v1050_v7  ;;  %vm1016_vm6 = vcmp.gt.f32.partialorder %v1015_v52, 0.0 }
  0x5c   : > { %v1026_v54 = vsel %vm1016_vm6, 1, %v2992_v47 }
  0x5d   : > { %v3264_v9 = vsel %vm1052_vm1, %v2506_v4, %v1051_v8  ;;  %v1027_v57 = vperm.slane %v1026_v54, 0 }
  0x5f   : > { %vm1028_vm8 = vcmp.eq.s32.totalorder %v1027_v57, 1 }
  0x60   : > { %vm1029_vm9 = vmand %vm1025_vm7, %vm1028_vm8 }
  0x61   : > { %v1030_v59 = vsel %vm1029_vm9, 0.0, %v2993_v58 }
  0xcb   : > { %v1046_v10 = vpop.xlane.xlu0 %1045 }
  0xcc   : > { %v1054_v11 = vmul.f32 %v3264_v9, %v1046_v10 }
  0xce   : > { %v1055_v12 = vsub.f32 %v3260_v1, %v1054_v11 }
  0xd0   : > { %v1056_v13 = vmul.f32 %v1055_v12, %v1055_v12 }
  0xd2   : > { %v1057_v14 = vsel %vm1043_vm0, %v1056_v13, 0.0 }
  0xd3   : > { %1058 = vadd.xlane.f32.xlu0 %v1057_v14 }
 0x146   : > { %v1059_v17 = vpop.xlane.xlu0 %1058 }
 0x147   : > { %v1060_v18 = vmul.f32 %v1059_v17, %v3264_v9 }
 0x149   : > { %v1061_v19 = vadd.f32 1e-05, %v1060_v18 }
 0x14b   : > { %2507 = vrsqrt.f32 %v1061_v19  ;;  %vm1068_vm3 = vweird.f32 %v1061_v19 }
 0x151   : > { %v2508_v20 = vpop.eup %2507 }
 0x152   : > { %v1063_v21 = vmul.f32 %v2508_v20, %v1061_v19  ;;  %vm1069_vm2 = vweird.f32 %v2508_v20 }
 0x153   : > { %vm1070_vm4 = vmor %vm1068_vm3, %vm1069_vm2 }
 0x154   : > { %v1064_v22 = vmul.f32 %v2508_v20, %v1063_v21 }
 0x156   : > { %v1065_v23 = vmul.f32 0.5, %v1064_v22 }
 0x158   : > { %v1066_v24 = vsub.f32 1.5, %v1065_v23 }
 0x15a   : > { %v1067_v25 = vmul.f32 %v2508_v20, %v1066_v24 }
 0x15c   : > { %v1071_v27 = vsel %vm1070_vm4, %v2508_v20, %v1067_v25 }
 0x15d   : > { %v1072_v28 = vmul.f32 %v1071_v27, %v1055_v12 }
 0x15f   : > { %v1076_v30 = vmul.f32 %v2492_v26, %v1072_v28 }
 0x161   : > { %v1080_v31 = vadd.f32 %v2493_v29, %v1076_v30 }
 0x163   : > { %v1086_v32 = vpack.c.bf16 %v1080_v31, %v1080_v31 }
 0x165   : > { %2219 = vmatmul.msk.bf16.vlgmr.msra.gmra.mxu0 %vm1043_vm0, %v1086_v32 }
 0x1e2   : > { %v1114_v34 = vpop.f32.mrf.mxu0 }
 0x1e3   : > { %v1115_v35 = vadd.f32 %v2494_v33, %v1114_v34 }
 0x1e5   : > { %v1118_v36 = vpack.c.bf16 %v1115_v35, %v1115_v35 }
 0x1e7   : > { %v1120_v37 = vunpack.c.l.b16 %v1118_v36 }
 0x1e9   : > { %v3277_v38 = vpack.c.b16 %v1120_v37, %v1120_v37 }
 0x1ea   : > { %v1116_v39 = vpop.f32.mrf.mxu0 }
 0x1eb   : > { %1307 = vrot.lane.b32.xlu0 %v3277_v38, %s2985_s10  ;;  %1181 = vrot.lane.b32.xlu2 %v3277_v38, %s2986_s29 }
 0x1ec   : > { %1122 = vrot.lane.b32.xlu1 %v3277_v38, %s2987_s6 }
 0x1f3   : > { %1309 = vrot.lane.b32.xlu2 %v3277_v38, %s3512_s5 }
 0x1f4   : > { %1183 = vrot.lane.b32.xlu1 %v3277_v38, %s2989_s9 }
 0x1fb   : > { %1244 = vrot.lane.b32.xlu2 %v3277_v38, %s2990_s8 }
 0x1fc   : > { %1246 = vrot.lane.b32.xlu1 %v3277_v38, %s2991_s7 }
 0x245   : > { %v1182_v40 = vpop.permute.xlu2 %1181 }
 0x24d   : > { %v1310_v43 = vpop.permute.xlu2 %1309 }
 0x24e   : > { %v1315_v46 = vsel %vm1124_vm5, %v1310_v43, 0 }
 0x255   : > { %v1245_v50 = vpop.permute.xlu2 %1244 }
 0x25d   : > { %v1308_v51 = vpop.permute.xlu0 %1307 }
 0x25e   : > { %v1123_v41 = vpop.permute.xlu1 %1122 }
 0x25f   : > { %v1129_v42 = vsel %vm1124_vm5, %v1123_v41, 0 }
 0x260   : > { %1138 = vmatpush.bf16.xpose.msra.mxu3 %v1129_v42 }
 0x266   : > { %v1184_v44 = vpop.permute.xlu1 %1183 }
 0x267   : > { %2220 = vmatmul.msk.bf16.vlgmr.msra.gmra.mxu3 %vm1124_vm5, %v1118_v36  ;;  %v1189_v45 = vsel %vm1124_vm5, %v1184_v44, 0 }
 0x268   : > { %1198 = vmatpush.bf16.xpose.msrb.mxu3 %v1189_v45 }
 0x26e   : > { %v1247_v48 = vpop.permute.xlu1 %1246 }
 0x26f   : > { %v1252_v49 = vsel %vm1124_vm5, %v1247_v48, 0 }
 0x270   : > { %1324 = vmatpush.bf16.xpose.msra.mxu3 %v1315_v46  ;;  %1261 = vmatpush.bf16.xpose.msrb.mxu0 %v1252_v49 }
 0x277   : > { %2222 = vmatmul.msk.bf16.vlgmr.msrb.gmra.mxu3 %vm1124_vm5, %v1182_v40  ;;  %2224 = vmatmul.msk.bf16.vlgmr.msrb.gmra.mxu0 %vm1124_vm5, %v1245_v50 }
 0x287   : > { %2226 = vmatmul.msk.bf16.vlgmr.msra.gmra.mxu3 %vm1124_vm5, %v1308_v51 }
 0x2ea   : > { %v1140_v60 = vpop.f32.mrf.mxu3 }
 0x2eb   : > { %v1141_v61 = vadd.f32 %v1140_v60, %v1030_v59 }
 0x2ed   : > { %v1144_v62 = vsel %vm1124_vm5, %v1141_v61, -inf }
 0x2ee   : > { %1145 = vmax.xlane.f32.xlu1 %v1144_v62 }
 0x2f2   : > { %v1142_v63 = vpop.f32.mrf.mxu3 }
 0x2f4   : > { %v1263_v0 = vpop.f32.mrf.mxu0 }
 0x2f5   : > { %v1264_v6 = vadd.f32 %v1263_v0, %v1030_v59 }
 0x2f7   : > { %v1267_v8 = vsel %vm1124_vm5, %v1264_v6, -inf }
 0x2fa   : > { %v1200_v2 = vpop.f32.mrf.mxu3 }
 0x2fb   : > { %v1201_v3 = vadd.f32 %v1200_v2, %v1030_v59 }
 0x2fc   : > { %v1265_v4 = vpop.f32.mrf.mxu0 }
 0x2fd   : > { %v1204_v5 = vsel %vm1124_vm5, %v1201_v3, -inf }
 0x2fe   : > { %1205 = vmax.xlane.f32.xlu2 %v1204_v5 }
 0x302   : > { %v1202_v7 = vpop.f32.mrf.mxu3 }
 0x306   : > { %1268 = vmax.xlane.f32.xlu2 %v1267_v8 }
 0x30a   : > { %v1326_v10 = vpop.f32.mrf.mxu3 }
 0x30b   : > { %v1327_v11 = vadd.f32 %v1326_v10, %v1030_v59 }
 0x30d   : > { %v1330_v12 = vsel %vm1124_vm5, %v1327_v11, -inf }
 0x30e   : > { %1331 = vmax.xlane.f32.xlu0 %v1330_v12 }
 0x312   : > { %v1328_v13 = vpop.f32.mrf.mxu3 }
 0x31e   : > { %1156 = vrot.lane.b32.xlu2 %v3277_v38, %s2994_s16 }
 0x322   : > { %1216 = vrot.lane.b32.xlu0 %v3277_v38, %s2995_s28  ;;  %s3538_s28 = sld [smem:[#allocation40_spill]] }
 0x326   : > { %1342 = vrot.lane.b32.xlu2 %v3277_v38, %s2996_s27 }
 0x328   : > { %v2318_v10 = vld [vmem:[%s3538_s28 + $0x8] sm:$0xff] }
 0x329   : > { %1400 = vmatpush.bf16.msra.mxu0 %v2318_v10 }
 0x32a   : > { %1279 = vrot.lane.b32.xlu0 %v3277_v38, %s2997_s4  ;;  %s3540_s4 = sld [smem:[#allocation35_spill]] }
 0x361   : > { %v1146_v14 = vpop.xlane.xlu1 %1145 }
 0x362   : > { %v1147_v15 = vsub.f32 %v1141_v61, %v1146_v14 }
 0x364   : > { %v1148_v16 = vmul.f32 1.442695, %v1147_v15 }
 0x366   : > { %2509 = vpow2.f32 %v1148_v16  ;;  %v2495_v16 = vld [vmem:[#allocation8] ss:$0 sm:$0xff] }
 0x36c   : > { %v2510_v17 = vpop.eup %2509 }
 0x36d   : > { %v1150_v18 = vsel %vm1124_vm5, %v2510_v17, 0.0 }
 0x36e   : > { %1151 = vadd.xlane.f32.xlu1 %v1150_v18 }
 0x371   : > { %v1206_v19 = vpop.xlane.xlu2 %1205 }
 0x372   : > { %v1207_v20 = vsub.f32 %v1201_v3, %v1206_v19 }
 0x374   : > { %v1208_v21 = vmul.f32 1.442695, %v1207_v20 }
 0x376   : > { %2511 = vpow2.f32 %v1208_v21 }
 0x379   : > { %v1269_v22 = vpop.xlane.xlu2 %1268 }
 0x37a   : > { %v1270_v29 = vsub.f32 %v1264_v6, %v1269_v22  ;;  %v2322_v22 = vld [vmem:[%s3495_s15 + $0x8] sm:$0xff] }
 0x37b   : > { %1506 = vmatpush.bf16.msrb.mxu3 %v2322_v22 }
 0x37c   : > { %v2512_v23 = vpop.eup %2511  ;;  %v1271_v31 = vmul.f32 1.442695, %v1270_v29  ;;  %v2320_v29 = vld [vmem:[%s3493_s13 + $0x8] sm:$0xff] }
 0x37d   : > { %v1210_v24 = vsel %vm1124_vm5, %v2512_v23, 0.0 }
 0x37e   : > { %1211 = vadd.xlane.f32.xlu1 %v1210_v24 }
 0x381   : > { %v1332_v25 = vpop.xlane.xlu0 %1331  ;;  %v1157_v26 = vpop.permute.xlu2 %1156 }
 0x382   : > { %v1333_v27 = vsub.f32 %v1327_v11, %v1332_v25  ;;  %v1163_v28 = vsel %vm1161_vm10, %v1157_v26, 0  ;;  %v2317_v11 = vld [vmem:[%s3538_s28] sm:$0xff] }
 0x383   : > { %1172 = vmatpush.bf16.msra.mxu2 %v1163_v28  ;;  %1401 = vmatpush.bf16.msra.mxu0 %v2317_v11 }
 0x384   : > { %v1334_v30 = vmul.f32 1.442695, %v1333_v27 }
 0x386   : > { %2513 = vpow2.f32 %v1334_v30  ;;  %v2319_v30 = vld [vmem:[%s3493_s13] sm:$0xff] }
 0x387   : > { %2515 = vpow2.f32 %v1271_v31  ;;  %v2498_v31 = vld [vmem:[#allocation14] ss:$0 sm:$0xff] }
 0x389   : > { %v1343_v43 = vpop.permute.xlu2 %1342 }
 0x38a   : > { %v1348_v45 = vsel %vm1161_vm10, %v1343_v43, 0 }
 0x38c   : > { %v2514_v32 = vpop.eup %2513 }
 0x38d   : > { %v1336_v33 = vsel %vm1124_vm5, %v2514_v32, 0.0  ;;  %v2516_v34 = vpop.eup %2515 }
 0x38e   : > { %1337 = vadd.xlane.f32.xlu1 %v1336_v33  ;;  %v1273_v37 = vsel %vm1124_vm5, %v2516_v34, 0.0 }
 0x394   : > { %v1217_v35 = vpop.permute.xlu0 %1216 }
 0x395   : > { %v1222_v36 = vsel %vm1161_vm10, %v1217_v35, 0 }
 0x396   : > { %1231 = vmatpush.bf16.msrb.mxu2 %v1222_v36  ;;  %1274 = vadd.xlane.f32.xlu1 %v1273_v37 }
 0x39c   : > { %v1280_v38 = vpop.permute.xlu0 %1279 }
 0x39d   : > { %v1285_v39 = vsel %vm1161_vm10, %v1280_v38, 0 }
 0x39e   : > { %1294 = vmatpush.bf16.msra.mxu1 %v1285_v39 }
 0x3a2   : > { %1470 = vmatpush.bf16.msrb.mxu1 %v2320_v29 }
 0x3a6   : > { %1471 = vmatpush.bf16.msrb.mxu1 %v2319_v30 }
 0x3e1   : > { %v1152_v40 = vpop.xlane.xlu1 %1151 }
 0x3e2   : > { %2517 = vrcp.f32 %v1152_v40 }
 0x3e8   : > { %v2518_v41 = vpop.eup %2517 }
 0x3e9   : > { %v1154_v42 = vmul.f32 %v2518_v41, %v2510_v17 }
 0x3eb   : > { %v1155_v44 = vpack.c.bf16 %v1154_v42, %v1154_v42 }
 0x3ed   : > { %2221 = vmatmul.msk.bf16.vlgmr.msra.gmra.mxu2 %vm1124_vm5, %v1155_v44 }
 0x3ee   : > { %1357 = vmatpush.bf16.msra.mxu2 %v1348_v45 }
 0x3f1   : > { %v1212_v46 = vpop.xlane.xlu1 %1211 }
 0x3f2   : > { %2519 = vrcp.f32 %v1212_v46 }
 0x3f8   : > { %v2520_v48 = vpop.eup %2519 }
 0x3f9   : > { %v1214_v49 = vmul.f32 %v2520_v48, %v2512_v23  ;;  %v2321_v23 = vld [vmem:[%s3495_s15] sm:$0xff] }
 0x3fa   : > { %1507 = vmatpush.bf16.msrb.mxu3 %v2321_v23 }
 0x3fb   : > { %v1215_v50 = vpack.c.bf16 %v1214_v49, %v1214_v49  ;;  %v2496_v49 = vld [vmem:[#allocation10] ss:$0 sm:$0xff] }
 0x3fd   : > { %2223 = vmatmul.msk.bf16.vlgmr.msrb.gmra.mxu2 %vm1124_vm5, %v1215_v50 }
 0x401   : > { %v1338_v51 = vpop.xlane.xlu1 %1337 }
 0x402   : > { %2521 = vrcp.f32 %v1338_v51 }
 0x408   : > { %v2522_v52 = vpop.eup %2521 }
 0x409   : > { %v1340_v53 = vmul.f32 %v2522_v52, %v2514_v32  ;;  %v1275_v54 = vpop.xlane.xlu1 %1274  ;;  %v2497_v52 = vld [vmem:[#allocation11] ss:$0 sm:$0xff] }
 0x40a   : > { %2523 = vrcp.f32 %v1275_v54 }
 0x40b   : > { %v1341_v55 = vpack.c.bf16 %v1340_v53, %v1340_v53 }
 0x40d   : > { %2227 = vmatmul.msk.bf16.vlgmr.msra.gmra.mxu2 %vm1124_vm5, %v1341_v55 }
 0x410   : > { %v2524_v56 = vpop.eup %2523 }
 0x411   : > { %v1277_v57 = vmul.f32 %v2524_v56, %v2516_v34 }
 0x413   : > { %v1278_v59 = vpack.c.bf16 %v1277_v57, %v1277_v57 }
 0x415   : > { %2225 = vmatmul.msk.bf16.vlgmr.msra.gmra.mxu1 %vm1124_vm5, %v1278_v59 }
 0x470   : > { %v1174_v60 = vpop.f32.mrf.mxu2 }
 0x471   : > { %v1178_v61 = vpack.c.bf16 %v1174_v60, %v1174_v60 }
 0x473   : > { %1180 = vst.msk [vmem:[#allocation2] sm:$0xf] %vm1179_vm11, %v1178_v61  ;;  %v2499_v61 = vld [vmem:[#allocation13] ss:$0 sm:$0xff] }
 0x478   : > { %v1176_v62 = vpop.f32.mrf.mxu2 }
 0x480   : > { %v1233_v63 = vpop.f32.mrf.mxu2 }
 0x481   : > { %v1237_v0 = vpack.c.bf16 %v1233_v63, %v1233_v63 }
 0x483   : > { %1239 = vrot.lane.b32.xlu1 %v1237_v0, %s3511_s2  ;;  %s3539_s2 = sld [smem:[#allocation32_spill]] }
 0x488   : > { %v1235_v2 = vpop.f32.mrf.mxu2 }
 0x489   : > { %s996_s5 = scalar_lea.vmem %s3539_s2, %s3254_s26  ;;  %s3541_s2 = sld [smem:[#allocation34_spill]] }
 0x490   : > { %v1359_v3 = vpop.f32.mrf.mxu2 }
 0x491   : > { %v1363_v4 = vpack.c.bf16 %v1359_v3, %v1359_v3 }
 0x492   : > { %v1296_v5 = vpop.f32.mrf.mxu1 }
 0x493   : > { %v1300_v6 = vpack.c.bf16 %v1296_v5, %v1296_v5  ;;  %1365 = vrot.lane.b32.xlu0 %v1363_v4, %s3510_s30 }
 0x495   : > { %1302 = vrot.lane.b32.xlu2 %v1300_v6, %s3509_s1 }
 0x498   : > { %v1361_v7 = vpop.f32.mrf.mxu2 }
 0x49a   : > { %v1298_v8 = vpop.f32.mrf.mxu1 }
 0x4ef   : > { %v1303_v13 = vpop.permute.xlu2 %1302 }
 0x4f5   : > { %v1240_v12 = vpop.permute.xlu1 %1239 }
 0x4f6   : > { %1243 = vst.msk [vmem:[#allocation2] sm:$0xf] %vm1242_vm12, %v1240_v12 }
 0x4f7   : > { %1306 = vst.msk [vmem:[#allocation2] sm:$0xf] %vm1305_vm13, %v1303_v13 }
 0x505   : > { %v1366_v14 = vpop.permute.xlu0 %1365 }
 0x506   : > { %1369 = vst.msk [vmem:[#allocation2] sm:$0xf] %vm1368_vm14, %v1366_v14 }
 0x50d   : > { %v1370_v15 = vld [vmem:[#allocation2] sm:$0xf] }
 0x50e   : > { %2236 = vmatmul.msk.bf16.vlgmr.msra.gmra.mxu0 %vm1043_vm0, %v1370_v15 }
 0x58b   : > { %v1403_v17 = vpop.f32.mrf.mxu0 }
 0x58c   : > { %v1404_v18 = vadd.f32 %v2495_v16, %v1403_v17 }
 0x58e   : > { %v3343_v19 = vadd.f32 %v1404_v18, %v3260_v1  ;;  %v1014_v1 = vld [vmem:[%s996_s5] sm:$0xf]  ;;  %s2209_s5 = sshll.u32 %s3548_s3, 3 }
 0x58f   : > { %2254 = vmatmul.msk.bf16.vlgmr.msrb.gmra.mxu3 %vm1043_vm0, %v1014_v1  ;;  %s1006_s12 = scalar_lea.vmem %s3540_s4, %s2209_s5  ;;  %s1002_s5 = scalar_lea.vmem %s3541_s2, %s3548_s3 }
 0x590   : > { %v1410_v20 = vsel %vm1043_vm0, %v3343_v19, 0.0  ;;  %v1019_v56 = vld [vmem:[%s1006_s12] sm:$0xff]  ;;  %s3542_s3 = smov 72  }
 0x591   : > { %1411 = vadd.xlane.f32.xlu2 %v1410_v20  ;;  %vm1020_vm3 = vcmp.gt.f32.partialorder %v1019_v56, 0.0  ;;  %v1017_v8 = vld [vmem:[%s1002_s5] sm:$0x1] }
 0x592   : > { %v1034_v57 = vsel %vm1020_vm3, 1, %v2992_v47  ;;  %vm1018_vm4 = vcmp.gt.f32.partialorder %v1017_v8, 0.0 }
 0x593   : > { %v1405_v21 = vpop.f32.mrf.mxu0  ;;  %v1031_v10 = vsel %vm1018_vm4, 1, %v2992_v47 }
 0x594   : > { %v1032_v12 = vperm.slane %v1031_v10, 0 }
 0x596   : > { %vm1033_vm6 = vcmp.eq.s32.totalorder %v1032_v12, 1 }
 0x604   : > { %v1412_v24 = vpop.xlane.xlu2 %1411 }
 0x605   : > { %v1413_v25 = vmul.f32 %v1412_v24, %v3264_v9 }
 0x607   : > { %v1414_v26 = vsub.f32 %v3343_v19, %v1413_v25 }
 0x609   : > { %v1415_v27 = vmul.f32 %v1414_v26, %v1414_v26 }
 0x60b   : > { %v1416_v28 = vsel %vm1043_vm0, %v1415_v27, 0.0 }
 0x60c   : > { %1417 = vadd.xlane.f32.xlu0 %v1416_v28 }
 0x612   : > { %v1509_v32 = vpop.f32.mrf.mxu3 }
 0x613   : > { %v1510_v35 = vadd.f32 %v2498_v31, %v1509_v32 }
 0x615   : > { %v1514_v37 = vpack.c.bf16 %v1510_v35, %v1510_v35 }
 0x617   : > { %v1519_v38 = vsel %vm1124_vm5, %v1514_v37, 0  ;;  %v1547_v39 = vunpack.c.l.b16 %v1514_v37 }
 0x618   : > { %1528 = vmatpush.bf16.xpose.msrb.mxu2 %v1519_v38 }
 0x619   : > { %v3369_v40 = vpack.c.b16 %v1547_v39, %v1547_v39 }
 0x61a   : > { %v1511_v41 = vpop.f32.mrf.mxu3 }
 0x61b   : > { %1577 = vrot.lane.b32.xlu1 %v3369_v40, %s2986_s29 }
 0x620   : > { %1036 = vperm.xlu0 %2491, %v1034_v57  }
 0x623   : > { %1639 = vrot.lane.b32.xlu1 %v3369_v40, %s2990_s8 }
 0x67f   : > { %v1418_v33 = vpop.xlane.xlu0 %1417 }
 0x680   : > { %v1419_v34 = vmul.f32 %v1418_v33, %v3264_v9 }
 0x682   : > { %v1420_v36 = vadd.f32 1e-05, %v1419_v34 }
 0x684   : > { %2525 = vrsqrt.f32 %v1420_v36  ;;  %vm1427_vm1 = vweird.f32 %v1420_v36 }
 0x68a   : > { %v2526_v42 = vpop.eup %2525 }
 0x68b   : > { %v1422_v43 = vmul.f32 %v2526_v42, %v1420_v36  ;;  %vm1428_vm15 = vweird.f32 %v2526_v42 }
 0x68c   : > { %vm1429_vm2 = vmor %vm1427_vm1, %vm1428_vm15 }
 0x68d   : > { %v1423_v44 = vmul.f32 %v2526_v42, %v1422_v43  ;;  %v1578_v59 = vpop.permute.xlu1 %1577 }
 0x68e   : > { %v1583_v60 = vsel %vm1124_vm5, %v1578_v59, 0 }
 0x68f   : > { %v1424_v45 = vmul.f32 0.5, %v1423_v44  ;;  %1592 = vmatpush.bf16.xpose.msra.mxu1 %v1583_v60 }
 0x691   : > { %v1425_v46 = vsub.f32 1.5, %v1424_v45 }
 0x692   : > { %v1037_v13 = vpop.permute.xlu0 %1036 }
 0x693   : > { %v1426_v48 = vmul.f32 %v2526_v42, %v1425_v46  ;;  %vm1038_vm7 = vcmp.eq.s32.totalorder %v1037_v13, 1 }
 0x694   : > { %vm1039_vm8 = vmand %vm1033_vm6, %vm1038_vm7 }
 0x695   : > { %v1430_v50 = vsel %vm1429_vm2, %v2526_v42, %v1426_v48  ;;  %v1640_v0 = vpop.permute.xlu1 %1639  ;;  %v1040_v16 = vsel %vm1039_vm8, 0.0, %v2993_v58 }
 0x696   : > { %v1431_v51 = vmul.f32 %v1430_v50, %v1414_v26  ;;  %v1645_v2 = vsel %vm1124_vm5, %v1640_v0, 0 }
 0x697   : > { %1654 = vmatpush.bf16.xpose.msra.mxu2 %v1645_v2 }
 0x698   : > { %v1435_v53 = vmul.f32 %v2496_v49, %v1431_v51 }
 0x69a   : > { %v1439_v54 = vadd.f32 %v2497_v52, %v1435_v53 }
 0x69c   : > { %v1445_v55 = vpack.c.bf16 %v1439_v54, %v1439_v54 }
 0x69e   : > { %2245 = vmatmul.msk.bf16.vlgmr.msrb.gmra.mxu1 %vm1043_vm0, %v1445_v55 }
 0x71b   : > { %v1473_v62 = vpop.f32.mrf.mxu1 }
 0x71c   : > { %v1474_v63 = vadd.f32 %v2499_v61, %v1473_v62 }
 0x71e   : > { %v1513_v3 = vpack.c.bf16 %v1474_v63, %v1474_v63 }
 0x720   : > { %v1573_v4 = vunpack.c.l.b16 %v1513_v3  ;;  %2255 = vmatmul.msk.bf16.vlgmr.msrb.gmra.mxu2 %vm1124_vm5, %v1513_v3 }
 0x722   : > { %v1574_v5 = vpack.c.b16 %v1573_v4, %v1573_v4 }
 0x723   : > { %v1475_v6 = vpop.f32.mrf.mxu1 }
 0x724   : > { %1637 = vrot.lane.b32.xlu2 %v1574_v5, %s2990_s8  ;;  %1575 = vrot.lane.b32.xlu1 %v1574_v5, %s2986_s29  ;;  %s3544_s29 = smov 24  }
 0x72c   : > { %1701 = vrot.lane.b32.xlu1 %v3369_v40, %s2985_s10 }
 0x734   : > { %1699 = vrot.lane.b32.xlu1 %v1574_v5, %s2985_s10  ;;  %s3543_s10 = smov 8  }
 0x77e   : > { %v1638_v7 = vpop.permute.xlu2 %1637 }
 0x77f   : > { %2259 = vmatmul.msk.bf16.vlgmr.msra.gmra.mxu2 %vm1124_vm5, %v1638_v7 }
 0x796   : > { %v1576_v11 = vpop.permute.xlu1 %1575 }
 0x797   : > { %2257 = vmatmul.msk.bf16.vlgmr.msra.gmra.mxu1 %vm1124_vm5, %v1576_v11 }
 0x79e   : > { %v1702_v14 = vpop.permute.xlu1 %1701 }
 0x79f   : > { %v1707_v15 = vsel %vm1124_vm5, %v1702_v14, 0 }
 0x7a0   : > { %1716 = vmatpush.bf16.xpose.msrb.mxu1 %v1707_v15 }
 0x7a3   : > { %v1530_v17 = vpop.f32.mrf.mxu2 }
 0x7a4   : > { %v1531_v18 = vadd.f32 %v1530_v17, %v1040_v16 }
 0x7a6   : > { %v1700_v20 = vpop.permute.xlu1 %1699  ;;  %v1534_v21 = vsel %vm1124_vm5, %v1531_v18, -inf }
 0x7a7   : > { %1535 = vmax.xlane.f32.xlu2 %v1534_v21  ;;  %2261 = vmatmul.msk.bf16.vlgmr.msrb.gmra.mxu1 %vm1124_vm5, %v1700_v20 }
 0x7ab   : > { %v1532_v47 = vpop.f32.mrf.mxu2 }
 0x802   : > { %v1656_v22 = vpop.f32.mrf.mxu2 }
 0x803   : > { %v1657_v27 = vadd.f32 %v1656_v22, %v1040_v16 }
 0x805   : > { %v1660_v30 = vsel %vm1124_vm5, %v1657_v27, -inf }
 0x80a   : > { %v1658_v23 = vpop.f32.mrf.mxu2 }
 0x814   : > { %v1594_v1 = vpop.f32.mrf.mxu1 }
 0x815   : > { %v1595_v24 = vadd.f32 %v1594_v1, %v1040_v16 }
 0x817   : > { %v1598_v25 = vsel %vm1124_vm5, %v1595_v24, -inf }
 0x818   : > { %1599 = vmax.xlane.f32.xlu1 %v1598_v25 }
 0x81a   : > { %v1536_v26 = vpop.xlane.xlu2 %1535 }
 0x81b   : > { %v1537_v28 = vsub.f32 %v1531_v18, %v1536_v26 }
 0x81c   : > { %v1596_v58 = vpop.f32.mrf.mxu1 }
 0x81d   : > { %v1538_v29 = vmul.f32 1.442695, %v1537_v28  ;;  %v2323_v28 = vld [vmem:[%s3497_s17] sm:$0xff] }
 0x81f   : > { %2527 = vpow2.f32 %v1538_v29 }
 0x820   : > { %1661 = vmax.xlane.f32.xlu1 %v1660_v30 }
 0x824   : > { %v1718_v31 = vpop.f32.mrf.mxu1 }
 0x825   : > { %v2528_v32 = vpop.eup %2527  ;;  %v1719_v33 = vadd.f32 %v1718_v31, %v1040_v16 }
 0x826   : > { %v1540_v34 = vsel %vm1124_vm5, %v2528_v32, 0.0 }
 0x827   : > { %1541 = vadd.xlane.f32.xlu2 %v1540_v34  ;;  %v1722_v35 = vsel %vm1124_vm5, %v1719_v33, -inf }
 0x828   : > { %1723 = vmax.xlane.f32.xlu0 %v1722_v35 }
 0x82c   : > { %v1720_v36 = vpop.f32.mrf.mxu1 }
 0x839   : > { %1610 = vrot.lane.b32.xlu1 %v3369_v40, %s2989_s9 }
 0x83f   : > { %1549 = vrot.lane.b32.xlu2 %v3369_v40, %s2987_s6  ;;  %s3545_s6 = smov 16  }
 0x847   : > { %1672 = vrot.lane.b32.xlu2 %v3369_v40, %s2991_s7 }
 0x88b   : > { %v1600_v37 = vpop.xlane.xlu1 %1599 }
 0x88c   : > { %v1601_v38 = vsub.f32 %v1595_v24, %v1600_v37 }
 0x88e   : > { %v1602_v39 = vmul.f32 1.442695, %v1601_v38 }
 0x890   : > { %2529 = vpow2.f32 %v1602_v39 }
 0x893   : > { %v1662_v44 = vpop.xlane.xlu1 %1661 }
 0x894   : > { %v1663_v48 = vsub.f32 %v1657_v27, %v1662_v44  ;;  %v2324_v27 = vld [vmem:[%s3497_s17 + $0x8] sm:$0xff] }
 0x895   : > { %1791 = vmatpush.bf16.msrb.mxu2 %v2324_v27  ;;  %v2326_v44 = vld [vmem:[%s3501_s21 + $0x8] sm:$0xff] }
 0x896   : > { %v2530_v41 = vpop.eup %2529  ;;  %v1664_v51 = vmul.f32 1.442695, %v1663_v48 }
 0x897   : > { %v1604_v42 = vsel %vm1124_vm5, %v2530_v41, 0.0 }
 0x898   : > { %1605 = vadd.xlane.f32.xlu1 %v1604_v42 }
 0x899   : > { %1792 = vmatpush.bf16.msrb.mxu2 %v2323_v28 }
 0x89a   : > { %v1542_v43 = vpop.xlane.xlu2 %1541 }
 0x89b   : > { %2531 = vrcp.f32 %v1542_v43  ;;  %v1724_v45 = vpop.xlane.xlu0 %1723 }
 0x89c   : > { %v1725_v46 = vsub.f32 %v1719_v33, %v1724_v45  ;;  %v2334_v45 = vld [vmem:[%s3503_s23 + $0x38] sm:$0xff] }
 0x89d   : > { %1938 = vmatpush.bf16.msra.mxu1 %v2334_v45 }
 0x89e   : > { %v1726_v49 = vmul.f32 1.442695, %v1725_v46 }
 0x8a0   : > { %2533 = vpow2.f32 %v1726_v49  ;;  %v2333_v49 = vld [vmem:[%s3503_s23 + $0x30] sm:$0xff] }
 0x8a1   : > { %v2532_v50 = vpop.eup %2531  ;;  %2535 = vpow2.f32 %v1664_v51  ;;  %1939 = vmatpush.bf16.msra.mxu1 %v2333_v49  ;;  %v2332_v51 = vld [vmem:[%s3503_s23 + $0x28] sm:$0xff] }
 0x8a2   : > { %v1544_v52 = vmul.f32 %v2532_v50, %v2528_v32  ;;  %v1550_v53 = vpop.permute.xlu2 %1549  ;;  %v2500_v32 = vld [vmem:[#allocation16] ss:$0 sm:$0xff] }
 0x8a3   : > { %v1555_v54 = vsel %vm1161_vm10, %v1550_v53, 0 }
 0x8a4   : > { %v1545_v55 = vpack.c.bf16 %v1544_v52, %v1544_v52  ;;  %1564 = vmatpush.bf16.msrb.mxu0 %v1555_v54  ;;  %v2331_v52 = vld [vmem:[%s3503_s23 + $0x20] sm:$0xff] }
 0x8a5   : > { %1940 = vmatpush.bf16.msra.mxu1 %v2332_v51 }
 0x8a6   : > { %v2534_v56 = vpop.eup %2533 }
 0x8a7   : > { %2256 = vmatmul.msk.bf16.vlgmr.msrb.gmra.mxu0 %vm1124_vm5, %v1545_v55  ;;  %v1728_v57 = vsel %vm1124_vm5, %v2534_v56, 0.0  ;;  %v2536_v62 = vpop.eup %2535 }
 0x8a8   : > { %1729 = vadd.xlane.f32.xlu0 %v1728_v57  ;;  %v1666_v0 = vsel %vm1124_vm5, %v2536_v62, 0.0  ;;  %v2329_v57 = vld [vmem:[%s3503_s23 + $0x10] sm:$0xff] }
 0x8a9   : > { %1941 = vmatpush.bf16.msra.mxu1 %v2331_v52 }
 0x8aa   : > { %v1673_v59 = vpop.permute.xlu2 %1672 }
 0x8ab   : > { %v1678_v60 = vsel %vm1161_vm10, %v1673_v59, 0  ;;  %v1611_v61 = vpop.permute.xlu1 %1610 }
 0x8ac   : > { %v1616_v63 = vsel %vm1161_vm10, %v1611_v61, 0  ;;  %1687 = vmatpush.bf16.msra.mxu0 %v1678_v60  ;;  %v2501_v61 = vld [vmem:[#allocation17] ss:$0 sm:$0xff] }
 0x8ad   : > { %1625 = vmatpush.bf16.msra.mxu3 %v1616_v63 }
 0x8b0   : > { %1667 = vadd.xlane.f32.xlu0 %v1666_v0  ;;  %1861 = vmatpush.bf16.msrb.mxu0 %v2326_v44  ;;  %v2502_v0 = vld [vmem:[#allocation19] ss:$0 sm:$0xff] }
 0x8b1   : > { %1734 = vrot.lane.b32.xlu1 %v3369_v40, %s3542_s3  ;;  %s1010_s3 = scalar_lea.vmem %s3505_s25, %s3254_s26 }
 0x90b   : > { %v1606_v2 = vpop.xlane.xlu1 %1605 }
 0x90c   : > { %2537 = vrcp.f32 %v1606_v2 }
 0x912   : > { %v2538_v3 = vpop.eup %2537 }
 0x913   : > { %v1608_v4 = vmul.f32 %v2538_v3, %v2530_v41 }
 0x915   : > { %v1609_v5 = vpack.c.bf16 %v1608_v4, %v1608_v4 }
 0x917   : > { %2258 = vmatmul.msk.bf16.vlgmr.msra.gmra.mxu3 %vm1124_vm5, %v1609_v5  ;;  %v2328_v5 = vld [vmem:[%s3503_s23 + $0x8] sm:$0xff] }
 0x91b   : > { %v1730_v6 = vpop.xlane.xlu0 %1729 }
 0x91c   : > { %2539 = vrcp.f32 %v1730_v6  ;;  %v2327_v6 = vld [vmem:[%s3503_s23] sm:$0xff] }
 0x922   : > { %v2540_v7 = vpop.eup %2539 }
 0x923   : > { %v1732_v8 = vmul.f32 %v2540_v7, %v2534_v56  ;;  %v1668_v10 = vpop.xlane.xlu0 %1667  ;;  %v1735_v11 = vpop.permute.xlu1 %1734  ;;  %v2503_v7 = vld [vmem:[#allocation20] ss:$0 sm:$0xff] }
 0x924   : > { %2541 = vrcp.f32 %v1668_v10  ;;  %v1740_v12 = vsel %vm1161_vm10, %v1735_v11, 0  ;;  %v1566_v13 = vpop.f32.mrf.mxu0 }
 0x925   : > { %v1733_v14 = vpack.c.bf16 %v1732_v8, %v1732_v8  ;;  %v1570_v15 = vpack.c.bf16 %v1566_v13, %v1566_v13  ;;  %1749 = vmatpush.bf16.msrb.mxu3 %v1740_v12 }
 0x927   : > { %1571 = vst.msk [vmem:[#allocation2] sm:$0xf] %vm1179_vm11, %v1570_v15 }
 0x928   : > { %2262 = vmatmul.msk.bf16.vlgmr.msrb.gmra.mxu3 %vm1124_vm5, %v1733_v14  ;;  %v2504_v14 = vld [vmem:[#allocation22] ss:$0 sm:$0xff] }
 0x92a   : > { %v2542_v40 = vpop.eup %2541 }
 0x92b   : > { %v1670_v16 = vmul.f32 %v2542_v40, %v2536_v62 }
 0x92c   : > { %v1568_v17 = vpop.f32.mrf.mxu0 }
 0x92d   : > { %v1671_v18 = vpack.c.bf16 %v1670_v16, %v1670_v16 }
 0x92f   : > { %2260 = vmatmul.msk.bf16.vlgmr.msra.gmra.mxu0 %vm1124_vm5, %v1671_v18 }
 0x99a   : > { %v1627_v20 = vpop.f32.mrf.mxu3 }
 0x99b   : > { %v1631_v21 = vpack.c.bf16 %v1627_v20, %v1627_v20 }
 0x99d   : > { %1633 = vrot.lane.b32.xlu0 %v1631_v21, %s3543_s10 }
 0x9a2   : > { %v1629_v47 = vpop.f32.mrf.mxu3 }
 0x9ab   : > { %v1751_v22 = vpop.f32.mrf.mxu3 }
 0x9ac   : > { %v1755_v23 = vpack.c.bf16 %v1751_v22, %v1751_v22  ;;  %v1689_v1 = vpop.f32.mrf.mxu0 }
 0x9ad   : > { %v1693_v24 = vpack.c.bf16 %v1689_v1, %v1689_v1 }
 0x9ae   : > { %1757 = vrot.lane.b32.xlu2 %v1755_v23, %s3544_s29 }
 0x9af   : > { %1695 = vrot.lane.b32.xlu1 %v1693_v24, %s3545_s6 }
 0x9b3   : > { %v1753_v25 = vpop.f32.mrf.mxu3 }
 0x9b4   : > { %v1691_v26 = vpop.f32.mrf.mxu0 }
 0xa08   : > { %v1758_v30 = vpop.permute.xlu2 %1757 }
 0xa0f   : > { %v1634_v58 = vpop.permute.xlu0 %1633 }
 0xa10   : > { %1636 = vst.msk [vmem:[#allocation2] sm:$0xf] %vm1242_vm12, %v1634_v58 }
 0xa21   : > { %v1696_v29 = vpop.permute.xlu1 %1695 }
 0xa22   : > { %1698 = vst.msk [vmem:[#allocation2] sm:$0xf] %vm1305_vm13, %v1696_v29 }
 0xa23   : > { %1760 = vst.msk [vmem:[#allocation2] sm:$0xf] %vm1368_vm14, %v1758_v30 }
 0xa2a   : > { %v1761_v31 = vld [vmem:[#allocation2] sm:$0xf] }
 0xa2b   : > { %2271 = vmatmul.msk.bf16.vlgmr.msrb.gmra.mxu2 %vm1043_vm0, %v1761_v31 }
 0xaae   : > { %v1794_v33 = vpop.f32.mrf.mxu2 }
 0xaaf   : > { %v1795_v34 = vadd.f32 %v2500_v32, %v1794_v33 }
 0xab1   : > { %v1798_v35 = vadd.f32 %v1795_v34, %v3343_v19  ;;  %v2325_v19 = vld [vmem:[%s3501_s21] sm:$0xff] }
 0xab2   : > { %1862 = vmatpush.bf16.msrb.mxu0 %v2325_v19 }
 0xab3   : > { %v1801_v36 = vsel %vm1043_vm0, %v1798_v35, 0.0 }
 0xab4   : > { %1802 = vadd.xlane.f32.xlu1 %v1801_v36 }
 0xab6   : > { %v1796_v37 = vpop.f32.mrf.mxu2 }
 0xb27   : > { %v1803_v38 = vpop.xlane.xlu1 %1802 }
 0xb28   : > { %v1804_v39 = vmul.f32 %v1803_v38, %v3264_v9 }
 0xb2a   : > { %v1805_v41 = vsub.f32 %v1798_v35, %v1804_v39 }
 0xb2c   : > { %v1806_v42 = vmul.f32 %v1805_v41, %v1805_v41 }
 0xb2e   : > { %v1807_v43 = vsel %vm1043_vm0, %v1806_v42, 0.0 }
 0xb2f   : > { %1808 = vadd.xlane.f32.xlu2 %v1807_v43 }
 0xba2   : > { %v1809_v46 = vpop.xlane.xlu2 %1808 }
 0xba3   : > { %v1810_v48 = vmul.f32 %v1809_v46, %v3264_v9  ;;  %v2330_v9 = vld [vmem:[%s3503_s23 + $0x18] sm:$0xff] }
 0xba4   : > { %1942 = vmatpush.bf16.msra.mxu1 %v2330_v9 }
 0xba5   : > { %v1811_v50 = vadd.f32 1e-05, %v1810_v48 }
 0xba7   : > { %2543 = vrsqrt.f32 %v1811_v50  ;;  %vm1818_vm9 = vweird.f32 %v1811_v50 }
 0xba8   : > { %1943 = vmatpush.bf16.msra.mxu1 %v2329_v57 }
 0xbac   : > { %1944 = vmatpush.bf16.msra.mxu1 %v2328_v5 }
 0xbad   : > { %v2544_v53 = vpop.eup %2543 }
 0xbae   : > { %v1813_v54 = vmul.f32 %v2544_v53, %v1811_v50  ;;  %vm1819_vm5 = vweird.f32 %v2544_v53 }
 0xbaf   : > { %vm1820_vm10 = vmor %vm1818_vm9, %vm1819_vm5 }
 0xbb0   : > { %v1814_v55 = vmul.f32 %v2544_v53, %v1813_v54  ;;  %1945 = vmatpush.bf16.msra.mxu1 %v2327_v6 }
 0xbb2   : > { %v1815_v56 = vmul.f32 0.5, %v1814_v55 }
 0xbb4   : > { %v1816_v59 = vsub.f32 1.5, %v1815_v56 }
 0xbb6   : > { %v1817_v60 = vmul.f32 %v2544_v53, %v1816_v59 }
 0xbb8   : > { %v1821_v62 = vsel %vm1820_vm10, %v2544_v53, %v1817_v60 }
 0xbb9   : > { %v1822_v63 = vmul.f32 %v1821_v62, %v1805_v41 }
 0xbbb   : > { %v1826_v2 = vmul.f32 %v2501_v61, %v1822_v63 }
 0xbbd   : > { %v1830_v3 = vadd.f32 %v2502_v0, %v1826_v2 }
 0xbbf   : > { %v1836_v4 = vpack.c.bf16 %v1830_v3, %v1830_v3 }
 0xbc1   : > { %2280 = vmatmul.msk.bf16.vlgmr.msrb.gmra.mxu0 %vm1043_vm0, %v1836_v4  ;;  %vm1953_vm0 = vcmask 257024  }
 0xc3e   : > { %v1864_v8 = vpop.f32.mrf.mxu0 }
 0xc3f   : > { %v1865_v10 = vadd.f32 %v2503_v7, %v1864_v8 }
 0xc41   : > { %v1868_v11 = vmax.f32 %v1865_v10, 0.0 }
 0xc43   : > { %v1886_v12 = vpack.c.bf16 %v1868_v11, %v1868_v11 }
 0xc45   : > { %1946 = vmatmul.bf16.vlgmr.msra.gmra.mxu1 %v1886_v12 }
 0xc46   : > { %v1866_v13 = vpop.f32.mrf.mxu0 }
 0xcc2   : > { %v1947_v15 = vpop.f32.mrf.mxu1 }
 0xcc3   : > { %v1948_v40 = vadd.f32 %v2504_v14, %v1947_v15 }
 0xcc5   : > { %v1951_v16 = vadd.f32 %v1948_v40, %v1798_v35 }
 0xcc7   : > { %v1952_v17 = vpack.c.bf16 %v1951_v16, %v1951_v16 }
 0xcc9   : > { %1954 = vst.msk [vmem:[%s1010_s3] sm:$0xf] %vm1953_vm0, %v1952_v17 }
 0xcca   : > { %v1949_v18 = vpop.f32.mrf.mxu1 }
 0xccb PF: > { %s3546_s10 = sld [smem:[#allocation30_spill]] }
 0xcd1   : > { %s42_s29 = sadd.s32 1, %s3546_s10  }
 0xcd2   : > { %p39_p7 = scmp.ge.s32.totalorder %s42_s29, 4  }
 0xcd4   :  { %41 = sbr.rel (!%p39_p7) target bundleno = 21 (0x15), region = 215 }
 0xcd9   :  { %1974 = vsyncpa [#allocation4], 1 }
 0xcda   :  { %1976 = vsyncpa [#allocation4 + $0x1], 1 }
 0xcdb   :  { %1977 = vsyncpa [#allocation6], 1 }
 0xcdc   :  { %1978 = vsyncpa [#allocation9], 1 }
 0xcdd   :  { %1979 = vsyncpa [#allocation12], 1 }
 0xcde   :  { %1980 = vsyncpa [#allocation15], 1 }
 0xcdf   :  { %1981 = vsyncpa [#allocation18], 1 }
 0xce0   :  { %1982 = vsyncpa [#allocation21], 1 }

</bundles_post_ra>
